<compile_context>
chip_gen: v7x
topology: tpu7x:2x2x1
jax: 0.10.0
libtpu: 0.0.40
codegen_flags: <defaults>
</compile_context>

<pallas_src>
import math

import jax
import jax.numpy as jnp
from jax.experimental import pallas as pl
from jax.experimental.pallas import tpu as pltpu


def conv2d_3x3_s2_p1(x, weight, bias):
    """Conv2d(3, 3, kernel_size=3, stride=2, padding=1) forward.

    x:      (N, C_in, H, W)   NCHW, float32
    weight: (C_out, C_in, 3, 3)
    bias:   (C_out,)
    returns (N, C_out, H_o, W_o) NCHW
    """
    N, C_in, H, W = x.shape
    C_out, C_in_w, K, K2 = weight.shape
    assert C_in_w == C_in and K == 3 and K2 == 3
    stride, pad = 2, 1
    H_o = (H + 2 * pad - K) // stride + 1
    W_o = (W + 2 * pad - K) // stride + 1
    CKK = C_in * K * K

    # ---- batch blocking: Nb images per grid step, batch on the lane axis ------
    Nb = min(N, 128)                 # one lane-tile of images per grid step
    G = pl.cdiv(N, Nb)
    N_pad = G * Nb
    if N_pad != N:
        x = jnp.pad(x, ((0, N_pad - N), (0, 0), (0, 0), (0, 0)))

    # ---- cheap layout prep (no im2col matrix; ~1.3x input bytes, one copy) ----
    # Pad spatially so the padded dims are exactly 2*(H_o+1) x 2*(W_o+1).  The 2x2
    # parity split is a pure re-tiling of the padded input:
    #   phases[2*p+q, c, i, j, n] = x_pad[n, c, 2*i + p, 2*j + q]
    # and conv tap (kh, kw) is phase (kh&1, kw&1) shifted by (kh>>1, kw>>1).
    # pad + reshape + transpose is written as a single chain so XLA fuses it into
    # one HBM copy pass in front of the kernel (per perf review).
    Hp, Wp = 2 * (H_o + 1), 2 * (W_o + 1)
    x_pad = jnp.pad(x, ((0, 0), (0, 0), (pad, Hp - H - pad), (pad, Wp - W - pad)))
    phases = (
        x_pad.reshape(N_pad, C_in, H_o + 1, 2, W_o + 1, 2)
        .transpose(3, 5, 1, 2, 4, 0)                   # (p, q, c, i, j, n)
        .reshape(4, C_in, H_o + 1, W_o + 1, N_pad)     # batch last = lane axis
    )

    w_flat = weight.reshape(-1).astype(jnp.float32)    # (C_out*C_in*K*K,) -> SMEM
    b_flat = bias.reshape(-1).astype(jnp.float32)      # (C_out,)          -> SMEM

    def kernel(ph_ref, w_ref, b_ref, o_ref):
        nb = o_ref.shape[-1]
        # Bias-initialized accumulators, one per output channel; (H_o, W_o, nb)
        # tiles are lane-dense (8 full sublanes x nb lanes).
        accs = [jnp.full((H_o, W_o, nb), b_ref[co], dtype=jnp.float32)
                for co in range(C_out)]
        for ci in range(C_in):
            for ph in range(4):                        # phase index = 2*p + q
                p, q = ph >> 1, ph & 1
                khs = [k for k in range(K) if (k & 1) == p]
                kws = [k for k in range(K) if (k & 1) == q]
                plane = ph_ref[ph, ci]                 # (H_o+1, W_o+1, nb), one load
                # dw=0 / dw=1 variants of this plane.  The dw=1 shift is the only
                # cross-sublane relayout and happens once per plane (6x per batch
                # block) instead of once per tap; every per-tap slice below is a
                # free leading-dim / tile-aligned selection.
                plane_w0 = plane[:, :W_o, :]           # aligned [0:8] of 9 sublanes
                plane_w1 = plane[:, 1:, :] if any(kw >> 1 for kw in kws) else None
                for kh in khs:
                    dh = kh >> 1                       # free leading-dim shift
                    for kw in kws:
                        dw = kw >> 1
                        src = plane_w1 if dw else plane_w0
                        tap = src[dh:dh + H_o]         # (H_o, W_o, nb)
                        # tap-outer / channel-inner: one live tap, FMA into all
                        # output channels, then drop it (caps vreg pressure).
                        for co in range(C_out):
                            w = w_ref[co * CKK + ci * K * K + kh * K + kw]
                            accs[co] = accs[co] + w * tap
        for co in range(C_out):
            o_ref[co] = accs[co].astype(o_ref.dtype)

    flops = 2 * N_pad * C_out * CKK * H_o * W_o
    bytes_accessed = 4 * (phases.size + w_flat.size + b_flat.size
                          + C_out * H_o * W_o * N_pad)

    out_cl = pl.pallas_call(
        kernel,
        out_shape=jax.ShapeDtypeStruct((C_out, H_o, W_o, N_pad), x.dtype),
        grid=(G,),   # batch blocks: pipelined DMA; megacore-parallel when G >= 2
        in_specs=[
            pl.BlockSpec((4, C_in, H_o + 1, W_o + 1, Nb),
                         lambda g: (0, 0, 0, 0, g)),
            pl.BlockSpec(memory_space=pltpu.MemorySpace.SMEM),  # weights (flat)
            pl.BlockSpec(memory_space=pltpu.MemorySpace.SMEM),  # bias
        ],
        out_specs=pl.BlockSpec((C_out, H_o, W_o, Nb), lambda g: (0, 0, 0, g)),
        compiler_params=pltpu.CompilerParams(
            dimension_semantics=("parallel",),
        ),
        cost_estimate=pl.CostEstimate(
            flops=flops, transcendentals=0, bytes_accessed=bytes_accessed),
    )(phases, w_flat, b_flat)

    # (C_out, H_o, W_o, N_pad) -> NCHW; cheap XLA transpose on the small output.
    return out_cl.transpose(3, 0, 1, 2)[:N]


if __name__ == "__main__":
    key = jax.random.PRNGKey(0)
    kx, kw, kb = jax.random.split(key, 3)

    # shapes consistent with the module: in_channels must be 3
    N, C_in, H, W = 2, 3, 16, 16
    C_out, K = 3, 3

    x = jax.random.normal(kx, (N, C_in, H, W), dtype=jnp.float32)

    # deterministic PyTorch-style init: uniform(-1/sqrt(fan_in), 1/sqrt(fan_in))
    fan_in = C_in * K * K
    bound = 1.0 / math.sqrt(fan_in)
    weight = jax.random.uniform(kw, (C_out, C_in, K, K), jnp.float32, -bound, bound)
    bias = jax.random.uniform(kb, (C_out,), jnp.float32, -bound, bound)

    y = jax.jit(conv2d_3x3_s2_p1)(x, weight, bias)
    y = jax.block_until_ready(y)

    # sanity check against the XLA conv reference
    y_ref = jax.lax.conv_general_dilated(
        x, weight, window_strides=(2, 2), padding=((1, 1), (1, 1)),
        dimension_numbers=("NCHW", "OIHW", "NCHW"),
    ) + bias.reshape(1, C_out, 1, 1)

    H_o = (H + 2 - K) // 2 + 1
    W_o = (W + 2 - K) // 2 + 1
    assert y.shape == (N, C_out, H_o, W_o), y.shape
    assert jnp.allclose(y, y_ref, atol=1e-4, rtol=1e-4)

    print("KERNEL_OK")
</pallas_src>

<mosaic_0001>
module attributes {stable_mosaic.version = 11 : i64} {
  func.func @kernel(%arg0: i32, %arg1: memref<4x3x9x9x2xf32, #tpu.memory_space<vmem>>, %arg2: memref<81xf32, #tpu.memory_space<smem>>, %arg3: memref<3xf32, #tpu.memory_space<smem>>, %arg4: memref<3x8x8x2xf32, #tpu.memory_space<vmem>>) attributes {dimension_semantics = [#tpu.dimension_semantics<parallel>], iteration_bounds = array<i64: 1>, scalar_prefetch = 0 : i64, scratch_operands = 0 : i64, tpu.core_type = #tpu.core_type<tc>, window_params = [{transform_indices = @transform_0, window_bounds = array<i64: 4, 3, 9, 9, 2>}, {transform_indices = @transform_1, window_bounds = array<i64: 81>}, {transform_indices = @transform_2, window_bounds = array<i64: 3>}, {transform_indices = @transform_3, window_bounds = array<i64: 3, 8, 8, 2>}]} {
    %c0 = arith.constant 0 : index
    %0 = memref.load %arg3[%c0] : memref<3xf32, #tpu.memory_space<smem>>
    %1 = vector.broadcast %0 : f32 to vector<8x8x2xf32>
    %c1 = arith.constant 1 : index
    %2 = memref.load %arg3[%c1] : memref<3xf32, #tpu.memory_space<smem>>
    %3 = vector.broadcast %2 : f32 to vector<8x8x2xf32>
    %c2 = arith.constant 2 : index
    %4 = memref.load %arg3[%c2] : memref<3xf32, #tpu.memory_space<smem>>
    %5 = vector.broadcast %4 : f32 to vector<8x8x2xf32>
    %c0_0 = arith.constant 0 : index
    %c0_1 = arith.constant 0 : index
    %c0_2 = arith.constant 0 : index
    %c0_3 = arith.constant 0 : index
    %c0_4 = arith.constant 0 : index
    %6 = vector.load %arg1[%c0_0, %c0_1, %c0_2, %c0_3, %c0_4] : memref<4x3x9x9x2xf32, #tpu.memory_space<vmem>>, vector<1x1x9x9x2xf32>
    %7 = vector.shape_cast %6 : vector<1x1x9x9x2xf32> to vector<9x9x2xf32>
    %8 = vector.extract_strided_slice %7 {offsets = [0, 0, 0], sizes = [9, 8, 2], strides = [1, 1, 1]} : vector<9x9x2xf32> to vector<9x8x2xf32>
    %9 = vector.extract_strided_slice %7 {offsets = [0, 1, 0], sizes = [9, 8, 2], strides = [1, 1, 1]} : vector<9x9x2xf32> to vector<9x8x2xf32>
    %10 = vector.extract_strided_slice %8 {offsets = [0, 0, 0], sizes = [8, 8, 2], strides = [1, 1, 1]} : vector<9x8x2xf32> to vector<8x8x2xf32>
    %c0_5 = arith.constant 0 : index
    %11 = memref.load %arg2[%c0_5] : memref<81xf32, #tpu.memory_space<smem>>
    %12 = vector.broadcast %11 : f32 to vector<8x8x2xf32>
    %13 = arith.mulf %12, %10 : vector<8x8x2xf32>
    %14 = arith.addf %1, %13 : vector<8x8x2xf32>
    %c27 = arith.constant 27 : index
    %15 = memref.load %arg2[%c27] : memref<81xf32, #tpu.memory_space<smem>>
    %16 = vector.broadcast %15 : f32 to vector<8x8x2xf32>
    %17 = arith.mulf %16, %10 : vector<8x8x2xf32>
    %18 = arith.addf %3, %17 : vector<8x8x2xf32>
    %c54 = arith.constant 54 : index
    %19 = memref.load %arg2[%c54] : memref<81xf32, #tpu.memory_space<smem>>
    %20 = vector.broadcast %19 : f32 to vector<8x8x2xf32>
    %21 = arith.mulf %20, %10 : vector<8x8x2xf32>
    %22 = arith.addf %5, %21 : vector<8x8x2xf32>
    %23 = vector.extract_strided_slice %9 {offsets = [0, 0, 0], sizes = [8, 8, 2], strides = [1, 1, 1]} : vector<9x8x2xf32> to vector<8x8x2xf32>
    %c2_6 = arith.constant 2 : index
    %24 = memref.load %arg2[%c2_6] : memref<81xf32, #tpu.memory_space<smem>>
    %25 = vector.broadcast %24 : f32 to vector<8x8x2xf32>
    %26 = arith.mulf %25, %23 : vector<8x8x2xf32>
    %27 = arith.addf %14, %26 : vector<8x8x2xf32>
    %c29 = arith.constant 29 : index
    %28 = memref.load %arg2[%c29] : memref<81xf32, #tpu.memory_space<smem>>
    %29 = vector.broadcast %28 : f32 to vector<8x8x2xf32>
    %30 = arith.mulf %29, %23 : vector<8x8x2xf32>
    %31 = arith.addf %18, %30 : vector<8x8x2xf32>
    %c56 = arith.constant 56 : index
    %32 = memref.load %arg2[%c56] : memref<81xf32, #tpu.memory_space<smem>>
    %33 = vector.broadcast %32 : f32 to vector<8x8x2xf32>
    %34 = arith.mulf %33, %23 : vector<8x8x2xf32>
    %35 = arith.addf %22, %34 : vector<8x8x2xf32>
    %36 = vector.extract_strided_slice %8 {offsets = [1, 0, 0], sizes = [8, 8, 2], strides = [1, 1, 1]} : vector<9x8x2xf32> to vector<8x8x2xf32>
    %c6 = arith.constant 6 : index
    %37 = memref.load %arg2[%c6] : memref<81xf32, #tpu.memory_space<smem>>
    %38 = vector.broadcast %37 : f32 to vector<8x8x2xf32>
    %39 = arith.mulf %38, %36 : vector<8x8x2xf32>
    %40 = arith.addf %27, %39 : vector<8x8x2xf32>
    %c33 = arith.constant 33 : index
    %41 = memref.load %arg2[%c33] : memref<81xf32, #tpu.memory_space<smem>>
    %42 = vector.broadcast %41 : f32 to vector<8x8x2xf32>
    %43 = arith.mulf %42, %36 : vector<8x8x2xf32>
    %44 = arith.addf %31, %43 : vector<8x8x2xf32>
    %c60 = arith.constant 60 : index
    %45 = memref.load %arg2[%c60] : memref<81xf32, #tpu.memory_space<smem>>
    %46 = vector.broadcast %45 : f32 to vector<8x8x2xf32>
    %47 = arith.mulf %46, %36 : vector<8x8x2xf32>
    %48 = arith.addf %35, %47 : vector<8x8x2xf32>
    %49 = vector.extract_strided_slice %9 {offsets = [1, 0, 0], sizes = [8, 8, 2], strides = [1, 1, 1]} : vector<9x8x2xf32> to vector<8x8x2xf32>
    %c8 = arith.constant 8 : index
    %50 = memref.load %arg2[%c8] : memref<81xf32, #tpu.memory_space<smem>>
    %51 = vector.broadcast %50 : f32 to vector<8x8x2xf32>
    %52 = arith.mulf %51, %49 : vector<8x8x2xf32>
    %53 = arith.addf %40, %52 : vector<8x8x2xf32>
    %c35 = arith.constant 35 : index
    %54 = memref.load %arg2[%c35] : memref<81xf32, #tpu.memory_space<smem>>
    %55 = vector.broadcast %54 : f32 to vector<8x8x2xf32>
    %56 = arith.mulf %55, %49 : vector<8x8x2xf32>
    %57 = arith.addf %44, %56 : vector<8x8x2xf32>
    %c62 = arith.constant 62 : index
    %58 = memref.load %arg2[%c62] : memref<81xf32, #tpu.memory_space<smem>>
    %59 = vector.broadcast %58 : f32 to vector<8x8x2xf32>
    %60 = arith.mulf %59, %49 : vector<8x8x2xf32>
    %61 = arith.addf %48, %60 : vector<8x8x2xf32>
    %c1_7 = arith.constant 1 : index
    %c0_8 = arith.constant 0 : index
    %c0_9 = arith.constant 0 : index
    %c0_10 = arith.constant 0 : index
    %c0_11 = arith.constant 0 : index
    %62 = vector.load %arg1[%c1_7, %c0_8, %c0_9, %c0_10, %c0_11] : memref<4x3x9x9x2xf32, #tpu.memory_space<vmem>>, vector<1x1x9x9x2xf32>
    %63 = vector.shape_cast %62 : vector<1x1x9x9x2xf32> to vector<9x9x2xf32>
    %64 = vector.extract_strided_slice %63 {offsets = [0, 0, 0], sizes = [9, 8, 2], strides = [1, 1, 1]} : vector<9x9x2xf32> to vector<9x8x2xf32>
    %65 = vector.extract_strided_slice %64 {offsets = [0, 0, 0], sizes = [8, 8, 2], strides = [1, 1, 1]} : vector<9x8x2xf32> to vector<8x8x2xf32>
    %c1_12 = arith.constant 1 : index
    %66 = memref.load %arg2[%c1_12] : memref<81xf32, #tpu.memory_space<smem>>
    %67 = vector.broadcast %66 : f32 to vector<8x8x2xf32>
    %68 = arith.mulf %67, %65 : vector<8x8x2xf32>
    %69 = arith.addf %53, %68 : vector<8x8x2xf32>
    %c28 = arith.constant 28 : index
    %70 = memref.load %arg2[%c28] : memref<81xf32, #tpu.memory_space<smem>>
    %71 = vector.broadcast %70 : f32 to vector<8x8x2xf32>
    %72 = arith.mulf %71, %65 : vector<8x8x2xf32>
    %73 = arith.addf %57, %72 : vector<8x8x2xf32>
    %c55 = arith.constant 55 : index
    %74 = memref.load %arg2[%c55] : memref<81xf32, #tpu.memory_space<smem>>
    %75 = vector.broadcast %74 : f32 to vector<8x8x2xf32>
    %76 = arith.mulf %75, %65 : vector<8x8x2xf32>
    %77 = arith.addf %61, %76 : vector<8x8x2xf32>
    %78 = vector.extract_strided_slice %64 {offsets = [1, 0, 0], sizes = [8, 8, 2], strides = [1, 1, 1]} : vector<9x8x2xf32> to vector<8x8x2xf32>
    %c7 = arith.constant 7 : index
    %79 = memref.load %arg2[%c7] : memref<81xf32, #tpu.memory_space<smem>>
    %80 = vector.broadcast %79 : f32 to vector<8x8x2xf32>
    %81 = arith.mulf %80, %78 : vector<8x8x2xf32>
    %82 = arith.addf %69, %81 : vector<8x8x2xf32>
    %c34 = arith.constant 34 : index
    %83 = memref.load %arg2[%c34] : memref<81xf32, #tpu.memory_space<smem>>
    %84 = vector.broadcast %83 : f32 to vector<8x8x2xf32>
    %85 = arith.mulf %84, %78 : vector<8x8x2xf32>
    %86 = arith.addf %73, %85 : vector<8x8x2xf32>
    %c61 = arith.constant 61 : index
    %87 = memref.load %arg2[%c61] : memref<81xf32, #tpu.memory_space<smem>>
    %88 = vector.broadcast %87 : f32 to vector<8x8x2xf32>
    %89 = arith.mulf %88, %78 : vector<8x8x2xf32>
    %90 = arith.addf %77, %89 : vector<8x8x2xf32>
    %c2_13 = arith.constant 2 : index
    %c0_14 = arith.constant 0 : index
    %c0_15 = arith.constant 0 : index
    %c0_16 = arith.constant 0 : index
    %c0_17 = arith.constant 0 : index
    %91 = vector.load %arg1[%c2_13, %c0_14, %c0_15, %c0_16, %c0_17] : memref<4x3x9x9x2xf32, #tpu.memory_space<vmem>>, vector<1x1x9x9x2xf32>
    %92 = vector.shape_cast %91 : vector<1x1x9x9x2xf32> to vector<9x9x2xf32>
    %93 = vector.extract_strided_slice %92 {offsets = [0, 0, 0], sizes = [9, 8, 2], strides = [1, 1, 1]} : vector<9x9x2xf32> to vector<9x8x2xf32>
    %94 = vector.extract_strided_slice %92 {offsets = [0, 1, 0], sizes = [9, 8, 2], strides = [1, 1, 1]} : vector<9x9x2xf32> to vector<9x8x2xf32>
    %95 = vector.extract_strided_slice %93 {offsets = [0, 0, 0], sizes = [8, 8, 2], strides = [1, 1, 1]} : vector<9x8x2xf32> to vector<8x8x2xf32>
    %c3 = arith.constant 3 : index
    %96 = memref.load %arg2[%c3] : memref<81xf32, #tpu.memory_space<smem>>
    %97 = vector.broadcast %96 : f32 to vector<8x8x2xf32>
    %98 = arith.mulf %97, %95 : vector<8x8x2xf32>
    %99 = arith.addf %82, %98 : vector<8x8x2xf32>
    %c30 = arith.constant 30 : index
    %100 = memref.load %arg2[%c30] : memref<81xf32, #tpu.memory_space<smem>>
    %101 = vector.broadcast %100 : f32 to vector<8x8x2xf32>
    %102 = arith.mulf %101, %95 : vector<8x8x2xf32>
    %103 = arith.addf %86, %102 : vector<8x8x2xf32>
    %c57 = arith.constant 57 : index
    %104 = memref.load %arg2[%c57] : memref<81xf32, #tpu.memory_space<smem>>
    %105 = vector.broadcast %104 : f32 to vector<8x8x2xf32>
    %106 = arith.mulf %105, %95 : vector<8x8x2xf32>
    %107 = arith.addf %90, %106 : vector<8x8x2xf32>
    %108 = vector.extract_strided_slice %94 {offsets = [0, 0, 0], sizes = [8, 8, 2], strides = [1, 1, 1]} : vector<9x8x2xf32> to vector<8x8x2xf32>
    %c5 = arith.constant 5 : index
    %109 = memref.load %arg2[%c5] : memref<81xf32, #tpu.memory_space<smem>>
    %110 = vector.broadcast %109 : f32 to vector<8x8x2xf32>
    %111 = arith.mulf %110, %108 : vector<8x8x2xf32>
    %112 = arith.addf %99, %111 : vector<8x8x2xf32>
    %c32 = arith.constant 32 : index
    %113 = memref.load %arg2[%c32] : memref<81xf32, #tpu.memory_space<smem>>
    %114 = vector.broadcast %113 : f32 to vector<8x8x2xf32>
    %115 = arith.mulf %114, %108 : vector<8x8x2xf32>
    %116 = arith.addf %103, %115 : vector<8x8x2xf32>
    %c59 = arith.constant 59 : index
    %117 = memref.load %arg2[%c59] : memref<81xf32, #tpu.memory_space<smem>>
    %118 = vector.broadcast %117 : f32 to vector<8x8x2xf32>
    %119 = arith.mulf %118, %108 : vector<8x8x2xf32>
    %120 = arith.addf %107, %119 : vector<8x8x2xf32>
    %c3_18 = arith.constant 3 : index
    %c0_19 = arith.constant 0 : index
    %c0_20 = arith.constant 0 : index
    %c0_21 = arith.constant 0 : index
    %c0_22 = arith.constant 0 : index
    %121 = vector.load %arg1[%c3_18, %c0_19, %c0_20, %c0_21, %c0_22] : memref<4x3x9x9x2xf32, #tpu.memory_space<vmem>>, vector<1x1x9x9x2xf32>
    %122 = vector.shape_cast %121 : vector<1x1x9x9x2xf32> to vector<9x9x2xf32>
    %123 = vector.extract_strided_slice %122 {offsets = [0, 0, 0], sizes = [9, 8, 2], strides = [1, 1, 1]} : vector<9x9x2xf32> to vector<9x8x2xf32>
    %124 = vector.extract_strided_slice %123 {offsets = [0, 0, 0], sizes = [8, 8, 2], strides = [1, 1, 1]} : vector<9x8x2xf32> to vector<8x8x2xf32>
    %c4 = arith.constant 4 : index
    %125 = memref.load %arg2[%c4] : memref<81xf32, #tpu.memory_space<smem>>
    %126 = vector.broadcast %125 : f32 to vector<8x8x2xf32>
    %127 = arith.mulf %126, %124 : vector<8x8x2xf32>
    %128 = arith.addf %112, %127 : vector<8x8x2xf32>
    %c31 = arith.constant 31 : index
    %129 = memref.load %arg2[%c31] : memref<81xf32, #tpu.memory_space<smem>>
    %130 = vector.broadcast %129 : f32 to vector<8x8x2xf32>
    %131 = arith.mulf %130, %124 : vector<8x8x2xf32>
    %132 = arith.addf %116, %131 : vector<8x8x2xf32>
    %c58 = arith.constant 58 : index
    %133 = memref.load %arg2[%c58] : memref<81xf32, #tpu.memory_space<smem>>
    %134 = vector.broadcast %133 : f32 to vector<8x8x2xf32>
    %135 = arith.mulf %134, %124 : vector<8x8x2xf32>
    %136 = arith.addf %120, %135 : vector<8x8x2xf32>
    %c0_23 = arith.constant 0 : index
    %c1_24 = arith.constant 1 : index
    %c0_25 = arith.constant 0 : index
    %c0_26 = arith.constant 0 : index
    %c0_27 = arith.constant 0 : index
    %137 = vector.load %arg1[%c0_23, %c1_24, %c0_25, %c0_26, %c0_27] : memref<4x3x9x9x2xf32, #tpu.memory_space<vmem>>, vector<1x1x9x9x2xf32>
    %138 = vector.shape_cast %137 : vector<1x1x9x9x2xf32> to vector<9x9x2xf32>
    %139 = vector.extract_strided_slice %138 {offsets = [0, 0, 0], sizes = [9, 8, 2], strides = [1, 1, 1]} : vector<9x9x2xf32> to vector<9x8x2xf32>
    %140 = vector.extract_strided_slice %138 {offsets = [0, 1, 0], sizes = [9, 8, 2], strides = [1, 1, 1]} : vector<9x9x2xf32> to vector<9x8x2xf32>
    %141 = vector.extract_strided_slice %139 {offsets = [0, 0, 0], sizes = [8, 8, 2], strides = [1, 1, 1]} : vector<9x8x2xf32> to vector<8x8x2xf32>
    %c9 = arith.constant 9 : index
    %142 = memref.load %arg2[%c9] : memref<81xf32, #tpu.memory_space<smem>>
    %143 = vector.broadcast %142 : f32 to vector<8x8x2xf32>
    %144 = arith.mulf %143, %141 : vector<8x8x2xf32>
    %145 = arith.addf %128, %144 : vector<8x8x2xf32>
    %c36 = arith.constant 36 : index
    %146 = memref.load %arg2[%c36] : memref<81xf32, #tpu.memory_space<smem>>
    %147 = vector.broadcast %146 : f32 to vector<8x8x2xf32>
    %148 = arith.mulf %147, %141 : vector<8x8x2xf32>
    %149 = arith.addf %132, %148 : vector<8x8x2xf32>
    %c63 = arith.constant 63 : index
    %150 = memref.load %arg2[%c63] : memref<81xf32, #tpu.memory_space<smem>>
    %151 = vector.broadcast %150 : f32 to vector<8x8x2xf32>
    %152 = arith.mulf %151, %141 : vector<8x8x2xf32>
    %153 = arith.addf %136, %152 : vector<8x8x2xf32>
    %154 = vector.extract_strided_slice %140 {offsets = [0, 0, 0], sizes = [8, 8, 2], strides = [1, 1, 1]} : vector<9x8x2xf32> to vector<8x8x2xf32>
    %c11 = arith.constant 11 : index
    %155 = memref.load %arg2[%c11] : memref<81xf32, #tpu.memory_space<smem>>
    %156 = vector.broadcast %155 : f32 to vector<8x8x2xf32>
    %157 = arith.mulf %156, %154 : vector<8x8x2xf32>
    %158 = arith.addf %145, %157 : vector<8x8x2xf32>
    %c38 = arith.constant 38 : index
    %159 = memref.load %arg2[%c38] : memref<81xf32, #tpu.memory_space<smem>>
    %160 = vector.broadcast %159 : f32 to vector<8x8x2xf32>
    %161 = arith.mulf %160, %154 : vector<8x8x2xf32>
    %162 = arith.addf %149, %161 : vector<8x8x2xf32>
    %c65 = arith.constant 65 : index
    %163 = memref.load %arg2[%c65] : memref<81xf32, #tpu.memory_space<smem>>
    %164 = vector.broadcast %163 : f32 to vector<8x8x2xf32>
    %165 = arith.mulf %164, %154 : vector<8x8x2xf32>
    %166 = arith.addf %153, %165 : vector<8x8x2xf32>
    %167 = vector.extract_strided_slice %139 {offsets = [1, 0, 0], sizes = [8, 8, 2], strides = [1, 1, 1]} : vector<9x8x2xf32> to vector<8x8x2xf32>
    %c15 = arith.constant 15 : index
    %168 = memref.load %arg2[%c15] : memref<81xf32, #tpu.memory_space<smem>>
    %169 = vector.broadcast %168 : f32 to vector<8x8x2xf32>
    %170 = arith.mulf %169, %167 : vector<8x8x2xf32>
    %171 = arith.addf %158, %170 : vector<8x8x2xf32>
    %c42 = arith.constant 42 : index
    %172 = memref.load %arg2[%c42] : memref<81xf32, #tpu.memory_space<smem>>
    %173 = vector.broadcast %172 : f32 to vector<8x8x2xf32>
    %174 = arith.mulf %173, %167 : vector<8x8x2xf32>
    %175 = arith.addf %162, %174 : vector<8x8x2xf32>
    %c69 = arith.constant 69 : index
    %176 = memref.load %arg2[%c69] : memref<81xf32, #tpu.memory_space<smem>>
    %177 = vector.broadcast %176 : f32 to vector<8x8x2xf32>
    %178 = arith.mulf %177, %167 : vector<8x8x2xf32>
    %179 = arith.addf %166, %178 : vector<8x8x2xf32>
    %180 = vector.extract_strided_slice %140 {offsets = [1, 0, 0], sizes = [8, 8, 2], strides = [1, 1, 1]} : vector<9x8x2xf32> to vector<8x8x2xf32>
    %c17 = arith.constant 17 : index
    %181 = memref.load %arg2[%c17] : memref<81xf32, #tpu.memory_space<smem>>
    %182 = vector.broadcast %181 : f32 to vector<8x8x2xf32>
    %183 = arith.mulf %182, %180 : vector<8x8x2xf32>
    %184 = arith.addf %171, %183 : vector<8x8x2xf32>
    %c44 = arith.constant 44 : index
    %185 = memref.load %arg2[%c44] : memref<81xf32, #tpu.memory_space<smem>>
    %186 = vector.broadcast %185 : f32 to vector<8x8x2xf32>
    %187 = arith.mulf %186, %180 : vector<8x8x2xf32>
    %188 = arith.addf %175, %187 : vector<8x8x2xf32>
    %c71 = arith.constant 71 : index
    %189 = memref.load %arg2[%c71] : memref<81xf32, #tpu.memory_space<smem>>
    %190 = vector.broadcast %189 : f32 to vector<8x8x2xf32>
    %191 = arith.mulf %190, %180 : vector<8x8x2xf32>
    %192 = arith.addf %179, %191 : vector<8x8x2xf32>
    %c1_28 = arith.constant 1 : index
    %c1_29 = arith.constant 1 : index
    %c0_30 = arith.constant 0 : index
    %c0_31 = arith.constant 0 : index
    %c0_32 = arith.constant 0 : index
    %193 = vector.load %arg1[%c1_28, %c1_29, %c0_30, %c0_31, %c0_32] : memref<4x3x9x9x2xf32, #tpu.memory_space<vmem>>, vector<1x1x9x9x2xf32>
    %194 = vector.shape_cast %193 : vector<1x1x9x9x2xf32> to vector<9x9x2xf32>
    %195 = vector.extract_strided_slice %194 {offsets = [0, 0, 0], sizes = [9, 8, 2], strides = [1, 1, 1]} : vector<9x9x2xf32> to vector<9x8x2xf32>
    %196 = vector.extract_strided_slice %195 {offsets = [0, 0, 0], sizes = [8, 8, 2], strides = [1, 1, 1]} : vector<9x8x2xf32> to vector<8x8x2xf32>
    %c10 = arith.constant 10 : index
    %197 = memref.load %arg2[%c10] : memref<81xf32, #tpu.memory_space<smem>>
    %198 = vector.broadcast %197 : f32 to vector<8x8x2xf32>
    %199 = arith.mulf %198, %196 : vector<8x8x2xf32>
    %200 = arith.addf %184, %199 : vector<8x8x2xf32>
    %c37 = arith.constant 37 : index
    %201 = memref.load %arg2[%c37] : memref<81xf32, #tpu.memory_space<smem>>
    %202 = vector.broadcast %201 : f32 to vector<8x8x2xf32>
    %203 = arith.mulf %202, %196 : vector<8x8x2xf32>
    %204 = arith.addf %188, %203 : vector<8x8x2xf32>
    %c64 = arith.constant 64 : index
    %205 = memref.load %arg2[%c64] : memref<81xf32, #tpu.memory_space<smem>>
    %206 = vector.broadcast %205 : f32 to vector<8x8x2xf32>
    %207 = arith.mulf %206, %196 : vector<8x8x2xf32>
    %208 = arith.addf %192, %207 : vector<8x8x2xf32>
    %209 = vector.extract_strided_slice %195 {offsets = [1, 0, 0], sizes = [8, 8, 2], strides = [1, 1, 1]} : vector<9x8x2xf32> to vector<8x8x2xf32>
    %c16 = arith.constant 16 : index
    %210 = memref.load %arg2[%c16] : memref<81xf32, #tpu.memory_space<smem>>
    %211 = vector.broadcast %210 : f32 to vector<8x8x2xf32>
    %212 = arith.mulf %211, %209 : vector<8x8x2xf32>
    %213 = arith.addf %200, %212 : vector<8x8x2xf32>
    %c43 = arith.constant 43 : index
    %214 = memref.load %arg2[%c43] : memref<81xf32, #tpu.memory_space<smem>>
    %215 = vector.broadcast %214 : f32 to vector<8x8x2xf32>
    %216 = arith.mulf %215, %209 : vector<8x8x2xf32>
    %217 = arith.addf %204, %216 : vector<8x8x2xf32>
    %c70 = arith.constant 70 : index
    %218 = memref.load %arg2[%c70] : memref<81xf32, #tpu.memory_space<smem>>
    %219 = vector.broadcast %218 : f32 to vector<8x8x2xf32>
    %220 = arith.mulf %219, %209 : vector<8x8x2xf32>
    %221 = arith.addf %208, %220 : vector<8x8x2xf32>
    %c2_33 = arith.constant 2 : index
    %c1_34 = arith.constant 1 : index
    %c0_35 = arith.constant 0 : index
    %c0_36 = arith.constant 0 : index
    %c0_37 = arith.constant 0 : index
    %222 = vector.load %arg1[%c2_33, %c1_34, %c0_35, %c0_36, %c0_37] : memref<4x3x9x9x2xf32, #tpu.memory_space<vmem>>, vector<1x1x9x9x2xf32>
    %223 = vector.shape_cast %222 : vector<1x1x9x9x2xf32> to vector<9x9x2xf32>
    %224 = vector.extract_strided_slice %223 {offsets = [0, 0, 0], sizes = [9, 8, 2], strides = [1, 1, 1]} : vector<9x9x2xf32> to vector<9x8x2xf32>
    %225 = vector.extract_strided_slice %223 {offsets = [0, 1, 0], sizes = [9, 8, 2], strides = [1, 1, 1]} : vector<9x9x2xf32> to vector<9x8x2xf32>
    %226 = vector.extract_strided_slice %224 {offsets = [0, 0, 0], sizes = [8, 8, 2], strides = [1, 1, 1]} : vector<9x8x2xf32> to vector<8x8x2xf32>
    %c12 = arith.constant 12 : index
    %227 = memref.load %arg2[%c12] : memref<81xf32, #tpu.memory_space<smem>>
    %228 = vector.broadcast %227 : f32 to vector<8x8x2xf32>
    %229 = arith.mulf %228, %226 : vector<8x8x2xf32>
    %230 = arith.addf %213, %229 : vector<8x8x2xf32>
    %c39 = arith.constant 39 : index
    %231 = memref.load %arg2[%c39] : memref<81xf32, #tpu.memory_space<smem>>
    %232 = vector.broadcast %231 : f32 to vector<8x8x2xf32>
    %233 = arith.mulf %232, %226 : vector<8x8x2xf32>
    %234 = arith.addf %217, %233 : vector<8x8x2xf32>
    %c66 = arith.constant 66 : index
    %235 = memref.load %arg2[%c66] : memref<81xf32, #tpu.memory_space<smem>>
    %236 = vector.broadcast %235 : f32 to vector<8x8x2xf32>
    %237 = arith.mulf %236, %226 : vector<8x8x2xf32>
    %238 = arith.addf %221, %237 : vector<8x8x2xf32>
    %239 = vector.extract_strided_slice %225 {offsets = [0, 0, 0], sizes = [8, 8, 2], strides = [1, 1, 1]} : vector<9x8x2xf32> to vector<8x8x2xf32>
    %c14 = arith.constant 14 : index
    %240 = memref.load %arg2[%c14] : memref<81xf32, #tpu.memory_space<smem>>
    %241 = vector.broadcast %240 : f32 to vector<8x8x2xf32>
    %242 = arith.mulf %241, %239 : vector<8x8x2xf32>
    %243 = arith.addf %230, %242 : vector<8x8x2xf32>
    %c41 = arith.constant 41 : index
    %244 = memref.load %arg2[%c41] : memref<81xf32, #tpu.memory_space<smem>>
    %245 = vector.broadcast %244 : f32 to vector<8x8x2xf32>
    %246 = arith.mulf %245, %239 : vector<8x8x2xf32>
    %247 = arith.addf %234, %246 : vector<8x8x2xf32>
    %c68 = arith.constant 68 : index
    %248 = memref.load %arg2[%c68] : memref<81xf32, #tpu.memory_space<smem>>
    %249 = vector.broadcast %248 : f32 to vector<8x8x2xf32>
    %250 = arith.mulf %249, %239 : vector<8x8x2xf32>
    %251 = arith.addf %238, %250 : vector<8x8x2xf32>
    %c3_38 = arith.constant 3 : index
    %c1_39 = arith.constant 1 : index
    %c0_40 = arith.constant 0 : index
    %c0_41 = arith.constant 0 : index
    %c0_42 = arith.constant 0 : index
    %252 = vector.load %arg1[%c3_38, %c1_39, %c0_40, %c0_41, %c0_42] : memref<4x3x9x9x2xf32, #tpu.memory_space<vmem>>, vector<1x1x9x9x2xf32>
    %253 = vector.shape_cast %252 : vector<1x1x9x9x2xf32> to vector<9x9x2xf32>
    %254 = vector.extract_strided_slice %253 {offsets = [0, 0, 0], sizes = [9, 8, 2], strides = [1, 1, 1]} : vector<9x9x2xf32> to vector<9x8x2xf32>
    %255 = vector.extract_strided_slice %254 {offsets = [0, 0, 0], sizes = [8, 8, 2], strides = [1, 1, 1]} : vector<9x8x2xf32> to vector<8x8x2xf32>
    %c13 = arith.constant 13 : index
    %256 = memref.load %arg2[%c13] : memref<81xf32, #tpu.memory_space<smem>>
    %257 = vector.broadcast %256 : f32 to vector<8x8x2xf32>
    %258 = arith.mulf %257, %255 : vector<8x8x2xf32>
    %259 = arith.addf %243, %258 : vector<8x8x2xf32>
    %c40 = arith.constant 40 : index
    %260 = memref.load %arg2[%c40] : memref<81xf32, #tpu.memory_space<smem>>
    %261 = vector.broadcast %260 : f32 to vector<8x8x2xf32>
    %262 = arith.mulf %261, %255 : vector<8x8x2xf32>
    %263 = arith.addf %247, %262 : vector<8x8x2xf32>
    %c67 = arith.constant 67 : index
    %264 = memref.load %arg2[%c67] : memref<81xf32, #tpu.memory_space<smem>>
    %265 = vector.broadcast %264 : f32 to vector<8x8x2xf32>
    %266 = arith.mulf %265, %255 : vector<8x8x2xf32>
    %267 = arith.addf %251, %266 : vector<8x8x2xf32>
    %c0_43 = arith.constant 0 : index
    %c2_44 = arith.constant 2 : index
    %c0_45 = arith.constant 0 : index
    %c0_46 = arith.constant 0 : index
    %c0_47 = arith.constant 0 : index
    %268 = vector.load %arg1[%c0_43, %c2_44, %c0_45, %c0_46, %c0_47] : memref<4x3x9x9x2xf32, #tpu.memory_space<vmem>>, vector<1x1x9x9x2xf32>
    %269 = vector.shape_cast %268 : vector<1x1x9x9x2xf32> to vector<9x9x2xf32>
    %270 = vector.extract_strided_slice %269 {offsets = [0, 0, 0], sizes = [9, 8, 2], strides = [1, 1, 1]} : vector<9x9x2xf32> to vector<9x8x2xf32>
    %271 = vector.extract_strided_slice %269 {offsets = [0, 1, 0], sizes = [9, 8, 2], strides = [1, 1, 1]} : vector<9x9x2xf32> to vector<9x8x2xf32>
    %272 = vector.extract_strided_slice %270 {offsets = [0, 0, 0], sizes = [8, 8, 2], strides = [1, 1, 1]} : vector<9x8x2xf32> to vector<8x8x2xf32>
    %c18 = arith.constant 18 : index
    %273 = memref.load %arg2[%c18] : memref<81xf32, #tpu.memory_space<smem>>
    %274 = vector.broadcast %273 : f32 to vector<8x8x2xf32>
    %275 = arith.mulf %274, %272 : vector<8x8x2xf32>
    %276 = arith.addf %259, %275 : vector<8x8x2xf32>
    %c45 = arith.constant 45 : index
    %277 = memref.load %arg2[%c45] : memref<81xf32, #tpu.memory_space<smem>>
    %278 = vector.broadcast %277 : f32 to vector<8x8x2xf32>
    %279 = arith.mulf %278, %272 : vector<8x8x2xf32>
    %280 = arith.addf %263, %279 : vector<8x8x2xf32>
    %c72 = arith.constant 72 : index
    %281 = memref.load %arg2[%c72] : memref<81xf32, #tpu.memory_space<smem>>
    %282 = vector.broadcast %281 : f32 to vector<8x8x2xf32>
    %283 = arith.mulf %282, %272 : vector<8x8x2xf32>
    %284 = arith.addf %267, %283 : vector<8x8x2xf32>
    %285 = vector.extract_strided_slice %271 {offsets = [0, 0, 0], sizes = [8, 8, 2], strides = [1, 1, 1]} : vector<9x8x2xf32> to vector<8x8x2xf32>
    %c20 = arith.constant 20 : index
    %286 = memref.load %arg2[%c20] : memref<81xf32, #tpu.memory_space<smem>>
    %287 = vector.broadcast %286 : f32 to vector<8x8x2xf32>
    %288 = arith.mulf %287, %285 : vector<8x8x2xf32>
    %289 = arith.addf %276, %288 : vector<8x8x2xf32>
    %c47 = arith.constant 47 : index
    %290 = memref.load %arg2[%c47] : memref<81xf32, #tpu.memory_space<smem>>
    %291 = vector.broadcast %290 : f32 to vector<8x8x2xf32>
    %292 = arith.mulf %291, %285 : vector<8x8x2xf32>
    %293 = arith.addf %280, %292 : vector<8x8x2xf32>
    %c74 = arith.constant 74 : index
    %294 = memref.load %arg2[%c74] : memref<81xf32, #tpu.memory_space<smem>>
    %295 = vector.broadcast %294 : f32 to vector<8x8x2xf32>
    %296 = arith.mulf %295, %285 : vector<8x8x2xf32>
    %297 = arith.addf %284, %296 : vector<8x8x2xf32>
    %298 = vector.extract_strided_slice %270 {offsets = [1, 0, 0], sizes = [8, 8, 2], strides = [1, 1, 1]} : vector<9x8x2xf32> to vector<8x8x2xf32>
    %c24 = arith.constant 24 : index
    %299 = memref.load %arg2[%c24] : memref<81xf32, #tpu.memory_space<smem>>
    %300 = vector.broadcast %299 : f32 to vector<8x8x2xf32>
    %301 = arith.mulf %300, %298 : vector<8x8x2xf32>
    %302 = arith.addf %289, %301 : vector<8x8x2xf32>
    %c51 = arith.constant 51 : index
    %303 = memref.load %arg2[%c51] : memref<81xf32, #tpu.memory_space<smem>>
    %304 = vector.broadcast %303 : f32 to vector<8x8x2xf32>
    %305 = arith.mulf %304, %298 : vector<8x8x2xf32>
    %306 = arith.addf %293, %305 : vector<8x8x2xf32>
    %c78 = arith.constant 78 : index
    %307 = memref.load %arg2[%c78] : memref<81xf32, #tpu.memory_space<smem>>
    %308 = vector.broadcast %307 : f32 to vector<8x8x2xf32>
    %309 = arith.mulf %308, %298 : vector<8x8x2xf32>
    %310 = arith.addf %297, %309 : vector<8x8x2xf32>
    %311 = vector.extract_strided_slice %271 {offsets = [1, 0, 0], sizes = [8, 8, 2], strides = [1, 1, 1]} : vector<9x8x2xf32> to vector<8x8x2xf32>
    %c26 = arith.constant 26 : index
    %312 = memref.load %arg2[%c26] : memref<81xf32, #tpu.memory_space<smem>>
    %313 = vector.broadcast %312 : f32 to vector<8x8x2xf32>
    %314 = arith.mulf %313, %311 : vector<8x8x2xf32>
    %315 = arith.addf %302, %314 : vector<8x8x2xf32>
    %c53 = arith.constant 53 : index
    %316 = memref.load %arg2[%c53] : memref<81xf32, #tpu.memory_space<smem>>
    %317 = vector.broadcast %316 : f32 to vector<8x8x2xf32>
    %318 = arith.mulf %317, %311 : vector<8x8x2xf32>
    %319 = arith.addf %306, %318 : vector<8x8x2xf32>
    %c80 = arith.constant 80 : index
    %320 = memref.load %arg2[%c80] : memref<81xf32, #tpu.memory_space<smem>>
    %321 = vector.broadcast %320 : f32 to vector<8x8x2xf32>
    %322 = arith.mulf %321, %311 : vector<8x8x2xf32>
    %323 = arith.addf %310, %322 : vector<8x8x2xf32>
    %c1_48 = arith.constant 1 : index
    %c2_49 = arith.constant 2 : index
    %c0_50 = arith.constant 0 : index
    %c0_51 = arith.constant 0 : index
    %c0_52 = arith.constant 0 : index
    %324 = vector.load %arg1[%c1_48, %c2_49, %c0_50, %c0_51, %c0_52] : memref<4x3x9x9x2xf32, #tpu.memory_space<vmem>>, vector<1x1x9x9x2xf32>
    %325 = vector.shape_cast %324 : vector<1x1x9x9x2xf32> to vector<9x9x2xf32>
    %326 = vector.extract_strided_slice %325 {offsets = [0, 0, 0], sizes = [9, 8, 2], strides = [1, 1, 1]} : vector<9x9x2xf32> to vector<9x8x2xf32>
    %327 = vector.extract_strided_slice %326 {offsets = [0, 0, 0], sizes = [8, 8, 2], strides = [1, 1, 1]} : vector<9x8x2xf32> to vector<8x8x2xf32>
    %c19 = arith.constant 19 : index
    %328 = memref.load %arg2[%c19] : memref<81xf32, #tpu.memory_space<smem>>
    %329 = vector.broadcast %328 : f32 to vector<8x8x2xf32>
    %330 = arith.mulf %329, %327 : vector<8x8x2xf32>
    %331 = arith.addf %315, %330 : vector<8x8x2xf32>
    %c46 = arith.constant 46 : index
    %332 = memref.load %arg2[%c46] : memref<81xf32, #tpu.memory_space<smem>>
    %333 = vector.broadcast %332 : f32 to vector<8x8x2xf32>
    %334 = arith.mulf %333, %327 : vector<8x8x2xf32>
    %335 = arith.addf %319, %334 : vector<8x8x2xf32>
    %c73 = arith.constant 73 : index
    %336 = memref.load %arg2[%c73] : memref<81xf32, #tpu.memory_space<smem>>
    %337 = vector.broadcast %336 : f32 to vector<8x8x2xf32>
    %338 = arith.mulf %337, %327 : vector<8x8x2xf32>
    %339 = arith.addf %323, %338 : vector<8x8x2xf32>
    %340 = vector.extract_strided_slice %326 {offsets = [1, 0, 0], sizes = [8, 8, 2], strides = [1, 1, 1]} : vector<9x8x2xf32> to vector<8x8x2xf32>
    %c25 = arith.constant 25 : index
    %341 = memref.load %arg2[%c25] : memref<81xf32, #tpu.memory_space<smem>>
    %342 = vector.broadcast %341 : f32 to vector<8x8x2xf32>
    %343 = arith.mulf %342, %340 : vector<8x8x2xf32>
    %344 = arith.addf %331, %343 : vector<8x8x2xf32>
    %c52 = arith.constant 52 : index
    %345 = memref.load %arg2[%c52] : memref<81xf32, #tpu.memory_space<smem>>
    %346 = vector.broadcast %345 : f32 to vector<8x8x2xf32>
    %347 = arith.mulf %346, %340 : vector<8x8x2xf32>
    %348 = arith.addf %335, %347 : vector<8x8x2xf32>
    %c79 = arith.constant 79 : index
    %349 = memref.load %arg2[%c79] : memref<81xf32, #tpu.memory_space<smem>>
    %350 = vector.broadcast %349 : f32 to vector<8x8x2xf32>
    %351 = arith.mulf %350, %340 : vector<8x8x2xf32>
    %352 = arith.addf %339, %351 : vector<8x8x2xf32>
    %c2_53 = arith.constant 2 : index
    %c2_54 = arith.constant 2 : index
    %c0_55 = arith.constant 0 : index
    %c0_56 = arith.constant 0 : index
    %c0_57 = arith.constant 0 : index
    %353 = vector.load %arg1[%c2_53, %c2_54, %c0_55, %c0_56, %c0_57] : memref<4x3x9x9x2xf32, #tpu.memory_space<vmem>>, vector<1x1x9x9x2xf32>
    %354 = vector.shape_cast %353 : vector<1x1x9x9x2xf32> to vector<9x9x2xf32>
    %355 = vector.extract_strided_slice %354 {offsets = [0, 0, 0], sizes = [9, 8, 2], strides = [1, 1, 1]} : vector<9x9x2xf32> to vector<9x8x2xf32>
    %356 = vector.extract_strided_slice %354 {offsets = [0, 1, 0], sizes = [9, 8, 2], strides = [1, 1, 1]} : vector<9x9x2xf32> to vector<9x8x2xf32>
    %357 = vector.extract_strided_slice %355 {offsets = [0, 0, 0], sizes = [8, 8, 2], strides = [1, 1, 1]} : vector<9x8x2xf32> to vector<8x8x2xf32>
    %c21 = arith.constant 21 : index
    %358 = memref.load %arg2[%c21] : memref<81xf32, #tpu.memory_space<smem>>
    %359 = vector.broadcast %358 : f32 to vector<8x8x2xf32>
    %360 = arith.mulf %359, %357 : vector<8x8x2xf32>
    %361 = arith.addf %344, %360 : vector<8x8x2xf32>
    %c48 = arith.constant 48 : index
    %362 = memref.load %arg2[%c48] : memref<81xf32, #tpu.memory_space<smem>>
    %363 = vector.broadcast %362 : f32 to vector<8x8x2xf32>
    %364 = arith.mulf %363, %357 : vector<8x8x2xf32>
    %365 = arith.addf %348, %364 : vector<8x8x2xf32>
    %c75 = arith.constant 75 : index
    %366 = memref.load %arg2[%c75] : memref<81xf32, #tpu.memory_space<smem>>
    %367 = vector.broadcast %366 : f32 to vector<8x8x2xf32>
    %368 = arith.mulf %367, %357 : vector<8x8x2xf32>
    %369 = arith.addf %352, %368 : vector<8x8x2xf32>
    %370 = vector.extract_strided_slice %356 {offsets = [0, 0, 0], sizes = [8, 8, 2], strides = [1, 1, 1]} : vector<9x8x2xf32> to vector<8x8x2xf32>
    %c23 = arith.constant 23 : index
    %371 = memref.load %arg2[%c23] : memref<81xf32, #tpu.memory_space<smem>>
    %372 = vector.broadcast %371 : f32 to vector<8x8x2xf32>
    %373 = arith.mulf %372, %370 : vector<8x8x2xf32>
    %374 = arith.addf %361, %373 : vector<8x8x2xf32>
    %c50 = arith.constant 50 : index
    %375 = memref.load %arg2[%c50] : memref<81xf32, #tpu.memory_space<smem>>
    %376 = vector.broadcast %375 : f32 to vector<8x8x2xf32>
    %377 = arith.mulf %376, %370 : vector<8x8x2xf32>
    %378 = arith.addf %365, %377 : vector<8x8x2xf32>
    %c77 = arith.constant 77 : index
    %379 = memref.load %arg2[%c77] : memref<81xf32, #tpu.memory_space<smem>>
    %380 = vector.broadcast %379 : f32 to vector<8x8x2xf32>
    %381 = arith.mulf %380, %370 : vector<8x8x2xf32>
    %382 = arith.addf %369, %381 : vector<8x8x2xf32>
    %c3_58 = arith.constant 3 : index
    %c2_59 = arith.constant 2 : index
    %c0_60 = arith.constant 0 : index
    %c0_61 = arith.constant 0 : index
    %c0_62 = arith.constant 0 : index
    %383 = vector.load %arg1[%c3_58, %c2_59, %c0_60, %c0_61, %c0_62] : memref<4x3x9x9x2xf32, #tpu.memory_space<vmem>>, vector<1x1x9x9x2xf32>
    %384 = vector.shape_cast %383 : vector<1x1x9x9x2xf32> to vector<9x9x2xf32>
    %385 = vector.extract_strided_slice %384 {offsets = [0, 0, 0], sizes = [9, 8, 2], strides = [1, 1, 1]} : vector<9x9x2xf32> to vector<9x8x2xf32>
    %386 = vector.extract_strided_slice %385 {offsets = [0, 0, 0], sizes = [8, 8, 2], strides = [1, 1, 1]} : vector<9x8x2xf32> to vector<8x8x2xf32>
    %c22 = arith.constant 22 : index
    %387 = memref.load %arg2[%c22] : memref<81xf32, #tpu.memory_space<smem>>
    %388 = vector.broadcast %387 : f32 to vector<8x8x2xf32>
    %389 = arith.mulf %388, %386 : vector<8x8x2xf32>
    %390 = arith.addf %374, %389 : vector<8x8x2xf32>
    %c49 = arith.constant 49 : index
    %391 = memref.load %arg2[%c49] : memref<81xf32, #tpu.memory_space<smem>>
    %392 = vector.broadcast %391 : f32 to vector<8x8x2xf32>
    %393 = arith.mulf %392, %386 : vector<8x8x2xf32>
    %394 = arith.addf %378, %393 : vector<8x8x2xf32>
    %c76 = arith.constant 76 : index
    %395 = memref.load %arg2[%c76] : memref<81xf32, #tpu.memory_space<smem>>
    %396 = vector.broadcast %395 : f32 to vector<8x8x2xf32>
    %397 = arith.mulf %396, %386 : vector<8x8x2xf32>
    %398 = arith.addf %382, %397 : vector<8x8x2xf32>
    %c0_63 = arith.constant 0 : index
    %c0_64 = arith.constant 0 : index
    %c0_65 = arith.constant 0 : index
    %c0_66 = arith.constant 0 : index
    %399 = vector.load %arg4[%c0_63, %c0_64, %c0_65, %c0_66] : memref<3x8x8x2xf32, #tpu.memory_space<vmem>>, vector<1x8x8x2xf32>
    %400 = vector.shape_cast %399 : vector<1x8x8x2xf32> to vector<8x8x2xf32>
    %401 = vector.shape_cast %390 : vector<8x8x2xf32> to vector<1x8x8x2xf32>
    tpu.vector_store %arg4[%c0_63, %c0_64, %c0_65, %c0_66], %401 {strides = array<i32>} : memref<3x8x8x2xf32, #tpu.memory_space<vmem>>, vector<1x8x8x2xf32>,
    %c1_67 = arith.constant 1 : index
    %c0_68 = arith.constant 0 : index
    %c0_69 = arith.constant 0 : index
    %c0_70 = arith.constant 0 : index
    %402 = vector.load %arg4[%c1_67, %c0_68, %c0_69, %c0_70] : memref<3x8x8x2xf32, #tpu.memory_space<vmem>>, vector<1x8x8x2xf32>
    %403 = vector.shape_cast %402 : vector<1x8x8x2xf32> to vector<8x8x2xf32>
    %404 = vector.shape_cast %394 : vector<8x8x2xf32> to vector<1x8x8x2xf32>
    tpu.vector_store %arg4[%c1_67, %c0_68, %c0_69, %c0_70], %404 {strides = array<i32>} : memref<3x8x8x2xf32, #tpu.memory_space<vmem>>, vector<1x8x8x2xf32>,
    %c2_71 = arith.constant 2 : index
    %c0_72 = arith.constant 0 : index
    %c0_73 = arith.constant 0 : index
    %c0_74 = arith.constant 0 : index
    %405 = vector.load %arg4[%c2_71, %c0_72, %c0_73, %c0_74] : memref<3x8x8x2xf32, #tpu.memory_space<vmem>>, vector<1x8x8x2xf32>
    %406 = vector.shape_cast %405 : vector<1x8x8x2xf32> to vector<8x8x2xf32>
    %407 = vector.shape_cast %398 : vector<8x8x2xf32> to vector<1x8x8x2xf32>
    tpu.vector_store %arg4[%c2_71, %c0_72, %c0_73, %c0_74], %407 {strides = array<i32>} : memref<3x8x8x2xf32, #tpu.memory_space<vmem>>, vector<1x8x8x2xf32>,
    return
  }
  func.func @transform_0(%arg0: i32) -> (i32, i32, i32, i32, i32) {
    %c0_i32 = arith.constant 0 : i32
    %c0_i32_0 = arith.constant 0 : i32
    %c0_i32_1 = arith.constant 0 : i32
    %c0_i32_2 = arith.constant 0 : i32
    %c0_i32_3 = arith.constant 0 : i32
    return %c0_i32, %c0_i32_0, %c0_i32_1, %c0_i32_2, %arg0 : i32, i32, i32, i32, i32
  }
  func.func @transform_1(%arg0: i32) -> i32 {
    %c0_i32 = arith.constant 0 : i32
    %c0_i32_0 = arith.constant 0 : i32
    return %c0_i32 : i32
  }
  func.func @transform_2(%arg0: i32) -> i32 {
    %c0_i32 = arith.constant 0 : i32
    %c0_i32_0 = arith.constant 0 : i32
    return %c0_i32 : i32
  }
  func.func @transform_3(%arg0: i32) -> (i32, i32, i32, i32) {
    %c0_i32 = arith.constant 0 : i32
    %c0_i32_0 = arith.constant 0 : i32
    %c0_i32_1 = arith.constant 0 : i32
    %c0_i32_2 = arith.constant 0 : i32
    return %c0_i32, %c0_i32_0, %c0_i32_1, %arg0 : i32, i32, i32, i32
  }
}

</mosaic_0001>

<bundles_post_ra>
// kernel: conv2d_3x3_s2_p1.1
= control target key start
LH: loop header
LB: loop body
LE: loop exit
PB: predicated region body
PF: predicated region fallthrough
CT: control target
= control target key end

     0   :  { %8 = vsyncpa [#allocation3], 0  ;;  %s7134_s0 = inlined_call_operand.vmem [shape: f32[4,3,9,9,2], index: 0, kind: input, shape index: {}]   ;;  %s7135_s1 = inlined_call_operand.vmem [shape: f32[81], index: 1, kind: input, shape index: {}]   ;;  %s7136_s2 = inlined_call_operand.vmem [shape: f32[3], index: 2, kind: input, shape index: {}]   ;;  %s7137_s3 = inlined_call_operand.vmem [shape: f32[3,8,8,2], index: 3, kind: output, shape index: {}]  }
   0x1   :  { %s18_s14 = sshll.u32 %s7135_s1, 4  ;;  %s19_s14 = int_to_ptr.vmem [resolvable:$true] %s18_s14 }
   0x2   :  { %9 = vsyncpa [#allocation5], 0  ;;  %s28_s17 = sshll.u32 %s7136_s2, 4  ;;  %s3448_s18 = scalar_lea.vmem %s19_s14, 16  ;;  %s29_s17 = int_to_ptr.vmem [resolvable:$true] %s28_s17 }
   0x3   :  { %p3449_p0 = scmp.ne.s32.totalorder %s19_s14, %s3448_s18  ;;  %p3453_p1 = scmp.lt.s32.totalorder %s19_s14, %s19_s14 }
   0x4   :  { %p3454_p2 = scmp.lt.s32.totalorder %s3448_s18, %s3448_s18 }
   0x6   :  { %p3455_p3 = por %p3454_p2, %p3453_p1 }
   0x8   :  { %p3456_p4 = pnand %p3455_p3, %p3449_p0 }
   0xa   :  { %3459 = shalt.err (!%p3456_p4)
}
   0xb   :  { %s3476_s19 = smov [#allocation2]   ;;  %s3460_s20 = scalar_lea.vmem %s29_s17, 16 }
   0xc   :  { %21 = dma.vmem_to_smem %s19_s14, 16, %s3476_s19, [#allocation3]  }
   0xd   :  { %p3461_p5 = scmp.ne.s32.totalorder %s29_s17, %s3460_s20  ;;  %p3465_p6 = scmp.lt.s32.totalorder %s29_s17, %s29_s17 }
   0xe   :  { %p3466_p7 = scmp.lt.s32.totalorder %s3460_s20, %s3460_s20 }
  0x10   :  { %p3467_p8 = por %p3466_p7, %p3465_p6 }
  0x12   :  { %p3468_p9 = pnand %p3467_p8, %p3461_p5 }
  0x14   :  { %3471 = shalt.err (!%p3468_p9)
}
  0x15   :  { %s3477_s1 = smov [#allocation4]  }
  0x16   :  { %31 = dma.vmem_to_smem %s29_s17, 16, %s3477_s1, [#allocation5]  }
  0x17   :  { %3472 = dma.done.wait [#allocation3], 16  }
  0x18   :  { %3473 = vsyncadd [#allocation3], 4294967280 }
  0x19   :  { %3474 = dma.done.wait [#allocation5], 16  }
  0x1a   :  { %3475 = vsyncadd [#allocation5], 4294967280 }
  0x1b   :  { %38 = sfence }
  0x1c   :  { %s39_s2 = sld [smem:[#allocation4]]  ;;  %s3213_s21 = sld [smem:[#allocation4 + $0x1]]  ;;  %v3507_v0 = vld [vmem:[%s7134_s0] sm:$0xff]  ;;  %v3512_v1 = vld [vmem:[%s7134_s0 + $0x10] sm:$0xff]  ;;  %vm151_vm0 = vcmask 1046528   ;;  %vm3180_vm1 = vcmask 15360  }
  0x1d   :  { %s3214_s22 = sld [smem:[#allocation4 + $0x2]]  ;;  %s63_s23 = sld [smem:[#allocation2]]  ;;  %v3517_v2 = vld [vmem:[%s7134_s0 + $0x20] sm:$0xff]  ;;  %v3522_v3 = vld [vmem:[%s7134_s0 + $0x30] sm:$0xff]  ;;  %v3601_v52 = vld [vmem:[%s7134_s0 + $0x8] sm:$0x1] }
  0x1e   :  { %s3215_s30 = sld [smem:[#allocation2 + $0x1b]]  ;;  %v3527_v4 = vld [vmem:[%s7134_s0 + $0x40] sm:$0xff]  ;;  %v3532_v5 = vld [vmem:[%s7134_s0 + $0x50] sm:$0xff]  ;;  %s3216_s10 = sld [smem:[#allocation2 + $0x36]]  ;;  %v3606_v53 = vld [vmem:[%s7134_s0 + $0x18] sm:$0x1] }
  0x1f   :  { %v3537_v6 = vld [vmem:[%s7134_s0 + $0x60] sm:$0xff]  ;;  %v3542_v7 = vld [vmem:[%s7134_s0 + $0x70] sm:$0xff]  ;;  %s3217_s15 = sld [smem:[#allocation2 + $0x2]]  ;;  %s3218_s16 = sld [smem:[#allocation2 + $0x1d]]  ;;  %v3615_v58 = vld [vmem:[%s7134_s0 + $0x28] sm:$0x1] }
  0x20   :  { %v3620_v59 = vld [vmem:[%s7134_s0 + $0x38] sm:$0x1]  ;;  %s3738_s4 = sld [smem:[#allocation2 + $0x38]]  ;;  %s3788_s5 = sld [smem:[#allocation2 + $0x6]] }
  0x21   :  { %s3790_s6 = sld [smem:[#allocation2 + $0x21]]  ;;  %s3793_s7 = sld [smem:[#allocation2 + $0x3c]] }
  0x22   :  { %v40_v8 = vstv %s39_s2  ;;  %v42_v9 = vstv %s3213_s21  ;;  %s3853_s11 = sld [smem:[#allocation2 + $0x23]]  ;;  %s3859_s12 = sld [smem:[#allocation2 + $0x3e]] }
  0x23   :  { %v44_v10 = vstv %s3214_s22  ;;  %v64_v11 = vstv %s63_s23  ;;  %s3861_s13 = sld [smem:[#allocation2 + $0x1]]  ;;  %s4081_s18 = sld [smem:[#allocation2 + $0x1c]] }
  0x24   :  { %v65_v12 = vmul.f32 %v64_v11, %v3507_v0  ;;  %v66_v13 = vmul.f32 %v64_v11, %v3512_v1  ;;  %v67_v14 = vmul.f32 %v64_v11, %v3517_v2  ;;  %v68_v15 = vmul.f32 %v64_v11, %v3522_v3  ;;  %s4085_s19 = sld [smem:[#allocation2 + $0x37]]  ;;  %s4095_s21 = sld [smem:[#allocation2 + $0x22]] }
  0x25   :  { %v69_v16 = vmul.f32 %v64_v11, %v3527_v4  ;;  %v70_v17 = vmul.f32 %v64_v11, %v3532_v5  ;;  %v71_v18 = vmul.f32 %v64_v11, %v3537_v6  ;;  %v72_v19 = vmul.f32 %v64_v11, %v3542_v7  ;;  %s4087_s20 = sld [smem:[#allocation2 + $0x7]]  ;;  %s4201_s9 = sld [smem:[#allocation2 + $0x3d]] }
  0x26   :  { %v3552_v20 = vadd.f32 %v65_v12, %v40_v8  ;;  %v3554_v21 = vadd.f32 %v66_v13, %v40_v8  ;;  %v3556_v22 = vadd.f32 %v67_v14, %v40_v8  ;;  %v3558_v23 = vadd.f32 %v68_v15, %v40_v8  ;;  %v3651_v15 = vld [vmem:[%s7134_s0 + $0x68] sm:$0x1]  ;;  %s4320_s27 = sld [smem:[#allocation2 + $0x5]]  ;;  %s4322_s28 = sld [smem:[#allocation2 + $0x20]] }
  0x27   :  { %v3560_v24 = vadd.f32 %v69_v16, %v40_v8  ;;  %v3562_v25 = vadd.f32 %v70_v17, %v40_v8  ;;  %v3564_v26 = vadd.f32 %v71_v18, %v40_v8  ;;  %v3566_v27 = vadd.f32 %v72_v19, %v40_v8  ;;  %v3633_v8 = vld [vmem:[%s7134_s0 + $0x48] sm:$0x1]  ;;  %v3656_v16 = vld [vmem:[%s7134_s0 + $0x78] sm:$0x1]  ;;  %s4328_s29 = sld [smem:[#allocation2 + $0x3b]]  ;;  %s4593_s2 = sld [smem:[#allocation2 + $0x1f]] }
  0x28   :  { %v82_v28 = vstv %s3215_s30  ;;  %v100_v29 = vstv %s3216_s10  ;;  %v118_v30 = vstv %s3217_s15  ;;  %v3568_v31 = vstv %s3218_s16  ;;  %s3851_s10 = sld [smem:[#allocation2 + $0x8]]  ;;  %s4330_s30 = sld [smem:[#allocation2 + $0x4]] }
  0x29   :  { %v83_v32 = vmul.f32 %v82_v28, %v3507_v0  ;;  %v84_v33 = vmul.f32 %v82_v28, %v3512_v1  ;;  %v85_v34 = vmul.f32 %v82_v28, %v3517_v2  ;;  %v86_v35 = vmul.f32 %v82_v28, %v3522_v3  ;;  %s4599_s22 = sld [smem:[#allocation2 + $0x9]]  ;;  %s4605_s25 = sld [smem:[#allocation2 + $0x24]] }
  0x2a   :  { %v87_v36 = vmul.f32 %v82_v28, %v3527_v4  ;;  %v88_v37 = vmul.f32 %v82_v28, %v3532_v5  ;;  %v89_v38 = vmul.f32 %v82_v28, %v3537_v6  ;;  %v90_v39 = vmul.f32 %v82_v28, %v3542_v7  ;;  %s4744_s26 = sld [smem:[#allocation2 + $0xb]]  ;;  %s5045_s1 = sld [smem:[#allocation2 + $0x11]] }
  0x2b   :  { %v3578_v40 = vadd.f32 %v83_v32, %v42_v9  ;;  %v3580_v41 = vadd.f32 %v84_v33, %v42_v9  ;;  %v3582_v42 = vadd.f32 %v85_v34, %v42_v9  ;;  %v3584_v43 = vadd.f32 %v86_v35, %v42_v9  ;;  %s5176_s24 = sld [smem:[#allocation2 + $0x2c]]  ;;  %s5346_s17 = sld [smem:[#allocation2 + $0x40]] }
  0x2c   :  { %v3586_v44 = vadd.f32 %v87_v36, %v42_v9  ;;  %v3588_v45 = vadd.f32 %v88_v37, %v42_v9  ;;  %v3590_v46 = vadd.f32 %v89_v38, %v42_v9  ;;  %v3592_v47 = vadd.f32 %v90_v39, %v42_v9  ;;  %v3638_v9 = vld [vmem:[%s7134_s0 + $0x58] sm:$0x1]  ;;  %s5447_s23 = sld [smem:[#allocation2 + $0x42]]  ;;  %s5968_s15 = sld [smem:[#allocation2 + $0x18]] }
  0x2d   :  { %v101_v48 = vmul.f32 %v100_v29, %v3507_v0  ;;  %v102_v49 = vmul.f32 %v100_v29, %v3512_v1  ;;  %v103_v50 = vmul.f32 %v100_v29, %v3517_v2  ;;  %v104_v51 = vmul.f32 %v100_v29, %v3522_v3  ;;  %s5966_s14 = sld [smem:[#allocation2 + $0x4a]]  ;;  %s6649_s8 = sld [smem:[#allocation2 + $0x30]] }
  0x2e   :  { %7145 = vst [vmem:[#allocation8_spill] sm:$0xff] %v3592_v47  ;;  %v105_v54 = vmul.f32 %v100_v29, %v3527_v4  ;;  %v106_v55 = vmul.f32 %v100_v29, %v3532_v5  ;;  %v107_v56 = vmul.f32 %v100_v29, %v3537_v6  ;;  %v108_v57 = vmul.f32 %v100_v29, %v3542_v7  ;;  %s6972_s16 = sld [smem:[#allocation2 + $0x16]] }
  0x2f   :  { %v3622_v60 = vadd.f32 %v101_v48, %v44_v10  ;;  %v3624_v61 = vadd.f32 %v102_v49, %v44_v10  ;;  %v3626_v62 = vadd.f32 %v103_v50, %v44_v10  ;;  %v3628_v63 = vadd.f32 %v104_v51, %v44_v10 }
  0x30   :  { %v3640_v11 = vadd.f32 %v105_v54, %v44_v10  ;;  %v3642_v12 = vadd.f32 %v106_v55, %v44_v10  ;;  %v3644_v13 = vadd.f32 %v107_v56, %v44_v10  ;;  %v3646_v14 = vadd.f32 %v108_v57, %v44_v10 }
  0x31   :  { %7146 = vst [vmem:[#allocation9_spill] sm:$0xff] %v3622_v60  ;;  %7147 = vst [vmem:[#allocation10_spill] sm:$0xff] %v3624_v61  ;;  %v119_v17 = vmul.f32 %v118_v30, %v3507_v0  ;;  %v120_v18 = vmul.f32 %v118_v30, %v3601_v52  ;;  %v121_v19 = vmul.f32 %v118_v30, %v3512_v1 }
  0x32   :  { %7148 = vst [vmem:[#allocation11_spill] sm:$0xff] %v3626_v62  ;;  %7149 = vst [vmem:[#allocation12_spill] sm:$0xff] %v3628_v63  ;;  %v122_v28 = vmul.f32 %v118_v30, %v3606_v53  ;;  %v123_v10 = vmul.f32 %v118_v30, %v3517_v2  ;;  %v124_v29 = vmul.f32 %v118_v30, %v3615_v58 }
  0x33   :  { %7150 = vst [vmem:[#allocation13_spill] sm:$0xff] %v3640_v11  ;;  %7151 = vst [vmem:[#allocation14_spill] sm:$0xff] %v3642_v12  ;;  %v125_v32 = vmul.f32 %v118_v30, %v3522_v3  ;;  %v126_v33 = vmul.f32 %v118_v30, %v3620_v59  ;;  %v127_v34 = vmul.f32 %v118_v30, %v3527_v4  ;;  %v152_v50 = vrot.slane %v119_v17, 1 }
  0x34   :  { %7152 = vst [vmem:[#allocation15_spill] sm:$0xff] %v3644_v13  ;;  %7153 = vst [vmem:[#allocation16_spill] sm:$0xff] %v3646_v14  ;;  %v128_v35 = vmul.f32 %v118_v30, %v3633_v8  ;;  %v129_v36 = vmul.f32 %v118_v30, %v3532_v5  ;;  %v130_v37 = vmul.f32 %v118_v30, %v3638_v9  ;;  %v153_v51 = vrot.slane %v120_v18, 1 }
  0x35   :  { %v131_v38 = vmul.f32 %v118_v30, %v3537_v6  ;;  %v132_v39 = vmul.f32 %v118_v30, %v3651_v15  ;;  %v133_v48 = vmul.f32 %v118_v30, %v3542_v7  ;;  %v134_v49 = vmul.f32 %v118_v30, %v3656_v16 }
  0x36   :  { %v155_v54 = vrot.slane %v121_v19, 1  ;;  %v156_v55 = vrot.slane %v122_v28, 1  ;;  %v158_v56 = vrot.slane %v123_v10, 1  ;;  %v159_v57 = vrot.slane %v124_v29, 1 }
  0x37   :  { %v161_v14 = vrot.slane %v125_v32, 1  ;;  %v162_v13 = vrot.slane %v126_v33, 1  ;;  %v154_v12 = vsel %vm151_vm0, %v152_v50, %v153_v51  ;;  %v164_v63 = vrot.slane %v127_v34, 1 }
  0x38   :  { %v157_v11 = vsel %vm151_vm0, %v155_v54, %v156_v55  ;;  %v165_v62 = vrot.slane %v128_v35, 1  ;;  %v160_v61 = vsel %vm151_vm0, %v158_v56, %v159_v57  ;;  %v167_v47 = vrot.slane %v129_v36, 1 }
  0x39   :  { %v163_v60 = vsel %vm151_vm0, %v161_v14, %v162_v13  ;;  %v168_v30 = vrot.slane %v130_v37, 1  ;;  %v170_v18 = vrot.slane %v131_v38, 1  ;;  %v171_v19 = vrot.slane %v132_v39, 1 }
  0x3a   :  { %v166_v17 = vsel %vm151_vm0, %v164_v63, %v165_v62  ;;  %v173_v28 = vrot.slane %v133_v48, 1  ;;  %v174_v29 = vrot.slane %v134_v49, 1  ;;  %v3681_v32 = vadd.f32 %v154_v12, %v3552_v20 }
  0x3b   :  { %v169_v10 = vsel %vm151_vm0, %v167_v47, %v168_v30  ;;  %v3684_v33 = vadd.f32 %v157_v11, %v3554_v21  ;;  %v172_v34 = vsel %vm151_vm0, %v170_v18, %v171_v19  ;;  %v3688_v13 = vadd.f32 %v160_v61, %v3556_v22 }
  0x3c   :  { %v3691_v14 = vadd.f32 %v163_v60, %v3558_v23  ;;  %v3694_v62 = vadd.f32 %v166_v17, %v3560_v24  ;;  %v175_v47 = vsel %vm151_vm0, %v173_v28, %v174_v29  ;;  %v3698_v63 = vadd.f32 %v169_v10, %v3562_v25 }
  0x3d   :  { %v3701_v20 = vadd.f32 %v172_v34, %v3564_v26  ;;  %v194_v21 = vmul.f32 %v3568_v31, %v3507_v0  ;;  %v3706_v22 = vadd.f32 %v175_v47, %v3566_v27  ;;  %v195_v23 = vmul.f32 %v3568_v31, %v3601_v52 }
  0x3e   :  { %v196_v24 = vmul.f32 %v3568_v31, %v3512_v1  ;;  %v197_v60 = vmul.f32 %v3568_v31, %v3606_v53  ;;  %v198_v25 = vmul.f32 %v3568_v31, %v3517_v2  ;;  %v199_v26 = vmul.f32 %v3568_v31, %v3615_v58 }
  0x3f   :  { %v200_v61 = vmul.f32 %v3568_v31, %v3522_v3  ;;  %v201_v27 = vmul.f32 %v3568_v31, %v3620_v59  ;;  %v202_v11 = vmul.f32 %v3568_v31, %v3527_v4  ;;  %v203_v12 = vmul.f32 %v3568_v31, %v3633_v8 }
  0x40   :  { %v204_v35 = vmul.f32 %v3568_v31, %v3532_v5  ;;  %v205_v36 = vmul.f32 %v3568_v31, %v3638_v9  ;;  %v206_v37 = vmul.f32 %v3568_v31, %v3537_v6  ;;  %v207_v38 = vmul.f32 %v3568_v31, %v3651_v15 }
  0x41   :  { %v208_v39 = vmul.f32 %v3568_v31, %v3542_v7  ;;  %v209_v48 = vmul.f32 %v3568_v31, %v3656_v16  ;;  %v226_v49 = vrot.slane %v194_v21, 1  ;;  %v227_v50 = vrot.slane %v195_v23, 1 }
  0x42   :  { %v229_v51 = vrot.slane %v196_v24, 1  ;;  %v230_v54 = vrot.slane %v197_v60, 1  ;;  %v232_v55 = vrot.slane %v198_v25, 1  ;;  %v233_v56 = vrot.slane %v199_v26, 1 }
  0x43   :  { %v235_v57 = vrot.slane %v200_v61, 1  ;;  %v236_v30 = vrot.slane %v201_v27, 1  ;;  %v228_v17 = vsel %vm151_vm0, %v226_v49, %v227_v50  ;;  %v238_v19 = vrot.slane %v202_v11, 1 }
  0x44   :  { %v231_v18 = vsel %vm151_vm0, %v229_v51, %v230_v54  ;;  %v239_v28 = vrot.slane %v203_v12, 1  ;;  %v234_v10 = vsel %vm151_vm0, %v232_v55, %v233_v56  ;;  %v241_v29 = vrot.slane %v204_v35, 1 }
  0x45   :  { %v237_v31 = vsel %vm151_vm0, %v235_v57, %v236_v30  ;;  %v242_v34 = vrot.slane %v205_v36, 1  ;;  %v244_v21 = vrot.slane %v206_v37, 1  ;;  %v245_v23 = vrot.slane %v207_v38, 1  ;;  %v7154_v38 = vld [vmem:[#allocation8_spill] sm:$0xff] }
  0x46   :  { %v240_v47 = vsel %vm151_vm0, %v238_v19, %v239_v28  ;;  %v247_v24 = vrot.slane %v208_v39, 1  ;;  %v248_v25 = vrot.slane %v209_v48, 1  ;;  %v3747_v26 = vadd.f32 %v228_v17, %v3578_v40 }
  0x47   :  { %v243_v60 = vsel %vm151_vm0, %v241_v29, %v242_v34  ;;  %v3750_v61 = vadd.f32 %v231_v18, %v3580_v41  ;;  %v246_v27 = vsel %vm151_vm0, %v244_v21, %v245_v23  ;;  %v3754_v11 = vadd.f32 %v234_v10, %v3582_v42 }
  0x48   :  { %v3757_v12 = vadd.f32 %v237_v31, %v3584_v43  ;;  %v3760_v35 = vadd.f32 %v240_v47, %v3586_v44  ;;  %v249_v36 = vsel %vm151_vm0, %v247_v24, %v248_v25  ;;  %v3764_v37 = vadd.f32 %v243_v60, %v3588_v45 }
  0x49   :  { %v3767_v40 = vadd.f32 %v246_v27, %v3590_v46  ;;  %v267_v41 = vstv %s3738_s4  ;;  %v3771_v39 = vadd.f32 %v249_v36, %v7154_v38  ;;  %s5714_s4 = sld [smem:[#allocation2 + $0x28]] }
  0x4a   :  { %v268_v42 = vmul.f32 %v267_v41, %v3507_v0  ;;  %v269_v43 = vmul.f32 %v267_v41, %v3601_v52  ;;  %v270_v48 = vmul.f32 %v267_v41, %v3512_v1  ;;  %v271_v44 = vmul.f32 %v267_v41, %v3606_v53 }
  0x4b   :  { %v272_v49 = vmul.f32 %v267_v41, %v3517_v2  ;;  %v273_v45 = vmul.f32 %v267_v41, %v3615_v58  ;;  %v274_v50 = vmul.f32 %v267_v41, %v3522_v3  ;;  %v275_v46 = vmul.f32 %v267_v41, %v3620_v59 }
  0x4c   :  { %v276_v51 = vmul.f32 %v267_v41, %v3527_v4  ;;  %v277_v54 = vmul.f32 %v267_v41, %v3633_v8  ;;  %v278_v0 = vmul.f32 %v267_v41, %v3532_v5  ;;  %v279_v52 = vmul.f32 %v267_v41, %v3638_v9 }
  0x4d   :  { %v280_v55 = vmul.f32 %v267_v41, %v3537_v6  ;;  %v281_v56 = vmul.f32 %v267_v41, %v3651_v15  ;;  %v282_v57 = vmul.f32 %v267_v41, %v3542_v7  ;;  %v283_v30 = vmul.f32 %v267_v41, %v3656_v16 }
  0x4e   :  { %v300_v17 = vrot.slane %v268_v42, 1  ;;  %v301_v18 = vrot.slane %v269_v43, 1  ;;  %v303_v19 = vrot.slane %v270_v48, 1  ;;  %v304_v28 = vrot.slane %v271_v44, 1 }
  0x4f   :  { %v306_v10 = vrot.slane %v272_v49, 1  ;;  %v307_v31 = vrot.slane %v273_v45, 1  ;;  %v309_v29 = vrot.slane %v274_v50, 1  ;;  %v310_v47 = vrot.slane %v275_v46, 1  ;;  %v7155_v49 = vld [vmem:[#allocation9_spill] sm:$0xff]  ;;  %v7156_v46 = vld [vmem:[#allocation10_spill] sm:$0xff] }
  0x50   :  { %v302_v34 = vsel %vm151_vm0, %v300_v17, %v301_v18  ;;  %v312_v21 = vrot.slane %v276_v51, 1  ;;  %v313_v23 = vrot.slane %v277_v54, 1  ;;  %v305_v24 = vsel %vm151_vm0, %v303_v19, %v304_v28  ;;  %v7157_v54 = vld [vmem:[#allocation11_spill] sm:$0xff]  ;;  %v7159_v18 = vld [vmem:[#allocation13_spill] sm:$0xff] }
  0x51   :  { %v308_v60 = vsel %vm151_vm0, %v306_v10, %v307_v31  ;;  %v315_v25 = vrot.slane %v278_v0, 1  ;;  %v316_v27 = vrot.slane %v279_v52, 1  ;;  %v311_v36 = vsel %vm151_vm0, %v309_v29, %v310_v47  ;;  %v7158_v52 = vld [vmem:[#allocation12_spill] sm:$0xff]  ;;  %v7161_v28 = vld [vmem:[#allocation15_spill] sm:$0xff] }
  0x52   :  { %v314_v41 = vsel %vm151_vm0, %v312_v21, %v313_v23  ;;  %v318_v38 = vrot.slane %v280_v55, 1  ;;  %v319_v42 = vrot.slane %v281_v56, 1  ;;  %v321_v48 = vrot.slane %v282_v57, 1  ;;  %v3809_v55 = vld [vmem:[%s7134_s0 + $0x80] sm:$0xff] }
  0x53   :  { %v317_v43 = vsel %vm151_vm0, %v315_v25, %v316_v27  ;;  %v322_v44 = vrot.slane %v283_v30, 1  ;;  %v332_v45 = vadd.f32 %v302_v34, %v7155_v49  ;;  %v333_v51 = vadd.f32 %v305_v24, %v7156_v46  ;;  %v7160_v30 = vld [vmem:[#allocation14_spill] sm:$0xff]  ;;  %v7162_v31 = vld [vmem:[#allocation16_spill] sm:$0xff] }
  0x54   :  { %v320_v50 = vsel %vm151_vm0, %v318_v38, %v319_v42  ;;  %v334_v0 = vadd.f32 %v308_v60, %v7157_v54  ;;  %v335_v17 = vadd.f32 %v311_v36, %v7158_v52  ;;  %v336_v57 = vadd.f32 %v314_v41, %v7159_v18 }
  0x55   :  { %v323_v56 = vsel %vm151_vm0, %v321_v48, %v322_v44  ;;  %v337_v19 = vadd.f32 %v317_v43, %v7160_v30  ;;  %v338_v10 = vadd.f32 %v320_v50, %v7161_v28  ;;  %v341_v34 = vstv %s3788_s5  ;;  %s6232_s5 = sld [smem:[#allocation2 + $0x1a]] }
  0x56   :  { %v339_v29 = vadd.f32 %v323_v56, %v7162_v31  ;;  %v359_v47 = vstv %s3790_s6  ;;  %v377_v21 = vstv %s3793_s7  ;;  %v342_v23 = vmul.f32 %v341_v34, %v3512_v1  ;;  %s6235_s6 = sld [smem:[#allocation2 + $0x35]] }
  0x57   :  { %v343_v24 = vmul.f32 %v341_v34, %v3517_v2  ;;  %v344_v60 = vmul.f32 %v341_v34, %v3522_v3  ;;  %v345_v25 = vmul.f32 %v341_v34, %v3527_v4  ;;  %v346_v27 = vmul.f32 %v341_v34, %v3532_v5 }
  0x58   :  { %v347_v36 = vmul.f32 %v341_v34, %v3537_v6  ;;  %v348_v41 = vmul.f32 %v341_v34, %v3542_v7  ;;  %v349_v38 = vmul.f32 %v341_v34, %v3809_v55  ;;  %v3828_v42 = vadd.f32 %v342_v23, %v3681_v32 }
  0x59   :  { %v3831_v43 = vadd.f32 %v343_v24, %v3684_v33  ;;  %v3834_v48 = vadd.f32 %v344_v60, %v3688_v13  ;;  %v3837_v44 = vadd.f32 %v345_v25, %v3691_v14  ;;  %v3840_v49 = vadd.f32 %v346_v27, %v3694_v62 }
  0x5a   :  { %v3843_v50 = vadd.f32 %v347_v36, %v3698_v63  ;;  %v3846_v46 = vadd.f32 %v348_v41, %v3701_v20  ;;  %v3849_v32 = vadd.f32 %v349_v38, %v3706_v22  ;;  %v360_v33 = vmul.f32 %v359_v47, %v3512_v1 }
  0x5b   :  { %v361_v13 = vmul.f32 %v359_v47, %v3517_v2  ;;  %v362_v14 = vmul.f32 %v359_v47, %v3522_v3  ;;  %v363_v62 = vmul.f32 %v359_v47, %v3527_v4  ;;  %v364_v63 = vmul.f32 %v359_v47, %v3532_v5 }
  0x5c   :  { %v365_v20 = vmul.f32 %v359_v47, %v3537_v6  ;;  %v366_v22 = vmul.f32 %v359_v47, %v3542_v7  ;;  %v367_v54 = vmul.f32 %v359_v47, %v3809_v55  ;;  %v3868_v52 = vadd.f32 %v360_v33, %v3747_v26 }
  0x5d   :  { %v3871_v56 = vadd.f32 %v361_v13, %v3750_v61  ;;  %v3874_v18 = vadd.f32 %v362_v14, %v3754_v11  ;;  %v3877_v30 = vadd.f32 %v363_v62, %v3757_v12  ;;  %v3880_v28 = vadd.f32 %v364_v63, %v3760_v35 }
  0x5e   :  { %v3883_v31 = vadd.f32 %v365_v20, %v3764_v37  ;;  %v3886_v34 = vadd.f32 %v366_v22, %v3767_v40  ;;  %v3889_v26 = vadd.f32 %v367_v54, %v3771_v39  ;;  %v378_v61 = vmul.f32 %v377_v21, %v3512_v1 }
  0x5f   :  { %v379_v11 = vmul.f32 %v377_v21, %v3517_v2  ;;  %v380_v12 = vmul.f32 %v377_v21, %v3522_v3  ;;  %v381_v35 = vmul.f32 %v377_v21, %v3527_v4  ;;  %v382_v37 = vmul.f32 %v377_v21, %v3532_v5 }
  0x60   :  { %7163 = vst [vmem:[#allocation8_spill] sm:$0xff] %v3889_v26  ;;  %v383_v40 = vmul.f32 %v377_v21, %v3537_v6  ;;  %v384_v47 = vmul.f32 %v377_v21, %v3542_v7  ;;  %v385_v39 = vmul.f32 %v377_v21, %v3809_v55  ;;  %v3899_v23 = vadd.f32 %v378_v61, %v332_v45 }
  0x61   :  { %v3901_v24 = vadd.f32 %v379_v11, %v333_v51  ;;  %v3903_v60 = vadd.f32 %v380_v12, %v334_v0  ;;  %v3905_v25 = vadd.f32 %v381_v35, %v335_v17  ;;  %v3907_v27 = vadd.f32 %v382_v37, %v336_v57  ;;  %v3928_v51 = vld [vmem:[%s7134_s0 + $0x88] sm:$0x1] }
  0x62   :  { %7164 = vst [vmem:[#allocation9_spill] sm:$0xff] %v3899_v23  ;;  %v3909_v36 = vadd.f32 %v383_v40, %v337_v19  ;;  %v3911_v41 = vadd.f32 %v384_v47, %v338_v10  ;;  %v3913_v38 = vadd.f32 %v385_v39, %v339_v29  ;;  %v395_v33 = vstv %s3851_s10  ;;  %s4203_s10 = sld [smem:[#allocation2 + $0x3]] }
  0x63   :  { %7165 = vst [vmem:[#allocation10_spill] sm:$0xff] %v3901_v24  ;;  %7166 = vst [vmem:[#allocation11_spill] sm:$0xff] %v3903_v60  ;;  %v3917_v13 = vstv %s3853_s11  ;;  %v3920_v21 = vstv %s3859_s12  ;;  %v3923_v45 = vstv %s3861_s13  ;;  %v396_v0 = vmul.f32 %v395_v33, %v3512_v1  ;;  %s4209_s11 = sld [smem:[#allocation2 + $0x1e]]  ;;  %s4211_s12 = sld [smem:[#allocation2 + $0x39]] }
  0x64   :  { %7167 = vst [vmem:[#allocation12_spill] sm:$0xff] %v3905_v25  ;;  %7168 = vst [vmem:[#allocation13_spill] sm:$0xff] %v3907_v27  ;;  %v397_v17 = vmul.f32 %v395_v33, %v3606_v53  ;;  %v398_v57 = vmul.f32 %v395_v33, %v3517_v2  ;;  %v399_v19 = vmul.f32 %v395_v33, %v3615_v58  ;;  %s5960_s13 = sld [smem:[#allocation2 + $0x2f]] }
  0x65   :  { %7169 = vst [vmem:[#allocation14_spill] sm:$0xff] %v3909_v36  ;;  %7170 = vst [vmem:[#allocation15_spill] sm:$0xff] %v3911_v41  ;;  %v400_v10 = vmul.f32 %v395_v33, %v3522_v3  ;;  %v401_v29 = vmul.f32 %v395_v33, %v3620_v59  ;;  %v402_v14 = vmul.f32 %v395_v33, %v3527_v4  ;;  %v428_v37 = vrot.slane %v396_v0, 1 }
  0x66   :  { %7171 = vst [vmem:[#allocation16_spill] sm:$0xff] %v3913_v38  ;;  %7172 = vst [vmem:[#allocation17_spill] sm:$0xff] %v3920_v21  ;;  %v403_v62 = vmul.f32 %v395_v33, %v3633_v8  ;;  %v404_v63 = vmul.f32 %v395_v33, %v3532_v5  ;;  %v405_v20 = vmul.f32 %v395_v33, %v3638_v9  ;;  %v429_v40 = vrot.slane %v397_v17, 1 }
  0x67   :  { %7173 = vst [vmem:[#allocation18_spill] sm:$0xff] %v3923_v45  ;;  %v406_v22 = vmul.f32 %v395_v33, %v3537_v6  ;;  %v407_v54 = vmul.f32 %v395_v33, %v3651_v15  ;;  %v408_v61 = vmul.f32 %v395_v33, %v3542_v7  ;;  %v409_v11 = vmul.f32 %v395_v33, %v3656_v16 }
  0x68   :  { %v410_v12 = vmul.f32 %v395_v33, %v3809_v55  ;;  %v411_v35 = vmul.f32 %v395_v33, %v3928_v51  ;;  %v431_v47 = vrot.slane %v398_v57, 1  ;;  %v432_v39 = vrot.slane %v399_v19, 1 }
  0x69   :  { %v434_v38 = vrot.slane %v400_v10, 1  ;;  %v435_v45 = vrot.slane %v401_v29, 1  ;;  %v437_v41 = vrot.slane %v402_v14, 1  ;;  %v438_v36 = vrot.slane %v403_v62, 1 }
  0x6a   :  { %v430_v27 = vsel %vm151_vm0, %v428_v37, %v429_v40  ;;  %v433_v25 = vsel %vm151_vm0, %v431_v47, %v432_v39  ;;  %v440_v60 = vrot.slane %v404_v63, 1  ;;  %v441_v24 = vrot.slane %v405_v20, 1 }
  0x6b   :  { %v436_v23 = vsel %vm151_vm0, %v434_v38, %v435_v45  ;;  %v439_v26 = vsel %vm151_vm0, %v437_v41, %v438_v36  ;;  %v443_v21 = vrot.slane %v406_v22, 1  ;;  %v444_v33 = vrot.slane %v407_v54, 1 }
  0x6c   :  { %v442_v0 = vsel %vm151_vm0, %v440_v60, %v441_v24  ;;  %v446_v17 = vrot.slane %v408_v61, 1  ;;  %v447_v57 = vrot.slane %v409_v11, 1  ;;  %v449_v19 = vrot.slane %v410_v12, 1 }
  0x6d   :  { %v445_v10 = vsel %vm151_vm0, %v443_v21, %v444_v33  ;;  %v450_v29 = vrot.slane %v411_v35, 1  ;;  %v3953_v14 = vadd.f32 %v430_v27, %v3828_v42  ;;  %v3956_v62 = vadd.f32 %v433_v25, %v3831_v43 }
  0x6e   :  { %v448_v38 = vsel %vm151_vm0, %v446_v17, %v447_v57  ;;  %v3960_v36 = vadd.f32 %v436_v23, %v3834_v48  ;;  %v3963_v41 = vadd.f32 %v439_v26, %v3837_v44  ;;  %v3966_v24 = vadd.f32 %v442_v0, %v3840_v49 }
  0x6f   :  { %v451_v60 = vsel %vm151_vm0, %v449_v19, %v450_v29  ;;  %v3970_v21 = vadd.f32 %v445_v10, %v3843_v50  ;;  %v3973_v42 = vadd.f32 %v448_v38, %v3846_v46  ;;  %v470_v43 = vmul.f32 %v3917_v13, %v3512_v1 }
  0x70   :  { %v3978_v48 = vadd.f32 %v451_v60, %v3849_v32  ;;  %v471_v44 = vmul.f32 %v3917_v13, %v3606_v53  ;;  %v472_v49 = vmul.f32 %v3917_v13, %v3517_v2  ;;  %v473_v26 = vmul.f32 %v3917_v13, %v3615_v58 }
  0x71   :  { %v474_v50 = vmul.f32 %v3917_v13, %v3522_v3  ;;  %v475_v46 = vmul.f32 %v3917_v13, %v3620_v59  ;;  %v476_v23 = vmul.f32 %v3917_v13, %v3527_v4  ;;  %v477_v32 = vmul.f32 %v3917_v13, %v3633_v8 }
  0x72   :  { %v478_v25 = vmul.f32 %v3917_v13, %v3532_v5  ;;  %v479_v27 = vmul.f32 %v3917_v13, %v3638_v9  ;;  %v480_v45 = vmul.f32 %v3917_v13, %v3537_v6  ;;  %v481_v63 = vmul.f32 %v3917_v13, %v3651_v15 }
  0x73   :  { %v482_v20 = vmul.f32 %v3917_v13, %v3542_v7  ;;  %v483_v22 = vmul.f32 %v3917_v13, %v3656_v16  ;;  %v484_v54 = vmul.f32 %v3917_v13, %v3809_v55  ;;  %v485_v61 = vmul.f32 %v3917_v13, %v3928_v51 }
  0x74   :  { %v502_v11 = vrot.slane %v470_v43, 1  ;;  %v503_v12 = vrot.slane %v471_v44, 1  ;;  %v505_v35 = vrot.slane %v472_v49, 1  ;;  %v506_v37 = vrot.slane %v473_v26, 1 }
  0x75   :  { %v508_v40 = vrot.slane %v474_v50, 1  ;;  %v509_v47 = vrot.slane %v475_v46, 1  ;;  %v511_v39 = vrot.slane %v476_v23, 1  ;;  %v512_v33 = vrot.slane %v477_v32, 1 }
  0x76   :  { %v504_v0 = vsel %vm151_vm0, %v502_v11, %v503_v12  ;;  %v507_v17 = vsel %vm151_vm0, %v505_v35, %v506_v37  ;;  %v514_v57 = vrot.slane %v478_v25, 1  ;;  %v515_v19 = vrot.slane %v479_v27, 1 }
  0x77   :  { %v510_v10 = vsel %vm151_vm0, %v508_v40, %v509_v47  ;;  %v513_v29 = vsel %vm151_vm0, %v511_v39, %v512_v33  ;;  %v517_v38 = vrot.slane %v480_v45, 1  ;;  %v518_v13 = vrot.slane %v481_v63, 1 }
  0x78   :  { %v516_v60 = vsel %vm151_vm0, %v514_v57, %v515_v19  ;;  %v520_v43 = vrot.slane %v482_v20, 1  ;;  %v521_v44 = vrot.slane %v483_v22, 1  ;;  %v523_v49 = vrot.slane %v484_v54, 1  ;;  %v7175_v54 = vld [vmem:[#allocation8_spill] sm:$0xff] }
  0x79   :  { %v519_v26 = vsel %vm151_vm0, %v517_v38, %v518_v13  ;;  %v524_v50 = vrot.slane %v485_v61, 1  ;;  %v4017_v46 = vadd.f32 %v504_v0, %v3868_v52  ;;  %v4020_v23 = vadd.f32 %v507_v17, %v3871_v56  ;;  %v7174_v56 = vld [vmem:[#allocation17_spill] sm:$0xff]  ;;  %v4093_v13 = vld [vmem:[%s7134_s0 + $0x1c0] sm:$0xff] }
  0x7a   :  { %v522_v32 = vsel %vm151_vm0, %v520_v43, %v521_v44  ;;  %v4024_v25 = vadd.f32 %v510_v10, %v3874_v18  ;;  %v4027_v27 = vadd.f32 %v513_v29, %v3877_v30  ;;  %v4030_v45 = vadd.f32 %v516_v60, %v3880_v28  ;;  %v7176_v44 = vld [vmem:[#allocation9_spill] sm:$0xff] }
  0x7b   :  { %v525_v63 = vsel %vm151_vm0, %v523_v49, %v524_v50  ;;  %v4034_v20 = vadd.f32 %v519_v26, %v3883_v31  ;;  %v4037_v52 = vadd.f32 %v522_v32, %v3886_v34  ;;  %v544_v22 = vmul.f32 %v7174_v56, %v3512_v1  ;;  %v7177_v26 = vld [vmem:[#allocation10_spill] sm:$0xff] }
  0x7c   :  { %v4042_v18 = vadd.f32 %v525_v63, %v7175_v54  ;;  %v545_v30 = vmul.f32 %v7174_v56, %v3606_v53  ;;  %v546_v28 = vmul.f32 %v7174_v56, %v3517_v2  ;;  %v547_v61 = vmul.f32 %v7174_v56, %v3615_v58  ;;  %v4103_v32 = vld [vmem:[%s7134_s0 + $0x1d0] sm:$0xff]  ;;  %v4108_v63 = vld [vmem:[%s7134_s0 + $0x1e0] sm:$0xff]  ;;  %v7178_v54 = vld [vmem:[#allocation11_spill] sm:$0xff] }
  0x7d   :  { %v548_v31 = vmul.f32 %v7174_v56, %v3522_v3  ;;  %v549_v34 = vmul.f32 %v7174_v56, %v3620_v59  ;;  %v550_v1 = vmul.f32 %v7174_v56, %v3527_v4  ;;  %v551_v11 = vmul.f32 %v7174_v56, %v3633_v8 }
  0x7e   :  { %v552_v53 = vmul.f32 %v7174_v56, %v3532_v5  ;;  %v553_v2 = vmul.f32 %v7174_v56, %v3638_v9  ;;  %v554_v58 = vmul.f32 %v7174_v56, %v3537_v6  ;;  %v555_v3 = vmul.f32 %v7174_v56, %v3651_v15 }
  0x7f   :  { %v556_v59 = vmul.f32 %v7174_v56, %v3542_v7  ;;  %v557_v4 = vmul.f32 %v7174_v56, %v3656_v16  ;;  %v558_v8 = vmul.f32 %v7174_v56, %v3809_v55  ;;  %v559_v5 = vmul.f32 %v7174_v56, %v3928_v51  ;;  %v4079_v55 = vld [vmem:[%s7134_s0 + $0x1b0] sm:$0xff] }
  0x80   :  { %v576_v12 = vrot.slane %v544_v22, 1  ;;  %v577_v9 = vrot.slane %v545_v30, 1  ;;  %v579_v35 = vrot.slane %v546_v28, 1  ;;  %v580_v37 = vrot.slane %v547_v61, 1  ;;  %v4113_v56 = vld [vmem:[%s7134_s0 + $0x1f0] sm:$0xff]  ;;  %v7179_v28 = vld [vmem:[#allocation12_spill] sm:$0xff] }
  0x81   :  { %v582_v6 = vrot.slane %v548_v31, 1  ;;  %v583_v40 = vrot.slane %v549_v34, 1  ;;  %v585_v47 = vrot.slane %v550_v1, 1  ;;  %v586_v15 = vrot.slane %v551_v11, 1  ;;  %v7180_v31 = vld [vmem:[#allocation13_spill] sm:$0xff]  ;;  %v4122_v1 = vld [vmem:[%s7134_s0 + $0x200] sm:$0xff] }
  0x82   :  { %v578_v39 = vsel %vm151_vm0, %v576_v12, %v577_v9  ;;  %v581_v7 = vsel %vm151_vm0, %v579_v35, %v580_v37  ;;  %v588_v33 = vrot.slane %v552_v53, 1  ;;  %v589_v16 = vrot.slane %v553_v2, 1  ;;  %v4127_v11 = vld [vmem:[%s7134_s0 + $0x210] sm:$0xff]  ;;  %v4132_v53 = vld [vmem:[%s7134_s0 + $0x220] sm:$0xff] }
  0x83   :  { %v584_v51 = vsel %vm151_vm0, %v582_v6, %v583_v40  ;;  %v587_v0 = vsel %vm151_vm0, %v585_v47, %v586_v15  ;;  %v591_v17 = vrot.slane %v554_v58, 1  ;;  %v592_v57 = vrot.slane %v555_v3, 1  ;;  %v7181_v58 = vld [vmem:[#allocation14_spill] sm:$0xff]  ;;  %v7184_v12 = vld [vmem:[#allocation16_spill] sm:$0xff] }
  0x84   :  { %v590_v19 = vsel %vm151_vm0, %v588_v33, %v589_v16  ;;  %v594_v10 = vrot.slane %v556_v59, 1  ;;  %v595_v29 = vrot.slane %v557_v4, 1  ;;  %v597_v38 = vrot.slane %v558_v8, 1  ;;  %v7182_v59 = vld [vmem:[#allocation15_spill] sm:$0xff]  ;;  %v7183_v8 = vld [vmem:[#allocation18_spill] sm:$0xff] }
  0x85   :  { %v593_v60 = vsel %vm151_vm0, %v591_v17, %v592_v57  ;;  %v598_v43 = vrot.slane %v559_v5, 1  ;;  %v608_v49 = vadd.f32 %v578_v39, %v7176_v44  ;;  %v609_v50 = vadd.f32 %v581_v7, %v7177_v26 }
  0x86   :  { %v596_v22 = vsel %vm151_vm0, %v594_v10, %v595_v29  ;;  %v610_v30 = vadd.f32 %v584_v51, %v7178_v54  ;;  %v611_v61 = vadd.f32 %v587_v0, %v7179_v28  ;;  %v612_v34 = vadd.f32 %v590_v19, %v7180_v31 }
  0x87   :  { %v599_v2 = vsel %vm151_vm0, %v597_v38, %v598_v43  ;;  %v613_v3 = vadd.f32 %v593_v60, %v7181_v58  ;;  %v614_v4 = vadd.f32 %v596_v22, %v7182_v59  ;;  %v628_v5 = vmul.f32 %v4079_v55, %v7183_v8 }
  0x88   :  { %v615_v9 = vadd.f32 %v599_v2, %v7184_v12  ;;  %v629_v35 = vmul.f32 %v4093_v13, %v7183_v8  ;;  %v630_v37 = vmul.f32 %v4103_v32, %v7183_v8  ;;  %v631_v6 = vmul.f32 %v4108_v63, %v7183_v8 }
  0x89   :  { %v632_v40 = vmul.f32 %v4113_v56, %v7183_v8  ;;  %v633_v47 = vmul.f32 %v4122_v1, %v7183_v8  ;;  %v634_v15 = vmul.f32 %v4127_v11, %v7183_v8  ;;  %v635_v39 = vmul.f32 %v4132_v53, %v7183_v8 }
  0x8a   :  { %v636_v7 = vadd.f32 %v628_v5, %v3953_v14  ;;  %v637_v33 = vadd.f32 %v629_v35, %v3956_v62  ;;  %v638_v16 = vadd.f32 %v630_v37, %v3960_v36  ;;  %v639_v51 = vadd.f32 %v631_v6, %v3963_v41 }
  0x8b   :  { %v640_v0 = vadd.f32 %v632_v40, %v3966_v24  ;;  %v641_v17 = vadd.f32 %v633_v47, %v3970_v21  ;;  %v642_v57 = vadd.f32 %v634_v15, %v3973_v42  ;;  %v643_v19 = vadd.f32 %v635_v39, %v3978_v48 }
  0x8c   :  { %v645_v10 = vstv %s4081_s18  ;;  %v663_v29 = vstv %s4085_s19  ;;  %v681_v38 = vstv %s4087_s20  ;;  %v699_v60 = vstv %s4095_s21  ;;  %s4597_s21 = sld [smem:[#allocation2 + $0x3a]]  ;;  %s5034_s18 = sld [smem:[#allocation2 + $0xf]] }
  0x8d   :  { %v646_v14 = vmul.f32 %v4079_v55, %v645_v10  ;;  %v647_v62 = vmul.f32 %v4093_v13, %v645_v10  ;;  %v648_v36 = vmul.f32 %v4103_v32, %v645_v10  ;;  %v649_v41 = vmul.f32 %v4108_v63, %v645_v10  ;;  %s5040_s19 = sld [smem:[#allocation2 + $0x2a]]  ;;  %s5042_s20 = sld [smem:[#allocation2 + $0x45]] }
  0x8e   :  { %v650_v24 = vmul.f32 %v4113_v56, %v645_v10  ;;  %v651_v21 = vmul.f32 %v4122_v1, %v645_v10  ;;  %v652_v42 = vmul.f32 %v4127_v11, %v645_v10  ;;  %v653_v48 = vmul.f32 %v4132_v53, %v645_v10 }
  0x8f   :  { %v654_v43 = vadd.f32 %v646_v14, %v4017_v46  ;;  %v655_v44 = vadd.f32 %v647_v62, %v4020_v23  ;;  %v656_v26 = vadd.f32 %v648_v36, %v4024_v25  ;;  %v657_v22 = vadd.f32 %v649_v41, %v4027_v27 }
  0x90   :  { %v658_v54 = vadd.f32 %v650_v24, %v4030_v45  ;;  %v659_v28 = vadd.f32 %v651_v21, %v4034_v20  ;;  %v660_v31 = vadd.f32 %v652_v42, %v4037_v52  ;;  %v661_v2 = vadd.f32 %v653_v48, %v4042_v18  ;;  %v3234_v52 = vld [vmem:[%s7134_s0 + $0x230] sm:$0xff] }
  0x91   :  { %v664_v58 = vmul.f32 %v4079_v55, %v663_v29  ;;  %v665_v59 = vmul.f32 %v4093_v13, %v663_v29  ;;  %v666_v46 = vmul.f32 %v4103_v32, %v663_v29  ;;  %v667_v23 = vmul.f32 %v4108_v63, %v663_v29 }
  0x92   :  { %v668_v25 = vmul.f32 %v4113_v56, %v663_v29  ;;  %v669_v27 = vmul.f32 %v4122_v1, %v663_v29  ;;  %v670_v45 = vmul.f32 %v4127_v11, %v663_v29  ;;  %v671_v20 = vmul.f32 %v4132_v53, %v663_v29 }
  0x93   :  { %v672_v18 = vadd.f32 %v664_v58, %v608_v49  ;;  %v673_v55 = vadd.f32 %v665_v59, %v609_v50  ;;  %v674_v8 = vadd.f32 %v666_v46, %v610_v30  ;;  %v675_v5 = vadd.f32 %v667_v23, %v611_v61 }
  0x94   :  { %v4193_v12 = vadd.f32 %v668_v25, %v612_v34  ;;  %v4195_v35 = vadd.f32 %v669_v27, %v613_v3  ;;  %v4197_v37 = vadd.f32 %v670_v45, %v614_v4  ;;  %v4199_v6 = vadd.f32 %v671_v20, %v615_v9  ;;  %v4275_v25 = vld [vmem:[%s7134_s0 + $0x3a0] sm:$0xff]  ;;  %v4280_v45 = vld [vmem:[%s7134_s0 + $0x3b0] sm:$0xff] }
  0x95   :  { %v682_v40 = vmul.f32 %v4093_v13, %v681_v38  ;;  %v683_v47 = vmul.f32 %v4103_v32, %v681_v38  ;;  %v684_v49 = vmul.f32 %v4108_v63, %v681_v38  ;;  %v685_v50 = vmul.f32 %v4113_v56, %v681_v38  ;;  %v4285_v20 = vld [vmem:[%s7134_s0 + $0x3c0] sm:$0xff] }
  0x96   :  { %v686_v30 = vmul.f32 %v4122_v1, %v681_v38  ;;  %v687_v61 = vmul.f32 %v4127_v11, %v681_v38  ;;  %v688_v34 = vmul.f32 %v4132_v53, %v681_v38  ;;  %v689_v3 = vmul.f32 %v3234_v52, %v681_v38 }
  0x97   :  { %v690_v4 = vadd.f32 %v682_v40, %v636_v7  ;;  %v691_v9 = vadd.f32 %v683_v47, %v637_v33  ;;  %v692_v15 = vadd.f32 %v684_v49, %v638_v16  ;;  %v693_v39 = vadd.f32 %v685_v50, %v639_v51 }
  0x98   :  { %v694_v10 = vadd.f32 %v686_v30, %v640_v0  ;;  %v695_v29 = vadd.f32 %v687_v61, %v641_v17  ;;  %v696_v14 = vadd.f32 %v688_v34, %v642_v57  ;;  %v697_v62 = vadd.f32 %v689_v3, %v643_v19 }
  0x99   :  { %v700_v36 = vmul.f32 %v4093_v13, %v699_v60  ;;  %v701_v41 = vmul.f32 %v4103_v32, %v699_v60  ;;  %v702_v24 = vmul.f32 %v4108_v63, %v699_v60  ;;  %v703_v21 = vmul.f32 %v4113_v56, %v699_v60 }
  0x9a   :  { %v704_v7 = vmul.f32 %v4122_v1, %v699_v60  ;;  %v705_v33 = vmul.f32 %v4127_v11, %v699_v60  ;;  %v706_v16 = vmul.f32 %v4132_v53, %v699_v60  ;;  %v707_v51 = vmul.f32 %v3234_v52, %v699_v60 }
  0x9b   :  { %v4223_v0 = vadd.f32 %v700_v36, %v654_v43  ;;  %v4225_v17 = vadd.f32 %v701_v41, %v655_v44  ;;  %v4227_v57 = vadd.f32 %v702_v24, %v656_v26  ;;  %v4229_v19 = vadd.f32 %v703_v21, %v657_v22 }
  0x9c   :  { %v4231_v38 = vadd.f32 %v704_v7, %v658_v54  ;;  %v4233_v42 = vadd.f32 %v705_v33, %v659_v28  ;;  %v4235_v48 = vadd.f32 %v706_v16, %v660_v31  ;;  %v4237_v58 = vadd.f32 %v707_v51, %v661_v2  ;;  %v4252_v54 = vld [vmem:[%s7134_s0 + $0x360] sm:$0xff]  ;;  %v4257_v28 = vld [vmem:[%s7134_s0 + $0x370] sm:$0xff] }
  0x9d   :  { %v717_v59 = vstv %s4201_s9  ;;  %v752_v46 = vstv %s4203_s10  ;;  %v770_v23 = vstv %s4209_s11  ;;  %v4243_v60 = vstv %s4211_s12  ;;  %s5958_s12 = sld [smem:[#allocation2 + $0x14]]  ;;  %s6440_s11 = sld [smem:[#allocation2 + $0x50]] }
  0x9e   :  { %v718_v43 = vmul.f32 %v4093_v13, %v717_v59  ;;  %v719_v44 = vmul.f32 %v4103_v32, %v717_v59  ;;  %v720_v26 = vmul.f32 %v4108_v63, %v717_v59  ;;  %v721_v22 = vmul.f32 %v4113_v56, %v717_v59  ;;  %v4265_v63 = vld [vmem:[%s7134_s0 + $0x380] sm:$0xff]  ;;  %v4270_v56 = vld [vmem:[%s7134_s0 + $0x390] sm:$0xff]  ;;  %s6651_s9 = sld [smem:[#allocation2 + $0x4b]] }
  0x9f   :  { %v722_v31 = vmul.f32 %v4122_v1, %v717_v59  ;;  %v723_v13 = vmul.f32 %v4127_v11, %v717_v59  ;;  %v724_v32 = vmul.f32 %v4132_v53, %v717_v59  ;;  %v725_v2 = vmul.f32 %v3234_v52, %v717_v59  ;;  %v4290_v52 = vld [vmem:[%s7134_s0 + $0x3d0] sm:$0xff] }
  0xa0   :  { %v726_v1 = vadd.f32 %v718_v43, %v672_v18  ;;  %v727_v11 = vadd.f32 %v719_v44, %v673_v55  ;;  %v728_v27 = vadd.f32 %v720_v26, %v674_v8  ;;  %v729_v53 = vadd.f32 %v721_v22, %v675_v5  ;;  %v4379_v44 = vld [vmem:[%s7134_s0 + $0x368] sm:$0x1]  ;;  %v4384_v26 = vld [vmem:[%s7134_s0 + $0x378] sm:$0x1] }
  0xa1   :  { %v730_v18 = vadd.f32 %v722_v31, %v4193_v12  ;;  %v731_v55 = vadd.f32 %v723_v13, %v4195_v35  ;;  %v732_v8 = vadd.f32 %v724_v32, %v4197_v37  ;;  %v733_v5 = vadd.f32 %v725_v2, %v4199_v6  ;;  %v4389_v22 = vld [vmem:[%s7134_s0 + $0x388] sm:$0x1]  ;;  %v4402_v2 = vld [vmem:[%s7134_s0 + $0x398] sm:$0x1] }
  0xa2   :  { %v753_v40 = vmul.f32 %v4252_v54, %v752_v46  ;;  %v754_v47 = vmul.f32 %v4257_v28, %v752_v46  ;;  %v755_v49 = vmul.f32 %v4265_v63, %v752_v46  ;;  %v756_v50 = vmul.f32 %v4270_v56, %v752_v46 }
  0xa3   :  { %v757_v30 = vmul.f32 %v4275_v25, %v752_v46  ;;  %v758_v61 = vmul.f32 %v4280_v45, %v752_v46  ;;  %v759_v12 = vmul.f32 %v4285_v20, %v752_v46  ;;  %v760_v35 = vmul.f32 %v4290_v52, %v752_v46 }
  0xa4   :  { %v4304_v34 = vadd.f32 %v753_v40, %v690_v4  ;;  %v4306_v37 = vadd.f32 %v754_v47, %v691_v9  ;;  %v4308_v6 = vadd.f32 %v755_v49, %v692_v15  ;;  %v4310_v3 = vadd.f32 %v756_v50, %v693_v39  ;;  %v4407_v40 = vld [vmem:[%s7134_s0 + $0x3a8] sm:$0x1] }
  0xa5   :  { %v4312_v36 = vadd.f32 %v757_v30, %v694_v10  ;;  %v4314_v41 = vadd.f32 %v758_v61, %v695_v29  ;;  %v4316_v24 = vadd.f32 %v759_v12, %v696_v14  ;;  %v4318_v21 = vadd.f32 %v760_v35, %v697_v62  ;;  %v4435_v12 = vld [vmem:[%s7134_s0 + $0x3c8] sm:$0x1] }
  0xa6   :  { %v771_v4 = vmul.f32 %v4252_v54, %v770_v23  ;;  %v772_v9 = vmul.f32 %v4257_v28, %v770_v23  ;;  %v773_v15 = vmul.f32 %v4265_v63, %v770_v23  ;;  %v774_v39 = vmul.f32 %v4270_v56, %v770_v23 }
  0xa7   :  { %v775_v10 = vmul.f32 %v4275_v25, %v770_v23  ;;  %v776_v29 = vmul.f32 %v4280_v45, %v770_v23  ;;  %v777_v14 = vmul.f32 %v4285_v20, %v770_v23  ;;  %v778_v62 = vmul.f32 %v4290_v52, %v770_v23 }
  0xa8   :  { %v4337_v7 = vadd.f32 %v771_v4, %v4223_v0  ;;  %v4340_v33 = vadd.f32 %v772_v9, %v4225_v17  ;;  %v4343_v16 = vadd.f32 %v773_v15, %v4227_v57  ;;  %v4346_v51 = vadd.f32 %v774_v39, %v4229_v19 }
  0xa9   :  { %v4349_v59 = vadd.f32 %v775_v10, %v4231_v38  ;;  %v4352_v46 = vadd.f32 %v776_v29, %v4233_v42  ;;  %v4355_v23 = vadd.f32 %v777_v14, %v4235_v48  ;;  %v4358_v0 = vadd.f32 %v778_v62, %v4237_v58 }
  0xaa   :  { %v789_v17 = vmul.f32 %v4252_v54, %v4243_v60  ;;  %v790_v57 = vmul.f32 %v4257_v28, %v4243_v60  ;;  %v791_v19 = vmul.f32 %v4265_v63, %v4243_v60  ;;  %v792_v38 = vmul.f32 %v4270_v56, %v4243_v60 }
  0xab   :  { %7185 = vst [vmem:[#allocation17_spill] sm:$0xff] %v4358_v0  ;;  %v793_v42 = vmul.f32 %v4275_v25, %v4243_v60  ;;  %v794_v48 = vmul.f32 %v4280_v45, %v4243_v60  ;;  %v795_v58 = vmul.f32 %v4285_v20, %v4243_v60  ;;  %v796_v43 = vmul.f32 %v4290_v52, %v4243_v60 }
  0xac   :  { %v4391_v31 = vadd.f32 %v789_v17, %v726_v1  ;;  %v4393_v60 = vadd.f32 %v790_v57, %v727_v11  ;;  %v4395_v13 = vadd.f32 %v791_v19, %v728_v27  ;;  %v4397_v32 = vadd.f32 %v792_v38, %v729_v53  ;;  %v4412_v1 = vld [vmem:[%s7134_s0 + $0x3b8] sm:$0x1] }
  0xad   :  { %v4414_v11 = vadd.f32 %v793_v42, %v730_v18  ;;  %v4416_v27 = vadd.f32 %v794_v48, %v731_v55  ;;  %v4418_v53 = vadd.f32 %v795_v58, %v732_v8  ;;  %v4420_v47 = vadd.f32 %v796_v43, %v733_v5  ;;  %v4440_v18 = vld [vmem:[%s7134_s0 + $0x3d8] sm:$0x1] }
  0xae   :  { %7186 = vst [vmem:[#allocation8_spill] sm:$0xff] %v4391_v31  ;;  %7187 = vst [vmem:[#allocation9_spill] sm:$0xff] %v4393_v60  ;;  %v806_v49 = vstv %s4320_s27  ;;  %v4424_v50 = vstv %s4322_s28  ;;  %v4427_v30 = vstv %s4328_s29  ;;  %v4430_v61 = vstv %s4330_s30  ;;  %s4750_s27 = sld [smem:[#allocation2 + $0x26]]  ;;  %s4752_s28 = sld [smem:[#allocation2 + $0x41]] }
  0xaf   :  { %7188 = vst [vmem:[#allocation10_spill] sm:$0xff] %v4395_v13  ;;  %7189 = vst [vmem:[#allocation11_spill] sm:$0xff] %v4397_v32  ;;  %v807_v55 = vmul.f32 %v4252_v54, %v806_v49  ;;  %v808_v8 = vmul.f32 %v4379_v44, %v806_v49  ;;  %v809_v5 = vmul.f32 %v4257_v28, %v806_v49  ;;  %s5709_s29 = sld [smem:[#allocation2 + $0x44]]  ;;  %s5711_s30 = sld [smem:[#allocation2 + $0xd]] }
  0xb0   :  { %7190 = vst [vmem:[#allocation12_spill] sm:$0xff] %v4414_v11  ;;  %7191 = vst [vmem:[#allocation13_spill] sm:$0xff] %v4416_v27  ;;  %v810_v35 = vmul.f32 %v4384_v26, %v806_v49  ;;  %v811_v4 = vmul.f32 %v4265_v63, %v806_v49  ;;  %v812_v9 = vmul.f32 %v4389_v22, %v806_v49 }
  0xb1   :  { %7192 = vst [vmem:[#allocation14_spill] sm:$0xff] %v4418_v53  ;;  %7193 = vst [vmem:[#allocation15_spill] sm:$0xff] %v4420_v47  ;;  %v813_v15 = vmul.f32 %v4270_v56, %v806_v49  ;;  %v814_v39 = vmul.f32 %v4402_v2, %v806_v49  ;;  %v815_v10 = vmul.f32 %v4275_v25, %v806_v49  ;;  %v839_v42 = vrot.slane %v807_v55, 1 }
  0xb2   :  { %7194 = vst [vmem:[#allocation18_spill] sm:$0xff] %v4427_v30  ;;  %7195 = vst [vmem:[#allocation16_spill] sm:$0xff] %v4430_v61  ;;  %v816_v29 = vmul.f32 %v4407_v40, %v806_v49  ;;  %v817_v14 = vmul.f32 %v4280_v45, %v806_v49  ;;  %v818_v62 = vmul.f32 %v4412_v1, %v806_v49  ;;  %v840_v48 = vrot.slane %v808_v8, 1 }
  0xb3   :  { %v819_v17 = vmul.f32 %v4285_v20, %v806_v49  ;;  %v820_v57 = vmul.f32 %v4435_v12, %v806_v49  ;;  %v821_v19 = vmul.f32 %v4290_v52, %v806_v49  ;;  %v822_v38 = vmul.f32 %v4440_v18, %v806_v49 }
  0xb4   :  { %v842_v58 = vrot.slane %v809_v5, 1  ;;  %v843_v43 = vrot.slane %v810_v35, 1  ;;  %v845_v47 = vrot.slane %v811_v4, 1  ;;  %v846_v61 = vrot.slane %v812_v9, 1 }
  0xb5   :  { %v848_v53 = vrot.slane %v813_v15, 1  ;;  %v849_v27 = vrot.slane %v814_v39, 1  ;;  %v841_v11 = vsel %vm151_vm0, %v839_v42, %v840_v48  ;;  %v851_v13 = vrot.slane %v815_v10, 1 }
  0xb6   :  { %v844_v32 = vsel %vm151_vm0, %v842_v58, %v843_v43  ;;  %v852_v60 = vrot.slane %v816_v29, 1  ;;  %v847_v31 = vsel %vm151_vm0, %v845_v47, %v846_v61  ;;  %v854_v30 = vrot.slane %v817_v14, 1 }
  0xb7   :  { %v850_v0 = vsel %vm151_vm0, %v848_v53, %v849_v27  ;;  %v855_v49 = vrot.slane %v818_v62, 1  ;;  %v857_v8 = vrot.slane %v819_v17, 1  ;;  %v858_v5 = vrot.slane %v820_v57, 1 }
  0xb8   :  { %v853_v55 = vsel %vm151_vm0, %v851_v13, %v852_v60  ;;  %v860_v35 = vrot.slane %v821_v19, 1  ;;  %v861_v9 = vrot.slane %v822_v38, 1  ;;  %v4465_v15 = vadd.f32 %v841_v11, %v4304_v34 }
  0xb9   :  { %v856_v4 = vsel %vm151_vm0, %v854_v30, %v855_v49  ;;  %v4468_v39 = vadd.f32 %v844_v32, %v4306_v37  ;;  %v859_v47 = vsel %vm151_vm0, %v857_v8, %v858_v5  ;;  %v4472_v27 = vadd.f32 %v847_v31, %v4308_v6 }
  0xba   :  { %v4475_v53 = vadd.f32 %v850_v0, %v4310_v3  ;;  %v4478_v60 = vadd.f32 %v853_v55, %v4312_v36  ;;  %v862_v13 = vsel %vm151_vm0, %v860_v35, %v861_v9  ;;  %v4482_v30 = vadd.f32 %v856_v4, %v4314_v41 }
  0xbb   :  { %v4485_v34 = vadd.f32 %v859_v47, %v4316_v24  ;;  %v881_v37 = vmul.f32 %v4252_v54, %v4424_v50  ;;  %v4490_v6 = vadd.f32 %v862_v13, %v4318_v21  ;;  %v882_v3 = vmul.f32 %v4379_v44, %v4424_v50 }
  0xbc   :  { %v883_v36 = vmul.f32 %v4257_v28, %v4424_v50  ;;  %v884_v0 = vmul.f32 %v4384_v26, %v4424_v50  ;;  %v885_v41 = vmul.f32 %v4265_v63, %v4424_v50  ;;  %v886_v24 = vmul.f32 %v4389_v22, %v4424_v50 }
  0xbd   :  { %v887_v31 = vmul.f32 %v4270_v56, %v4424_v50  ;;  %v888_v21 = vmul.f32 %v4402_v2, %v4424_v50  ;;  %v889_v32 = vmul.f32 %v4275_v25, %v4424_v50  ;;  %v890_v11 = vmul.f32 %v4407_v40, %v4424_v50 }
  0xbe   :  { %v891_v61 = vmul.f32 %v4280_v45, %v4424_v50  ;;  %v892_v10 = vmul.f32 %v4412_v1, %v4424_v50  ;;  %v893_v29 = vmul.f32 %v4285_v20, %v4424_v50  ;;  %v894_v14 = vmul.f32 %v4435_v12, %v4424_v50 }
  0xbf   :  { %v895_v62 = vmul.f32 %v4290_v52, %v4424_v50  ;;  %v896_v17 = vmul.f32 %v4440_v18, %v4424_v50  ;;  %v913_v57 = vrot.slane %v881_v37, 1  ;;  %v914_v19 = vrot.slane %v882_v3, 1 }
  0xc0   :  { %v916_v38 = vrot.slane %v883_v36, 1  ;;  %v917_v42 = vrot.slane %v884_v0, 1  ;;  %v919_v48 = vrot.slane %v885_v41, 1  ;;  %v920_v58 = vrot.slane %v886_v24, 1 }
  0xc1   :  { %v922_v43 = vrot.slane %v887_v31, 1  ;;  %v923_v49 = vrot.slane %v888_v21, 1  ;;  %v915_v55 = vsel %vm151_vm0, %v913_v57, %v914_v19  ;;  %v925_v5 = vrot.slane %v889_v32, 1 }
  0xc2   :  { %v918_v8 = vsel %vm151_vm0, %v916_v38, %v917_v42  ;;  %v926_v35 = vrot.slane %v890_v11, 1  ;;  %v921_v4 = vsel %vm151_vm0, %v919_v48, %v920_v58  ;;  %v928_v47 = vrot.slane %v891_v61, 1 }
  0xc3   :  { %v924_v9 = vsel %vm151_vm0, %v922_v43, %v923_v49  ;;  %v929_v50 = vrot.slane %v892_v10, 1  ;;  %v931_v37 = vrot.slane %v893_v29, 1  ;;  %v932_v3 = vrot.slane %v894_v14, 1 }
  0xc4   :  { %v927_v13 = vsel %vm151_vm0, %v925_v5, %v926_v35  ;;  %v934_v36 = vrot.slane %v895_v62, 1  ;;  %v935_v41 = vrot.slane %v896_v17, 1  ;;  %v4529_v24 = vadd.f32 %v915_v55, %v4337_v7  ;;  %v7197_v62 = vld [vmem:[#allocation17_spill] sm:$0xff] }
  0xc5   :  { %v930_v0 = vsel %vm151_vm0, %v928_v47, %v929_v50  ;;  %v4532_v31 = vadd.f32 %v918_v8, %v4340_v33  ;;  %v933_v21 = vsel %vm151_vm0, %v931_v37, %v932_v3  ;;  %v4536_v32 = vadd.f32 %v921_v4, %v4343_v16  ;;  %v7196_v33 = vld [vmem:[#allocation18_spill] sm:$0xff]  ;;  %v3264_v50 = vld [vmem:[%s7134_s0 + $0x520] sm:$0xff] }
  0xc6   :  { %v4539_v11 = vadd.f32 %v924_v9, %v4346_v51  ;;  %v4542_v61 = vadd.f32 %v927_v13, %v4349_v59  ;;  %v936_v10 = vsel %vm151_vm0, %v934_v36, %v935_v41  ;;  %v4546_v29 = vadd.f32 %v930_v0, %v4352_v46  ;;  %v7198_v3 = vld [vmem:[#allocation8_spill] sm:$0xff]  ;;  %v7199_v0 = vld [vmem:[#allocation9_spill] sm:$0xff] }
  0xc7   :  { %v4549_v7 = vadd.f32 %v933_v21, %v4355_v23  ;;  %v955_v14 = vmul.f32 %v4252_v54, %v7196_v33  ;;  %v4554_v16 = vadd.f32 %v936_v10, %v7197_v62  ;;  %v956_v51 = vmul.f32 %v4379_v44, %v7196_v33  ;;  %v3265_v21 = vld [vmem:[%s7134_s0 + $0x530] sm:$0xff]  ;;  %v3266_v10 = vld [vmem:[%s7134_s0 + $0x540] sm:$0xff] }
  0xc8   :  { %v957_v59 = vmul.f32 %v4257_v28, %v7196_v33  ;;  %v958_v17 = vmul.f32 %v4384_v26, %v7196_v33  ;;  %v959_v46 = vmul.f32 %v4265_v63, %v7196_v33  ;;  %v960_v23 = vmul.f32 %v4389_v22, %v7196_v33  ;;  %v7200_v62 = vld [vmem:[#allocation10_spill] sm:$0xff] }
  0xc9   :  { %v961_v54 = vmul.f32 %v4270_v56, %v7196_v33  ;;  %v962_v57 = vmul.f32 %v4402_v2, %v7196_v33  ;;  %v963_v44 = vmul.f32 %v4275_v25, %v7196_v33  ;;  %v964_v28 = vmul.f32 %v4407_v40, %v7196_v33 }
  0xca   :  { %v965_v26 = vmul.f32 %v4280_v45, %v7196_v33  ;;  %v966_v63 = vmul.f32 %v4412_v1, %v7196_v33  ;;  %v967_v22 = vmul.f32 %v4285_v20, %v7196_v33  ;;  %v968_v56 = vmul.f32 %v4435_v12, %v7196_v33 }
  0xcb   :  { %v969_v2 = vmul.f32 %v4290_v52, %v7196_v33  ;;  %v970_v25 = vmul.f32 %v4440_v18, %v7196_v33  ;;  %v987_v19 = vrot.slane %v955_v14, 1  ;;  %v988_v40 = vrot.slane %v956_v51, 1  ;;  %v4591_v52 = vld [vmem:[%s7134_s0 + $0x510] sm:$0xff] }
  0xcc   :  { %v990_v38 = vrot.slane %v957_v59, 1  ;;  %v991_v42 = vrot.slane %v958_v17, 1  ;;  %v993_v45 = vrot.slane %v959_v46, 1  ;;  %v994_v48 = vrot.slane %v960_v23, 1  ;;  %v3267_v33 = vld [vmem:[%s7134_s0 + $0x550] sm:$0xff]  ;;  %v7201_v59 = vld [vmem:[#allocation11_spill] sm:$0xff] }
  0xcd   :  { %v996_v58 = vrot.slane %v961_v54, 1  ;;  %v997_v1 = vrot.slane %v962_v57, 1  ;;  %v989_v43 = vsel %vm151_vm0, %v987_v19, %v988_v40  ;;  %v999_v49 = vrot.slane %v963_v44, 1  ;;  %v7202_v46 = vld [vmem:[#allocation12_spill] sm:$0xff]  ;;  %v3269_v57 = vld [vmem:[%s7134_s0 + $0x570] sm:$0xff]  ;;  %v7206_v19 = vld [vmem:[#allocation15_spill] sm:$0xff] }
  0xce   :  { %v992_v20 = vsel %vm151_vm0, %v990_v38, %v991_v42  ;;  %v1000_v12 = vrot.slane %v964_v28, 1  ;;  %v995_v18 = vsel %vm151_vm0, %v993_v45, %v994_v48  ;;  %v1002_v8 = vrot.slane %v965_v26, 1  ;;  %v3268_v54 = vld [vmem:[%s7134_s0 + $0x560] sm:$0xff]  ;;  %v7203_v26 = vld [vmem:[#allocation13_spill] sm:$0xff] }
  0xcf   :  { %v998_v55 = vsel %vm151_vm0, %v996_v58, %v997_v1  ;;  %v1003_v5 = vrot.slane %v966_v63, 1  ;;  %v1005_v4 = vrot.slane %v967_v22, 1  ;;  %v1006_v9 = vrot.slane %v968_v56, 1  ;;  %v3270_v44 = vld [vmem:[%s7134_s0 + $0x580] sm:$0xff]  ;;  %v7204_v22 = vld [vmem:[#allocation14_spill] sm:$0xff] }
  0xd0   :  { %v1001_v35 = vsel %vm151_vm0, %v999_v49, %v1000_v12  ;;  %v1008_v47 = vrot.slane %v969_v2, 1  ;;  %v1009_v37 = vrot.slane %v970_v25, 1  ;;  %v4609_v36 = vadd.f32 %v989_v43, %v7198_v3  ;;  %v7205_v2 = vld [vmem:[#allocation16_spill] sm:$0xff] }
  0xd1   :  { %v1004_v13 = vsel %vm151_vm0, %v1002_v8, %v1003_v5  ;;  %v4612_v41 = vadd.f32 %v992_v20, %v7199_v0  ;;  %v1007_v14 = vsel %vm151_vm0, %v1005_v4, %v1006_v9  ;;  %v1021_v51 = vadd.f32 %v995_v18, %v7200_v62 }
  0xd2   :  { %v1022_v17 = vadd.f32 %v998_v55, %v7201_v59  ;;  %v4627_v23 = vadd.f32 %v1001_v35, %v7202_v46  ;;  %v1010_v28 = vsel %vm151_vm0, %v1008_v47, %v1009_v37  ;;  %v1024_v63 = vadd.f32 %v1004_v13, %v7203_v26 }
  0xd3   :  { %v1025_v56 = vadd.f32 %v1007_v14, %v7204_v22  ;;  %v1038_v25 = vmul.f32 %v4591_v52, %v7205_v2  ;;  %v1026_v40 = vadd.f32 %v1010_v28, %v7206_v19  ;;  %v1039_v38 = vmul.f32 %v3264_v50, %v7205_v2 }
  0xd4   :  { %v1040_v42 = vmul.f32 %v3265_v21, %v7205_v2  ;;  %v1041_v45 = vmul.f32 %v3266_v10, %v7205_v2  ;;  %v1042_v48 = vmul.f32 %v3267_v33, %v7205_v2  ;;  %v1043_v58 = vmul.f32 %v3268_v54, %v7205_v2 }
  0xd5   :  { %v1044_v1 = vmul.f32 %v3269_v57, %v7205_v2  ;;  %v1045_v43 = vmul.f32 %v3270_v44, %v7205_v2  ;;  %v4652_v20 = vadd.f32 %v1038_v25, %v4465_v15  ;;  %v4655_v49 = vadd.f32 %v1039_v38, %v4468_v39 }
  0xd6   :  { %v4658_v12 = vadd.f32 %v1040_v42, %v4472_v27  ;;  %v4661_v18 = vadd.f32 %v1041_v45, %v4475_v53  ;;  %v4664_v55 = vadd.f32 %v1042_v48, %v4478_v60  ;;  %v4667_v8 = vadd.f32 %v1043_v58, %v4482_v30 }
  0xd7   :  { %v4670_v5 = vadd.f32 %v1044_v1, %v4485_v34  ;;  %v4673_v15 = vadd.f32 %v1045_v43, %v4490_v6  ;;  %v1055_v39 = vstv %s4593_s2  ;;  %v1073_v35 = vstv %s4597_s21  ;;  %s5439_s21 = sld [smem:[#allocation2 + $0xc]]  ;;  %s5827_s2 = sld [smem:[#allocation2 + $0x12]] }
  0xd8   :  { %v1110_v4 = vstv %s4599_s22  ;;  %v4679_v27 = vstv %s4605_s25  ;;  %v1056_v53 = vmul.f32 %v4591_v52, %v1055_v39  ;;  %v1057_v9 = vmul.f32 %v3264_v50, %v1055_v39  ;;  %s4742_s25 = sld [smem:[#allocation2 + $0x3f]] }
  0xd9   :  { %v1058_v47 = vmul.f32 %v3265_v21, %v1055_v39  ;;  %v1059_v60 = vmul.f32 %v3266_v10, %v1055_v39  ;;  %v1060_v13 = vmul.f32 %v3267_v33, %v1055_v39  ;;  %v1061_v37 = vmul.f32 %v3268_v54, %v1055_v39  ;;  %s5441_s22 = sld [smem:[#allocation2 + $0x27]] }
  0xda   :  { %v1062_v30 = vmul.f32 %v3269_v57, %v1055_v39  ;;  %v1063_v3 = vmul.f32 %v3270_v44, %v1055_v39  ;;  %v1064_v34 = vadd.f32 %v1056_v53, %v4529_v24  ;;  %v1065_v0 = vadd.f32 %v1057_v9, %v4532_v31  ;;  %v4694_v24 = vld [vmem:[%s7134_s0 + $0x90] sm:$0xff]  ;;  %v4699_v31 = vld [vmem:[%s7134_s0 + $0xa0] sm:$0xff] }
  0xdb   :  { %v1066_v6 = vadd.f32 %v1058_v47, %v4536_v32  ;;  %v1067_v14 = vadd.f32 %v1059_v60, %v4539_v11  ;;  %v1068_v62 = vadd.f32 %v1060_v13, %v4542_v61  ;;  %v1069_v59 = vadd.f32 %v1061_v37, %v4546_v29 }
  0xdc   :  { %v1070_v46 = vadd.f32 %v1062_v30, %v4549_v7  ;;  %v1071_v28 = vadd.f32 %v1063_v3, %v4554_v16  ;;  %v1074_v26 = vmul.f32 %v4591_v52, %v1073_v35  ;;  %v1075_v22 = vmul.f32 %v3264_v50, %v1073_v35  ;;  %v4704_v7 = vld [vmem:[%s7134_s0 + $0xb0] sm:$0xff]  ;;  %v4709_v16 = vld [vmem:[%s7134_s0 + $0xc0] sm:$0xff] }
  0xdd   :  { %v1076_v2 = vmul.f32 %v3265_v21, %v1073_v35  ;;  %v1077_v25 = vmul.f32 %v3266_v10, %v1073_v35  ;;  %v1078_v32 = vmul.f32 %v3267_v33, %v1073_v35  ;;  %v1079_v11 = vmul.f32 %v3268_v54, %v1073_v35  ;;  %v4714_v52 = vld [vmem:[%s7134_s0 + $0xd0] sm:$0xff]  ;;  %v4729_v54 = vld [vmem:[%s7134_s0 + $0xe0] sm:$0xff] }
  0xde   :  { %v1080_v61 = vmul.f32 %v3269_v57, %v1073_v35  ;;  %v1081_v29 = vmul.f32 %v3270_v44, %v1073_v35  ;;  %v4717_v50 = vadd.f32 %v1074_v26, %v4609_v36  ;;  %v4720_v21 = vadd.f32 %v1075_v22, %v4612_v41  ;;  %v4734_v57 = vld [vmem:[%s7134_s0 + $0xf0] sm:$0xff]  ;;  %v4739_v36 = vld [vmem:[%s7134_s0 + $0x100] sm:$0xff] }
  0xdf   :  { %v4722_v10 = vadd.f32 %v1076_v2, %v1021_v51  ;;  %v4724_v33 = vadd.f32 %v1077_v25, %v1022_v17  ;;  %v1086_v41 = vadd.f32 %v1078_v32, %v4627_v23  ;;  %v1087_v51 = vadd.f32 %v1079_v11, %v1024_v63 }
  0xe0   :  { %v1088_v17 = vadd.f32 %v1080_v61, %v1025_v56  ;;  %v1089_v44 = vadd.f32 %v1081_v29, %v1026_v40  ;;  %v1111_v19 = vmul.f32 %v4694_v24, %v1110_v4  ;;  %v1112_v38 = vmul.f32 %v4699_v31, %v1110_v4  ;;  %v4843_v61 = vld [vmem:[%s7134_s0 + $0xb8] sm:$0x1]  ;;  %v4848_v29 = vld [vmem:[%s7134_s0 + $0xc8] sm:$0x1] }
  0xe1   :  { %v1113_v42 = vmul.f32 %v4704_v7, %v1110_v4  ;;  %v1114_v45 = vmul.f32 %v4709_v16, %v1110_v4  ;;  %v1115_v23 = vmul.f32 %v4714_v52, %v1110_v4  ;;  %v1116_v63 = vmul.f32 %v4729_v54, %v1110_v4 }
  0xe2   :  { %v1117_v56 = vmul.f32 %v4734_v57, %v1110_v4  ;;  %v1118_v40 = vmul.f32 %v4739_v36, %v1110_v4  ;;  %v4759_v48 = vadd.f32 %v1111_v19, %v4652_v20  ;;  %v4762_v58 = vadd.f32 %v1112_v38, %v4655_v49 }
  0xe3   :  { %v4765_v1 = vadd.f32 %v1113_v42, %v4658_v12  ;;  %v4768_v43 = vadd.f32 %v1114_v45, %v4661_v18  ;;  %v4771_v39 = vadd.f32 %v1115_v23, %v4664_v55  ;;  %v4774_v35 = vadd.f32 %v1116_v63, %v4667_v8  ;;  %v4865_v23 = vld [vmem:[%s7134_s0 + $0xd8] sm:$0x1]  ;;  %v4870_v63 = vld [vmem:[%s7134_s0 + $0xe8] sm:$0x1] }
  0xe4   :  { %v4777_v4 = vadd.f32 %v1117_v56, %v4670_v5  ;;  %v4780_v20 = vadd.f32 %v1118_v40, %v4673_v15  ;;  %v1129_v49 = vmul.f32 %v4694_v24, %v4679_v27  ;;  %v1130_v12 = vmul.f32 %v4699_v31, %v4679_v27  ;;  %v4888_v40 = vld [vmem:[%s7134_s0 + $0x108] sm:$0x1] }
  0xe5   :  { %v1131_v18 = vmul.f32 %v4704_v7, %v4679_v27  ;;  %v1132_v55 = vmul.f32 %v4709_v16, %v4679_v27  ;;  %v1133_v8 = vmul.f32 %v4714_v52, %v4679_v27  ;;  %v1134_v5 = vmul.f32 %v4729_v54, %v4679_v27 }
  0xe6   :  { %v1135_v15 = vmul.f32 %v4734_v57, %v4679_v27  ;;  %v1136_v53 = vmul.f32 %v4739_v36, %v4679_v27  ;;  %v4798_v9 = vadd.f32 %v1129_v49, %v1064_v34  ;;  %v4800_v47 = vadd.f32 %v1130_v12, %v1065_v0 }
  0xe7   :  { %v4802_v60 = vadd.f32 %v1131_v18, %v1066_v6  ;;  %v4804_v13 = vadd.f32 %v1132_v55, %v1067_v14  ;;  %v4806_v37 = vadd.f32 %v1133_v8, %v1068_v62  ;;  %v4808_v30 = vadd.f32 %v1134_v5, %v1069_v59  ;;  %v4829_v62 = vld [vmem:[%s7134_s0 + $0x98] sm:$0x1]  ;;  %v4834_v59 = vld [vmem:[%s7134_s0 + $0xa8] sm:$0x1] }
  0xe8   :  { %v4810_v3 = vadd.f32 %v1135_v15, %v1070_v46  ;;  %v4812_v26 = vadd.f32 %v1136_v53, %v1071_v28  ;;  %v1146_v22 = vstv %s4742_s25  ;;  %v1164_v2 = vstv %s4744_s26  ;;  %s5226_s25 = sld [smem:[#allocation2 + $0x47]]  ;;  %s5228_s26 = sld [smem:[#allocation2 + $0xa]] }
  0xe9   :  { %v4817_v25 = vstv %s4750_s27  ;;  %v4820_v27 = vstv %s4752_s28  ;;  %v1147_v34 = vmul.f32 %v4694_v24, %v1146_v22  ;;  %v1148_v0 = vmul.f32 %v4699_v31, %v1146_v22  ;;  %s5231_s27 = sld [smem:[#allocation2 + $0x25]]  ;;  %s5659_s28 = sld [smem:[#allocation2 + $0x29]] }
  0xea   :  { %7207 = vst [vmem:[#allocation18_spill] sm:$0xff] %v4812_v26  ;;  %7208 = vst [vmem:[#allocation17_spill] sm:$0xff] %v4820_v27  ;;  %v1149_v6 = vmul.f32 %v4704_v7, %v1146_v22  ;;  %v1150_v14 = vmul.f32 %v4709_v16, %v1146_v22  ;;  %v1151_v46 = vmul.f32 %v4714_v52, %v1146_v22 }
  0xeb   :  { %v1152_v28 = vmul.f32 %v4729_v54, %v1146_v22  ;;  %v1153_v32 = vmul.f32 %v4734_v57, %v1146_v22  ;;  %v1154_v11 = vmul.f32 %v4739_v36, %v1146_v22  ;;  %v4851_v19 = vadd.f32 %v1147_v34, %v4717_v50 }
  0xec   :  { %v4854_v38 = vadd.f32 %v1148_v0, %v4720_v21  ;;  %v4857_v42 = vadd.f32 %v1149_v6, %v4722_v10  ;;  %v4860_v45 = vadd.f32 %v1150_v14, %v4724_v33  ;;  %v4872_v50 = vadd.f32 %v1151_v46, %v1086_v41  ;;  %v4883_v33 = vld [vmem:[%s7134_s0 + $0xf8] sm:$0x1] }
  0xed   :  { %7209 = vst [vmem:[#allocation8_spill] sm:$0xff] %v4851_v19  ;;  %v4874_v21 = vadd.f32 %v1152_v28, %v1087_v51  ;;  %v4876_v56 = vadd.f32 %v1153_v32, %v1088_v17  ;;  %v4878_v10 = vadd.f32 %v1154_v11, %v1089_v44  ;;  %v1165_v49 = vmul.f32 %v4694_v24, %v1164_v2 }
  0xee   :  { %7210 = vst [vmem:[#allocation9_spill] sm:$0xff] %v4854_v38  ;;  %7211 = vst [vmem:[#allocation10_spill] sm:$0xff] %v4857_v42  ;;  %v1166_v41 = vmul.f32 %v4829_v62, %v1164_v2  ;;  %v1167_v51 = vmul.f32 %v4699_v31, %v1164_v2  ;;  %v1168_v17 = vmul.f32 %v4834_v59, %v1164_v2 }
  0xef   :  { %7212 = vst [vmem:[#allocation11_spill] sm:$0xff] %v4860_v45  ;;  %7213 = vst [vmem:[#allocation12_spill] sm:$0xff] %v4872_v50  ;;  %v1169_v44 = vmul.f32 %v4704_v7, %v1164_v2  ;;  %v1170_v12 = vmul.f32 %v4843_v61, %v1164_v2  ;;  %v1171_v18 = vmul.f32 %v4709_v16, %v1164_v2  ;;  %v1197_v14 = vrot.slane %v1165_v49, 1 }
  0xf0   :  { %7214 = vst [vmem:[#allocation13_spill] sm:$0xff] %v4874_v21  ;;  %7215 = vst [vmem:[#allocation14_spill] sm:$0xff] %v4876_v56  ;;  %v1172_v55 = vmul.f32 %v4848_v29, %v1164_v2  ;;  %v1173_v8 = vmul.f32 %v4714_v52, %v1164_v2  ;;  %v1174_v5 = vmul.f32 %v4865_v23, %v1164_v2  ;;  %v1198_v46 = vrot.slane %v1166_v41, 1 }
  0xf1   :  { %7216 = vst [vmem:[#allocation16_spill] sm:$0xff] %v4878_v10  ;;  %v1175_v15 = vmul.f32 %v4729_v54, %v1164_v2  ;;  %v1176_v53 = vmul.f32 %v4870_v63, %v1164_v2  ;;  %v1177_v22 = vmul.f32 %v4734_v57, %v1164_v2  ;;  %v1178_v34 = vmul.f32 %v4883_v33, %v1164_v2 }
  0xf2   :  { %v1179_v0 = vmul.f32 %v4739_v36, %v1164_v2  ;;  %v1180_v6 = vmul.f32 %v4888_v40, %v1164_v2  ;;  %v1200_v28 = vrot.slane %v1167_v51, 1  ;;  %v1201_v32 = vrot.slane %v1168_v17, 1 }
  0xf3   :  { %v1203_v11 = vrot.slane %v1169_v44, 1  ;;  %v1204_v10 = vrot.slane %v1170_v12, 1  ;;  %v1206_v56 = vrot.slane %v1171_v18, 1  ;;  %v1207_v21 = vrot.slane %v1172_v55, 1 }
  0xf4   :  { %v1199_v50 = vsel %vm151_vm0, %v1197_v14, %v1198_v46  ;;  %v1202_v45 = vsel %vm151_vm0, %v1200_v28, %v1201_v32  ;;  %v1209_v42 = vrot.slane %v1173_v8, 1  ;;  %v1210_v38 = vrot.slane %v1174_v5, 1 }
  0xf5   :  { %v1205_v19 = vsel %vm151_vm0, %v1203_v11, %v1204_v10  ;;  %v1208_v26 = vsel %vm151_vm0, %v1206_v56, %v1207_v21  ;;  %v1212_v27 = vrot.slane %v1175_v15, 1  ;;  %v1213_v2 = vrot.slane %v1176_v53, 1 }
  0xf6   :  { %v1211_v49 = vsel %vm151_vm0, %v1209_v42, %v1210_v38  ;;  %v1215_v41 = vrot.slane %v1177_v22, 1  ;;  %v1216_v51 = vrot.slane %v1178_v34, 1  ;;  %v1218_v17 = vrot.slane %v1179_v0, 1 }
  0xf7   :  { %v1214_v44 = vsel %vm151_vm0, %v1212_v27, %v1213_v2  ;;  %v1219_v12 = vrot.slane %v1180_v6, 1  ;;  %v4913_v18 = vadd.f32 %v1199_v50, %v4759_v48  ;;  %v4916_v55 = vadd.f32 %v1202_v45, %v4762_v58 }
  0xf8   :  { %v1217_v10 = vsel %vm151_vm0, %v1215_v41, %v1216_v51  ;;  %v4920_v21 = vadd.f32 %v1205_v19, %v4765_v1  ;;  %v4923_v56 = vadd.f32 %v1208_v26, %v4768_v43  ;;  %v4926_v38 = vadd.f32 %v1211_v49, %v4771_v39 }
  0xf9   :  { %v1220_v27 = vsel %vm151_vm0, %v1218_v17, %v1219_v12  ;;  %v4930_v42 = vadd.f32 %v1214_v44, %v4774_v35  ;;  %v4933_v48 = vadd.f32 %v1217_v10, %v4777_v4  ;;  %v1239_v58 = vmul.f32 %v4694_v24, %v4817_v25 }
  0xfa   :  { %v4938_v1 = vadd.f32 %v1220_v27, %v4780_v20  ;;  %v1240_v43 = vmul.f32 %v4829_v62, %v4817_v25  ;;  %v1241_v39 = vmul.f32 %v4699_v31, %v4817_v25  ;;  %v1242_v26 = vmul.f32 %v4834_v59, %v4817_v25 }
  0xfb   :  { %v1243_v35 = vmul.f32 %v4704_v7, %v4817_v25  ;;  %v1244_v4 = vmul.f32 %v4843_v61, %v4817_v25  ;;  %v1245_v19 = vmul.f32 %v4709_v16, %v4817_v25  ;;  %v1246_v20 = vmul.f32 %v4848_v29, %v4817_v25 }
  0xfc   :  { %v1247_v45 = vmul.f32 %v4714_v52, %v4817_v25  ;;  %v1248_v50 = vmul.f32 %v4865_v23, %v4817_v25  ;;  %v1249_v8 = vmul.f32 %v4729_v54, %v4817_v25  ;;  %v1250_v5 = vmul.f32 %v4870_v63, %v4817_v25 }
  0xfd   :  { %v1251_v15 = vmul.f32 %v4734_v57, %v4817_v25  ;;  %v1252_v53 = vmul.f32 %v4883_v33, %v4817_v25  ;;  %v1253_v22 = vmul.f32 %v4739_v36, %v4817_v25  ;;  %v1254_v34 = vmul.f32 %v4888_v40, %v4817_v25 }
  0xfe   :  { %v1271_v0 = vrot.slane %v1239_v58, 1  ;;  %v1272_v6 = vrot.slane %v1240_v43, 1  ;;  %v1274_v14 = vrot.slane %v1241_v39, 1  ;;  %v1275_v46 = vrot.slane %v1242_v26, 1 }
  0xff   :  { %v1277_v28 = vrot.slane %v1243_v35, 1  ;;  %v1278_v32 = vrot.slane %v1244_v4, 1  ;;  %v1280_v11 = vrot.slane %v1245_v19, 1  ;;  %v1281_v2 = vrot.slane %v1246_v20, 1 }
 0x100   :  { %v1273_v49 = vsel %vm151_vm0, %v1271_v0, %v1272_v6  ;;  %v1276_v41 = vsel %vm151_vm0, %v1274_v14, %v1275_v46  ;;  %v1283_v51 = vrot.slane %v1247_v45, 1  ;;  %v1284_v17 = vrot.slane %v1248_v50, 1 }
 0x101   :  { %v1279_v44 = vsel %vm151_vm0, %v1277_v28, %v1278_v32  ;;  %v1282_v12 = vsel %vm151_vm0, %v1280_v11, %v1281_v2  ;;  %v1286_v10 = vrot.slane %v1249_v8, 1  ;;  %v1287_v25 = vrot.slane %v1250_v5, 1 }
 0x102   :  { %v1285_v27 = vsel %vm151_vm0, %v1283_v51, %v1284_v17  ;;  %v1289_v58 = vrot.slane %v1251_v15, 1  ;;  %v1290_v43 = vrot.slane %v1252_v53, 1  ;;  %v1292_v39 = vrot.slane %v1253_v22, 1  ;;  %v7218_v22 = vld [vmem:[#allocation18_spill] sm:$0xff] }
 0x103   :  { %v1288_v26 = vsel %vm151_vm0, %v1286_v10, %v1287_v25  ;;  %v1293_v35 = vrot.slane %v1254_v34, 1  ;;  %v4977_v4 = vadd.f32 %v1273_v49, %v4798_v9  ;;  %v4980_v19 = vadd.f32 %v1276_v41, %v4800_v47  ;;  %v7217_v47 = vld [vmem:[#allocation17_spill] sm:$0xff] }
 0x104   :  { %v1291_v20 = vsel %vm151_vm0, %v1289_v58, %v1290_v43  ;;  %v4984_v45 = vadd.f32 %v1279_v44, %v4802_v60  ;;  %v4987_v50 = vadd.f32 %v1282_v12, %v4804_v13  ;;  %v4990_v8 = vadd.f32 %v1285_v27, %v4806_v37 }
 0x105   :  { %v1294_v5 = vsel %vm151_vm0, %v1292_v39, %v1293_v35  ;;  %v4994_v15 = vadd.f32 %v1288_v26, %v4808_v30  ;;  %v4997_v9 = vadd.f32 %v1291_v20, %v4810_v3  ;;  %v1313_v53 = vmul.f32 %v4694_v24, %v7217_v47 }
 0x106   :  { %v5002_v60 = vadd.f32 %v1294_v5, %v7218_v22  ;;  %v1314_v13 = vmul.f32 %v4829_v62, %v7217_v47  ;;  %v1315_v37 = vmul.f32 %v4699_v31, %v7217_v47  ;;  %v1316_v34 = vmul.f32 %v4834_v59, %v7217_v47 }
 0x107   :  { %v1317_v30 = vmul.f32 %v4704_v7, %v7217_v47  ;;  %v1318_v3 = vmul.f32 %v4843_v61, %v7217_v47  ;;  %v1319_v24 = vmul.f32 %v4709_v16, %v7217_v47  ;;  %v1320_v0 = vmul.f32 %v4848_v29, %v7217_v47 }
 0x108   :  { %v1321_v62 = vmul.f32 %v4714_v52, %v7217_v47  ;;  %v1322_v6 = vmul.f32 %v4865_v23, %v7217_v47  ;;  %v1323_v14 = vmul.f32 %v4729_v54, %v7217_v47  ;;  %v1324_v46 = vmul.f32 %v4870_v63, %v7217_v47 }
 0x109   :  { %v1325_v28 = vmul.f32 %v4734_v57, %v7217_v47  ;;  %v1326_v32 = vmul.f32 %v4883_v33, %v7217_v47  ;;  %v1327_v11 = vmul.f32 %v4739_v36, %v7217_v47  ;;  %v1328_v2 = vmul.f32 %v4888_v40, %v7217_v47 }
 0x10a   :  { %v1345_v49 = vrot.slane %v1313_v53, 1  ;;  %v1346_v41 = vrot.slane %v1314_v13, 1  ;;  %v1348_v51 = vrot.slane %v1315_v37, 1  ;;  %v1349_v17 = vrot.slane %v1316_v34, 1 }
 0x10b   :  { %v1351_v44 = vrot.slane %v1317_v30, 1  ;;  %v1352_v12 = vrot.slane %v1318_v3, 1  ;;  %v1354_v10 = vrot.slane %v1319_v24, 1  ;;  %v1355_v25 = vrot.slane %v1320_v0, 1  ;;  %v7219_v30 = vld [vmem:[#allocation8_spill] sm:$0xff]  ;;  %v7220_v24 = vld [vmem:[#allocation9_spill] sm:$0xff] }
 0x10c   :  { %v1347_v27 = vsel %vm151_vm0, %v1345_v49, %v1346_v41  ;;  %v1350_v58 = vsel %vm151_vm0, %v1348_v51, %v1349_v17  ;;  %v1357_v43 = vrot.slane %v1321_v62, 1  ;;  %v1358_v39 = vrot.slane %v1322_v6, 1  ;;  %v7221_v6 = vld [vmem:[#allocation10_spill] sm:$0xff]  ;;  %v7223_v41 = vld [vmem:[#allocation12_spill] sm:$0xff] }
 0x10d   :  { %v1353_v26 = vsel %vm151_vm0, %v1351_v44, %v1352_v12  ;;  %v1356_v35 = vsel %vm151_vm0, %v1354_v10, %v1355_v25  ;;  %v1360_v20 = vrot.slane %v1323_v14, 1  ;;  %v1361_v5 = vrot.slane %v1324_v46, 1  ;;  %v7222_v46 = vld [vmem:[#allocation11_spill] sm:$0xff]  ;;  %v7225_v17 = vld [vmem:[#allocation14_spill] sm:$0xff]  ;;  %v7226_v10 = vld [vmem:[#allocation16_spill] sm:$0xff] }
 0x10e   :  { %v1359_v47 = vsel %vm151_vm0, %v1357_v43, %v1358_v39  ;;  %v1363_v53 = vrot.slane %v1325_v28, 1  ;;  %v1364_v22 = vrot.slane %v1326_v32, 1  ;;  %v1366_v13 = vrot.slane %v1327_v11, 1  ;;  %v5057_v32 = vld [vmem:[%s7134_s0 + $0x110] sm:$0xff] }
 0x10f   :  { %v1362_v37 = vsel %vm151_vm0, %v1360_v20, %v1361_v5  ;;  %v1367_v34 = vrot.slane %v1328_v2, 1  ;;  %v1377_v3 = vadd.f32 %v1347_v27, %v7219_v30  ;;  %v1378_v0 = vadd.f32 %v1350_v58, %v7220_v24  ;;  %v7224_v2 = vld [vmem:[#allocation13_spill] sm:$0xff] }
 0x110   :  { %v1365_v62 = vsel %vm151_vm0, %v1363_v53, %v1364_v22  ;;  %v1379_v14 = vadd.f32 %v1353_v26, %v7221_v6  ;;  %v1380_v49 = vadd.f32 %v1356_v35, %v7222_v46  ;;  %v1381_v28 = vadd.f32 %v1359_v47, %v7223_v41 }
 0x111   :  { %v1368_v11 = vsel %vm151_vm0, %v1366_v13, %v1367_v34  ;;  %v1382_v51 = vadd.f32 %v1362_v37, %v7224_v2  ;;  %v1383_v44 = vadd.f32 %v1365_v62, %v7225_v17  ;;  %v1386_v12 = vstv %s5034_s18  ;;  %s5348_s18 = sld [smem:[#allocation2 + $0x10]] }
 0x112   :  { %v1384_v25 = vadd.f32 %v1368_v11, %v7226_v10  ;;  %v1387_v27 = vmul.f32 %v4699_v31, %v1386_v12  ;;  %v1388_v58 = vmul.f32 %v4704_v7, %v1386_v12  ;;  %v1389_v43 = vmul.f32 %v4709_v16, %v1386_v12 }
 0x113   :  { %v1390_v39 = vmul.f32 %v4714_v52, %v1386_v12  ;;  %v1391_v26 = vmul.f32 %v4729_v54, %v1386_v12  ;;  %v1392_v35 = vmul.f32 %v4734_v57, %v1386_v12  ;;  %v1393_v20 = vmul.f32 %v4739_v36, %v1386_v12 }
 0x114   :  { %v1394_v5 = vmul.f32 %v5057_v32, %v1386_v12  ;;  %v5073_v47 = vadd.f32 %v1387_v27, %v4913_v18  ;;  %v5076_v53 = vadd.f32 %v1388_v58, %v4916_v55  ;;  %v5079_v22 = vadd.f32 %v1389_v43, %v4920_v21 }
 0x115   :  { %v5082_v13 = vadd.f32 %v1390_v39, %v4923_v56  ;;  %v5085_v37 = vadd.f32 %v1391_v26, %v4926_v38  ;;  %v5088_v34 = vadd.f32 %v1392_v35, %v4930_v42  ;;  %v5091_v30 = vadd.f32 %v1393_v20, %v4933_v48 }
 0x116   :  { %v5094_v18 = vadd.f32 %v1394_v5, %v4938_v1  ;;  %v1404_v55 = vstv %s5040_s19  ;;  %v1422_v24 = vstv %s5042_s20  ;;  %v1440_v62 = vstv %s5045_s1  ;;  %s5357_s19 = sld [smem:[#allocation2 + $0x2b]]  ;;  %s5359_s20 = sld [smem:[#allocation2 + $0x46]] }
 0x117   :  { %v1405_v21 = vmul.f32 %v4699_v31, %v1404_v55  ;;  %v1406_v56 = vmul.f32 %v4704_v7, %v1404_v55  ;;  %v1407_v6 = vmul.f32 %v4709_v16, %v1404_v55  ;;  %v1408_v38 = vmul.f32 %v4714_v52, %v1404_v55  ;;  %s5825_s1 = sld [smem:[#allocation2 + $0x43]] }
 0x118   :  { %v1409_v42 = vmul.f32 %v4729_v54, %v1404_v55  ;;  %v1410_v46 = vmul.f32 %v4734_v57, %v1404_v55  ;;  %v1411_v48 = vmul.f32 %v4739_v36, %v1404_v55  ;;  %v1412_v1 = vmul.f32 %v5057_v32, %v1404_v55 }
 0x119   :  { %v5108_v41 = vadd.f32 %v1405_v21, %v4977_v4  ;;  %v5111_v11 = vadd.f32 %v1406_v56, %v4980_v19  ;;  %v5114_v2 = vadd.f32 %v1407_v6, %v4984_v45  ;;  %v5117_v17 = vadd.f32 %v1408_v38, %v4987_v50 }
 0x11a   :  { %v5120_v12 = vadd.f32 %v1409_v42, %v4990_v8  ;;  %v5123_v10 = vadd.f32 %v1410_v46, %v4994_v15  ;;  %v5126_v27 = vadd.f32 %v1411_v48, %v4997_v9  ;;  %v5129_v4 = vadd.f32 %v1412_v1, %v5002_v60 }
 0x11b   :  { %v1423_v19 = vmul.f32 %v4699_v31, %v1422_v24  ;;  %v1424_v45 = vmul.f32 %v4704_v7, %v1422_v24  ;;  %v1425_v58 = vmul.f32 %v4709_v16, %v1422_v24  ;;  %v1426_v50 = vmul.f32 %v4714_v52, %v1422_v24 }
 0x11c   :  { %v1427_v8 = vmul.f32 %v4729_v54, %v1422_v24  ;;  %v1428_v43 = vmul.f32 %v4734_v57, %v1422_v24  ;;  %v1429_v15 = vmul.f32 %v4739_v36, %v1422_v24  ;;  %v1430_v9 = vmul.f32 %v5057_v32, %v1422_v24  ;;  %v5158_v24 = vld [vmem:[%s7134_s0 + $0x118] sm:$0x1] }
 0x11d   :  { %v5139_v39 = vadd.f32 %v1423_v19, %v1377_v3  ;;  %v5141_v60 = vadd.f32 %v1424_v45, %v1378_v0  ;;  %v5143_v26 = vadd.f32 %v1425_v58, %v1379_v14  ;;  %v5145_v35 = vadd.f32 %v1426_v50, %v1380_v49 }
 0x11e   :  { %v5147_v20 = vadd.f32 %v1427_v8, %v1381_v28  ;;  %v5149_v5 = vadd.f32 %v1428_v43, %v1382_v51  ;;  %v5151_v55 = vadd.f32 %v1429_v15, %v1383_v44  ;;  %v5153_v21 = vadd.f32 %v1430_v9, %v1384_v25 }
 0x11f   :  { %7227 = vst [vmem:[#allocation15_spill] sm:$0xff] %v5139_v39  ;;  %7228 = vst [vmem:[#allocation17_spill] sm:$0xff] %v5141_v60  ;;  %v1441_v3 = vmul.f32 %v4699_v31, %v1440_v62  ;;  %v1442_v0 = vmul.f32 %v4834_v59, %v1440_v62  ;;  %v1443_v14 = vmul.f32 %v4704_v7, %v1440_v62 }
 0x120   :  { %7229 = vst [vmem:[#allocation18_spill] sm:$0xff] %v5143_v26  ;;  %7230 = vst [vmem:[#allocation8_spill] sm:$0xff] %v5145_v35  ;;  %v1444_v49 = vmul.f32 %v4843_v61, %v1440_v62  ;;  %v1445_v28 = vmul.f32 %v4709_v16, %v1440_v62  ;;  %v1446_v51 = vmul.f32 %v4848_v29, %v1440_v62 }
 0x121   :  { %7231 = vst [vmem:[#allocation9_spill] sm:$0xff] %v5147_v20  ;;  %7232 = vst [vmem:[#allocation10_spill] sm:$0xff] %v5149_v5  ;;  %v1447_v44 = vmul.f32 %v4714_v52, %v1440_v62  ;;  %v1448_v25 = vmul.f32 %v4865_v23, %v1440_v62  ;;  %v1449_v56 = vmul.f32 %v4729_v54, %v1440_v62  ;;  %v1473_v45 = vrot.slane %v1441_v3, 1 }
 0x122   :  { %7233 = vst [vmem:[#allocation11_spill] sm:$0xff] %v5151_v55  ;;  %7234 = vst [vmem:[#allocation12_spill] sm:$0xff] %v5153_v21  ;;  %v1450_v6 = vmul.f32 %v4870_v63, %v1440_v62  ;;  %v1451_v38 = vmul.f32 %v4734_v57, %v1440_v62  ;;  %v1452_v42 = vmul.f32 %v4883_v33, %v1440_v62  ;;  %v1474_v58 = vrot.slane %v1442_v0, 1 }
 0x123   :  { %v1453_v46 = vmul.f32 %v4739_v36, %v1440_v62  ;;  %v1454_v48 = vmul.f32 %v4888_v40, %v1440_v62  ;;  %v1455_v1 = vmul.f32 %v5057_v32, %v1440_v62  ;;  %v1456_v19 = vmul.f32 %v5158_v24, %v1440_v62 }
 0x124   :  { %v1476_v50 = vrot.slane %v1443_v14, 1  ;;  %v1477_v8 = vrot.slane %v1444_v49, 1  ;;  %v1479_v43 = vrot.slane %v1445_v28, 1  ;;  %v1480_v15 = vrot.slane %v1446_v51, 1 }
 0x125   :  { %v1482_v9 = vrot.slane %v1447_v44, 1  ;;  %v1483_v21 = vrot.slane %v1448_v25, 1  ;;  %v1475_v55 = vsel %vm151_vm0, %v1473_v45, %v1474_v58  ;;  %v1485_v20 = vrot.slane %v1449_v56, 1 }
 0x126   :  { %v1478_v5 = vsel %vm151_vm0, %v1476_v50, %v1477_v8  ;;  %v1486_v35 = vrot.slane %v1450_v6, 1  ;;  %v1481_v26 = vsel %vm151_vm0, %v1479_v43, %v1480_v15  ;;  %v1488_v60 = vrot.slane %v1451_v38, 1 }
 0x127   :  { %v1484_v62 = vsel %vm151_vm0, %v1482_v9, %v1483_v21  ;;  %v1489_v39 = vrot.slane %v1452_v42, 1  ;;  %v1491_v0 = vrot.slane %v1453_v46, 1  ;;  %v1492_v14 = vrot.slane %v1454_v48, 1 }
 0x128   :  { %v1487_v3 = vsel %vm151_vm0, %v1485_v20, %v1486_v35  ;;  %v1494_v49 = vrot.slane %v1455_v1, 1  ;;  %v1495_v51 = vrot.slane %v1456_v19, 1  ;;  %v5185_v44 = vadd.f32 %v1475_v55, %v5073_v47 }
 0x129   :  { %v1490_v28 = vsel %vm151_vm0, %v1488_v60, %v1489_v39  ;;  %v5188_v25 = vadd.f32 %v1478_v5, %v5076_v53  ;;  %v1493_v56 = vsel %vm151_vm0, %v1491_v0, %v1492_v14  ;;  %v5192_v21 = vadd.f32 %v1481_v26, %v5079_v22 }
 0x12a   :  { %v5195_v6 = vadd.f32 %v1484_v62, %v5082_v13  ;;  %v5198_v35 = vadd.f32 %v1487_v3, %v5085_v37  ;;  %v1496_v39 = vsel %vm151_vm0, %v1494_v49, %v1495_v51  ;;  %v5202_v60 = vadd.f32 %v1490_v28, %v5088_v34 }
 0x12b   :  { %v5205_v47 = vadd.f32 %v1493_v56, %v5091_v30  ;;  %v1514_v53 = vstv %s5176_s24  ;;  %v5209_v20 = vadd.f32 %v1496_v39, %v5094_v18  ;;  %s5449_s24 = sld [smem:[#allocation2 + $0xe]] }
 0x12c   :  { %v1515_v22 = vmul.f32 %v4699_v31, %v1514_v53  ;;  %v1516_v13 = vmul.f32 %v4834_v59, %v1514_v53  ;;  %v1517_v26 = vmul.f32 %v4704_v7, %v1514_v53  ;;  %v1518_v37 = vmul.f32 %v4843_v61, %v1514_v53 }
 0x12d   :  { %v1519_v5 = vmul.f32 %v4709_v16, %v1514_v53  ;;  %v1520_v34 = vmul.f32 %v4848_v29, %v1514_v53  ;;  %v1521_v55 = vmul.f32 %v4714_v52, %v1514_v53  ;;  %v1522_v30 = vmul.f32 %v4865_v23, %v1514_v53 }
 0x12e   :  { %v1523_v38 = vmul.f32 %v4729_v54, %v1514_v53  ;;  %v1524_v18 = vmul.f32 %v4870_v63, %v1514_v53  ;;  %v1525_v42 = vmul.f32 %v4734_v57, %v1514_v53  ;;  %v1526_v46 = vmul.f32 %v4883_v33, %v1514_v53 }
 0x12f   :  { %v1527_v48 = vmul.f32 %v4739_v36, %v1514_v53  ;;  %v1528_v1 = vmul.f32 %v4888_v40, %v1514_v53  ;;  %v1529_v19 = vmul.f32 %v5057_v32, %v1514_v53  ;;  %v1530_v45 = vmul.f32 %v5158_v24, %v1514_v53 }
 0x130   :  { %v1547_v58 = vrot.slane %v1515_v22, 1  ;;  %v1548_v50 = vrot.slane %v1516_v13, 1  ;;  %v1550_v8 = vrot.slane %v1517_v26, 1  ;;  %v1551_v43 = vrot.slane %v1518_v37, 1 }
 0x131   :  { %v1553_v15 = vrot.slane %v1519_v5, 1  ;;  %v1554_v9 = vrot.slane %v1520_v34, 1  ;;  %v1556_v62 = vrot.slane %v1521_v55, 1  ;;  %v1557_v0 = vrot.slane %v1522_v30, 1 }
 0x132   :  { %v1549_v3 = vsel %vm151_vm0, %v1547_v58, %v1548_v50  ;;  %v1559_v14 = vrot.slane %v1523_v38, 1  ;;  %v1560_v49 = vrot.slane %v1524_v18, 1  ;;  %v1552_v28 = vsel %vm151_vm0, %v1550_v8, %v1551_v43 }
 0x133   :  { %v1555_v51 = vsel %vm151_vm0, %v1553_v15, %v1554_v9  ;;  %v1562_v56 = vrot.slane %v1525_v42, 1  ;;  %v1563_v39 = vrot.slane %v1526_v46, 1  ;;  %v1558_v53 = vsel %vm151_vm0, %v1556_v62, %v1557_v0 }
 0x134   :  { %v1561_v22 = vsel %vm151_vm0, %v1559_v14, %v1560_v49  ;;  %v1565_v13 = vrot.slane %v1527_v48, 1  ;;  %v1566_v26 = vrot.slane %v1528_v1, 1  ;;  %v1568_v5 = vrot.slane %v1529_v19, 1 }
 0x135   :  { %v1564_v37 = vsel %vm151_vm0, %v1562_v56, %v1563_v39  ;;  %v1569_v34 = vrot.slane %v1530_v45, 1  ;;  %v5240_v55 = vadd.f32 %v1549_v3, %v5108_v41  ;;  %v5244_v38 = vadd.f32 %v1552_v28, %v5111_v11 }
 0x136   :  { %v1567_v30 = vsel %vm151_vm0, %v1565_v13, %v1566_v26  ;;  %v5247_v18 = vadd.f32 %v1555_v51, %v5114_v2  ;;  %v5250_v42 = vadd.f32 %v1558_v53, %v5117_v17  ;;  %v5254_v48 = vadd.f32 %v1561_v22, %v5120_v12  ;;  %v3304_v53 = vld [vmem:[%s7134_s0 + $0x240] sm:$0xff]  ;;  %v5299_v22 = vld [vmem:[%s7134_s0 + $0x250] sm:$0xff] }
 0x137   :  { %v1570_v46 = vsel %vm151_vm0, %v1568_v5, %v1569_v34  ;;  %v5257_v1 = vadd.f32 %v1564_v37, %v5123_v10  ;;  %v5260_v41 = vadd.f32 %v1567_v30, %v5126_v27  ;;  %v1588_v19 = vstv %s5226_s25  ;;  %v7235_v37 = vld [vmem:[#allocation15_spill] sm:$0xff]  ;;  %v7236_v34 = vld [vmem:[#allocation17_spill] sm:$0xff] }
 0x138   :  { %v5263_v11 = vadd.f32 %v1570_v46, %v5129_v4  ;;  %v5267_v2 = vstv %s5228_s26  ;;  %v5270_v45 = vstv %s5231_s27  ;;  %v1589_v17 = vmul.f32 %v4699_v31, %v1588_v19  ;;  %v5311_v46 = vld [vmem:[%s7134_s0 + $0x260] sm:$0xff] }
 0x139   :  { %v1590_v58 = vmul.f32 %v4834_v59, %v1588_v19  ;;  %v1591_v12 = vmul.f32 %v4704_v7, %v1588_v19  ;;  %v1592_v10 = vmul.f32 %v4843_v61, %v1588_v19  ;;  %v1593_v50 = vmul.f32 %v4709_v16, %v1588_v19 }
 0x13a   :  { %v1594_v27 = vmul.f32 %v4848_v29, %v1588_v19  ;;  %v1595_v4 = vmul.f32 %v4714_v52, %v1588_v19  ;;  %v1596_v8 = vmul.f32 %v4865_v23, %v1588_v19  ;;  %v1597_v43 = vmul.f32 %v4729_v54, %v1588_v19 }
 0x13b   :  { %v1598_v15 = vmul.f32 %v4870_v63, %v1588_v19  ;;  %v1599_v31 = vmul.f32 %v4734_v57, %v1588_v19  ;;  %v1600_v59 = vmul.f32 %v4883_v33, %v1588_v19  ;;  %v1601_v7 = vmul.f32 %v4739_v36, %v1588_v19 }
 0x13c   :  { %v1602_v61 = vmul.f32 %v4888_v40, %v1588_v19  ;;  %v1603_v16 = vmul.f32 %v5057_v32, %v1588_v19  ;;  %v1604_v29 = vmul.f32 %v5158_v24, %v1588_v19  ;;  %v1621_v9 = vrot.slane %v1589_v17, 1  ;;  %v5316_v19 = vld [vmem:[%s7134_s0 + $0x270] sm:$0xff]  ;;  %v5321_v17 = vld [vmem:[%s7134_s0 + $0x280] sm:$0xff] }
 0x13d   :  { %v1622_v52 = vrot.slane %v1590_v58, 1  ;;  %v1624_v62 = vrot.slane %v1591_v12, 1  ;;  %v1625_v23 = vrot.slane %v1592_v10, 1  ;;  %v1627_v3 = vrot.slane %v1593_v50, 1  ;;  %v7237_v12 = vld [vmem:[#allocation18_spill] sm:$0xff]  ;;  %v7238_v50 = vld [vmem:[#allocation8_spill] sm:$0xff] }
 0x13e   :  { %v1628_v54 = vrot.slane %v1594_v27, 1  ;;  %v1630_v0 = vrot.slane %v1595_v4, 1  ;;  %v1631_v63 = vrot.slane %v1596_v8, 1  ;;  %v1633_v14 = vrot.slane %v1597_v43, 1  ;;  %v7239_v4 = vld [vmem:[#allocation9_spill] sm:$0xff]  ;;  %v5330_v43 = vld [vmem:[%s7134_s0 + $0x290] sm:$0xff] }
 0x13f   :  { %v1623_v57 = vsel %vm151_vm0, %v1621_v9, %v1622_v52  ;;  %v1626_v33 = vsel %vm151_vm0, %v1624_v62, %v1625_v23  ;;  %v1634_v36 = vrot.slane %v1598_v15, 1  ;;  %v1636_v49 = vrot.slane %v1599_v31, 1  ;;  %v5335_v15 = vld [vmem:[%s7134_s0 + $0x2a0] sm:$0xff]  ;;  %v5340_v31 = vld [vmem:[%s7134_s0 + $0x2b0] sm:$0xff] }
 0x140   :  { %v1629_v40 = vsel %vm151_vm0, %v1627_v3, %v1628_v54  ;;  %v1632_v32 = vsel %vm151_vm0, %v1630_v0, %v1631_v63  ;;  %v1637_v24 = vrot.slane %v1600_v59, 1  ;;  %v1639_v51 = vrot.slane %v1601_v7, 1  ;;  %v7240_v7 = vld [vmem:[#allocation10_spill] sm:$0xff]  ;;  %v7242_v52 = vld [vmem:[#allocation12_spill] sm:$0xff] }
 0x141   :  { %v1635_v28 = vsel %vm151_vm0, %v1633_v14, %v1634_v36  ;;  %v1640_v56 = vrot.slane %v1602_v61, 1  ;;  %v1642_v39 = vrot.slane %v1603_v16, 1  ;;  %v1643_v26 = vrot.slane %v1604_v29, 1  ;;  %v7241_v16 = vld [vmem:[#allocation11_spill] sm:$0xff] }
 0x142   :  { %v1638_v13 = vsel %vm151_vm0, %v1636_v49, %v1637_v24  ;;  %v5303_v5 = vadd.f32 %v1623_v57, %v7235_v37  ;;  %v5306_v30 = vadd.f32 %v1626_v33, %v7236_v34  ;;  %v1655_v10 = vadd.f32 %v1629_v40, %v7237_v12 }
 0x143   :  { %v1641_v58 = vsel %vm151_vm0, %v1639_v51, %v1640_v56  ;;  %v1656_v27 = vadd.f32 %v1632_v32, %v7238_v50  ;;  %v1657_v8 = vadd.f32 %v1635_v28, %v7239_v4  ;;  %v1644_v59 = vsel %vm151_vm0, %v1642_v39, %v1643_v26 }
 0x144   :  { %v1658_v61 = vadd.f32 %v1638_v13, %v7240_v7  ;;  %v1659_v29 = vadd.f32 %v1641_v58, %v7241_v16  ;;  %v1673_v9 = vmul.f32 %v3304_v53, %v5267_v2  ;;  %v1660_v62 = vadd.f32 %v1644_v59, %v7242_v52 }
 0x145   :  { %v1674_v23 = vmul.f32 %v5299_v22, %v5267_v2  ;;  %v1675_v3 = vmul.f32 %v5311_v46, %v5267_v2  ;;  %v1676_v54 = vmul.f32 %v5316_v19, %v5267_v2  ;;  %v1677_v0 = vmul.f32 %v5321_v17, %v5267_v2 }
 0x146   :  { %v1678_v63 = vmul.f32 %v5330_v43, %v5267_v2  ;;  %v1679_v57 = vmul.f32 %v5335_v15, %v5267_v2  ;;  %v1680_v33 = vmul.f32 %v5340_v31, %v5267_v2  ;;  %v1681_v14 = vadd.f32 %v1673_v9, %v5185_v44 }
 0x147   :  { %v1682_v36 = vadd.f32 %v1674_v23, %v5188_v25  ;;  %v1683_v40 = vadd.f32 %v1675_v3, %v5192_v21  ;;  %v1684_v32 = vadd.f32 %v1676_v54, %v5195_v6  ;;  %v1685_v49 = vadd.f32 %v1677_v0, %v5198_v35 }
 0x148   :  { %v1686_v24 = vadd.f32 %v1678_v63, %v5202_v60  ;;  %v1687_v28 = vadd.f32 %v1679_v57, %v5205_v47  ;;  %v1688_v51 = vadd.f32 %v1680_v33, %v5209_v20  ;;  %v1691_v56 = vmul.f32 %v3304_v53, %v5270_v45 }
 0x149   :  { %v1692_v44 = vmul.f32 %v5299_v22, %v5270_v45  ;;  %v1693_v25 = vmul.f32 %v5311_v46, %v5270_v45  ;;  %v1694_v21 = vmul.f32 %v5316_v19, %v5270_v45  ;;  %v1695_v6 = vmul.f32 %v5321_v17, %v5270_v45 }
 0x14a   :  { %v1696_v35 = vmul.f32 %v5330_v43, %v5270_v45  ;;  %v1697_v60 = vmul.f32 %v5335_v15, %v5270_v45  ;;  %v1698_v47 = vmul.f32 %v5340_v31, %v5270_v45  ;;  %v1699_v20 = vadd.f32 %v1691_v56, %v5240_v55 }
 0x14b   :  { %v1700_v2 = vadd.f32 %v1692_v44, %v5244_v38  ;;  %v1701_v39 = vadd.f32 %v1693_v25, %v5247_v18  ;;  %v1702_v13 = vadd.f32 %v1694_v21, %v5250_v42  ;;  %v1703_v26 = vadd.f32 %v1695_v6, %v5254_v48 }
 0x14c   :  { %v1704_v37 = vadd.f32 %v1696_v35, %v5257_v1  ;;  %v1705_v34 = vadd.f32 %v1697_v60, %v5260_v41  ;;  %v1706_v58 = vadd.f32 %v1698_v47, %v5263_v11  ;;  %v1708_v12 = vstv %s5346_s17  ;;  %v3312_v11 = vld [vmem:[%s7134_s0 + $0x2c0] sm:$0xff]  ;;  %s6974_s17 = sld [smem:[#allocation2 + $0x31]] }
 0x14d   :  { %v1726_v50 = vstv %s5348_s18  ;;  %v1744_v4 = vstv %s5357_s19  ;;  %v1762_v45 = vstv %s5359_s20  ;;  %v1709_v59 = vmul.f32 %v3304_v53, %v1708_v12  ;;  %s6977_s18 = sld [smem:[#allocation2 + $0x4c]] }
 0x14e   :  { %v1710_v55 = vmul.f32 %v5299_v22, %v1708_v12  ;;  %v1711_v38 = vmul.f32 %v5311_v46, %v1708_v12  ;;  %v1712_v18 = vmul.f32 %v5316_v19, %v1708_v12  ;;  %v1713_v42 = vmul.f32 %v5321_v17, %v1708_v12 }
 0x14f   :  { %v1714_v48 = vmul.f32 %v5330_v43, %v1708_v12  ;;  %v1715_v1 = vmul.f32 %v5335_v15, %v1708_v12  ;;  %v1716_v41 = vmul.f32 %v5340_v31, %v1708_v12  ;;  %v1717_v53 = vadd.f32 %v1709_v59, %v5303_v5 }
 0x150   :  { %v1718_v7 = vadd.f32 %v1710_v55, %v5306_v30  ;;  %v1719_v16 = vadd.f32 %v1711_v38, %v1655_v10  ;;  %v1720_v9 = vadd.f32 %v1712_v18, %v1656_v27  ;;  %v1721_v52 = vadd.f32 %v1713_v42, %v1657_v8 }
 0x151   :  { %v1722_v23 = vadd.f32 %v1714_v48, %v1658_v61  ;;  %v1723_v3 = vadd.f32 %v1715_v1, %v1659_v29  ;;  %v1724_v54 = vadd.f32 %v1716_v41, %v1660_v62  ;;  %v1727_v0 = vmul.f32 %v5299_v22, %v1726_v50  ;;  %v5494_v41 = vld [vmem:[%s7134_s0 + $0x450] sm:$0xff] }
 0x152   :  { %v1728_v63 = vmul.f32 %v5311_v46, %v1726_v50  ;;  %v1729_v57 = vmul.f32 %v5316_v19, %v1726_v50  ;;  %v1730_v33 = vmul.f32 %v5321_v17, %v1726_v50  ;;  %v1731_v56 = vmul.f32 %v5330_v43, %v1726_v50 }
 0x153   :  { %v1732_v5 = vmul.f32 %v5335_v15, %v1726_v50  ;;  %v1733_v30 = vmul.f32 %v5340_v31, %v1726_v50  ;;  %v1734_v10 = vmul.f32 %v3312_v11, %v1726_v50  ;;  %v5423_v27 = vadd.f32 %v1727_v0, %v1681_v14 }
 0x154   :  { %v5425_v8 = vadd.f32 %v1728_v63, %v1682_v36  ;;  %v5427_v61 = vadd.f32 %v1729_v57, %v1683_v40  ;;  %v5429_v29 = vadd.f32 %v1730_v33, %v1684_v32  ;;  %v5431_v62 = vadd.f32 %v1731_v56, %v1685_v49 }
 0x155   :  { %v5433_v44 = vadd.f32 %v1732_v5, %v1686_v24  ;;  %v5435_v25 = vadd.f32 %v1733_v30, %v1687_v28  ;;  %v5437_v21 = vadd.f32 %v1734_v10, %v1688_v51  ;;  %v1745_v14 = vmul.f32 %v5299_v22, %v1744_v4 }
 0x156   :  { %v1746_v36 = vmul.f32 %v5311_v46, %v1744_v4  ;;  %v1747_v40 = vmul.f32 %v5316_v19, %v1744_v4  ;;  %v1748_v32 = vmul.f32 %v5321_v17, %v1744_v4  ;;  %v1749_v49 = vmul.f32 %v5330_v43, %v1744_v4 }
 0x157   :  { %v1750_v24 = vmul.f32 %v5335_v15, %v1744_v4  ;;  %v1751_v28 = vmul.f32 %v5340_v31, %v1744_v4  ;;  %v1752_v51 = vmul.f32 %v3312_v11, %v1744_v4  ;;  %v1753_v6 = vadd.f32 %v1745_v14, %v1699_v20 }
 0x158   :  { %v1754_v35 = vadd.f32 %v1746_v36, %v1700_v2  ;;  %v1755_v60 = vadd.f32 %v1747_v40, %v1701_v39  ;;  %v1756_v47 = vadd.f32 %v1748_v32, %v1702_v13  ;;  %v1757_v12 = vadd.f32 %v1749_v49, %v1703_v26  ;;  %v5464_v39 = vld [vmem:[%s7134_s0 + $0x3f0] sm:$0xff] }
 0x159   :  { %v1758_v50 = vadd.f32 %v1750_v24, %v1704_v37  ;;  %v1759_v59 = vadd.f32 %v1751_v28, %v1705_v34  ;;  %v1760_v55 = vadd.f32 %v1752_v51, %v1706_v58  ;;  %v1763_v38 = vmul.f32 %v5299_v22, %v1762_v45  ;;  %v5469_v22 = vld [vmem:[%s7134_s0 + $0x400] sm:$0xff]  ;;  %v5484_v13 = vld [vmem:[%s7134_s0 + $0x430] sm:$0xff] }
 0x15a   :  { %v1764_v18 = vmul.f32 %v5311_v46, %v1762_v45  ;;  %v1765_v42 = vmul.f32 %v5316_v19, %v1762_v45  ;;  %v1766_v48 = vmul.f32 %v5321_v17, %v1762_v45  ;;  %v1767_v1 = vmul.f32 %v5330_v43, %v1762_v45 }
 0x15b   :  { %v1768_v4 = vmul.f32 %v5335_v15, %v1762_v45  ;;  %v1769_v20 = vmul.f32 %v5340_v31, %v1762_v45  ;;  %v1770_v2 = vmul.f32 %v3312_v11, %v1762_v45  ;;  %v1771_v46 = vadd.f32 %v1763_v38, %v1717_v53  ;;  %v5474_v15 = vld [vmem:[%s7134_s0 + $0x410] sm:$0xff]  ;;  %v5479_v31 = vld [vmem:[%s7134_s0 + $0x420] sm:$0xff] }
 0x15c   :  { %v1772_v19 = vadd.f32 %v1764_v18, %v1718_v7  ;;  %v1773_v17 = vadd.f32 %v1765_v42, %v1719_v16  ;;  %v1774_v43 = vadd.f32 %v1766_v48, %v1720_v9  ;;  %v1775_v26 = vadd.f32 %v1767_v1, %v1721_v52  ;;  %v5489_v45 = vld [vmem:[%s7134_s0 + $0x440] sm:$0xff] }
 0x15d   :  { %v1776_v37 = vadd.f32 %v1768_v4, %v1722_v23  ;;  %v1777_v34 = vadd.f32 %v1769_v20, %v1723_v3  ;;  %v1778_v58 = vadd.f32 %v1770_v2, %v1724_v54  ;;  %v5499_v11 = vld [vmem:[%s7134_s0 + $0x460] sm:$0xff]  ;;  %v1797_v53 = vstv %s5439_s21  ;;  %v5584_v20 = vld [vmem:[%s7134_s0 + $0x418] sm:$0x1]  ;;  %v5589_v2 = vld [vmem:[%s7134_s0 + $0x428] sm:$0x1]  ;;  %s5833_s21 = sld [smem:[#allocation2 + $0x2d]] }
 0x15e   :  { %v1815_v7 = vstv %s5441_s22  ;;  %v1833_v16 = vstv %s5447_s23  ;;  %v5505_v9 = vstv %s5449_s24  ;;  %v1798_v52 = vmul.f32 %v5464_v39, %v1797_v53  ;;  %s5835_s22 = sld [smem:[#allocation2 + $0x48]] }
 0x15f   :  { %v1799_v23 = vmul.f32 %v5469_v22, %v1797_v53  ;;  %v1800_v3 = vmul.f32 %v5474_v15, %v1797_v53  ;;  %v1801_v54 = vmul.f32 %v5479_v31, %v1797_v53  ;;  %v1802_v0 = vmul.f32 %v5484_v13, %v1797_v53 }
 0x160   :  { %v1803_v63 = vmul.f32 %v5489_v45, %v1797_v53  ;;  %v1804_v57 = vmul.f32 %v5494_v41, %v1797_v53  ;;  %v1805_v33 = vmul.f32 %v5499_v11, %v1797_v53  ;;  %v5516_v56 = vadd.f32 %v1798_v52, %v5423_v27 }
 0x161   :  { %v5519_v5 = vadd.f32 %v1799_v23, %v5425_v8  ;;  %v5522_v30 = vadd.f32 %v1800_v3, %v5427_v61  ;;  %v5525_v10 = vadd.f32 %v1801_v54, %v5429_v29  ;;  %v5528_v14 = vadd.f32 %v1802_v0, %v5431_v62  ;;  %v5607_v3 = vld [vmem:[%s7134_s0 + $0x448] sm:$0x1] }
 0x162   :  { %v5531_v36 = vadd.f32 %v1803_v63, %v5433_v44  ;;  %v5534_v40 = vadd.f32 %v1804_v57, %v5435_v25  ;;  %v5537_v27 = vadd.f32 %v1805_v33, %v5437_v21  ;;  %v1816_v8 = vmul.f32 %v5464_v39, %v1815_v7  ;;  %v5625_v0 = vld [vmem:[%s7134_s0 + $0x468] sm:$0x1] }
 0x163   :  { %v1817_v61 = vmul.f32 %v5469_v22, %v1815_v7  ;;  %v1818_v32 = vmul.f32 %v5474_v15, %v1815_v7  ;;  %v1819_v29 = vmul.f32 %v5479_v31, %v1815_v7  ;;  %v1820_v62 = vmul.f32 %v5484_v13, %v1815_v7 }
 0x164   :  { %v1821_v49 = vmul.f32 %v5489_v45, %v1815_v7  ;;  %v1822_v44 = vmul.f32 %v5494_v41, %v1815_v7  ;;  %v1823_v25 = vmul.f32 %v5499_v11, %v1815_v7  ;;  %v5547_v24 = vadd.f32 %v1816_v8, %v1753_v6 }
 0x165   :  { %v5549_v21 = vadd.f32 %v1817_v61, %v1754_v35  ;;  %v5551_v28 = vadd.f32 %v1818_v32, %v1755_v60  ;;  %v5553_v51 = vadd.f32 %v1819_v29, %v1756_v47  ;;  %v5555_v38 = vadd.f32 %v1820_v62, %v1757_v12  ;;  %v5570_v60 = vld [vmem:[%s7134_s0 + $0x3f8] sm:$0x1]  ;;  %v5575_v47 = vld [vmem:[%s7134_s0 + $0x408] sm:$0x1] }
 0x166   :  { %v5557_v18 = vadd.f32 %v1821_v49, %v1758_v50  ;;  %v5559_v42 = vadd.f32 %v1822_v44, %v1759_v59  ;;  %v5561_v48 = vadd.f32 %v1823_v25, %v1760_v55  ;;  %v1834_v1 = vmul.f32 %v5464_v39, %v1833_v16 }
 0x167   :  { %v1835_v4 = vmul.f32 %v5469_v22, %v1833_v16  ;;  %v1836_v6 = vmul.f32 %v5474_v15, %v1833_v16  ;;  %v1837_v35 = vmul.f32 %v5479_v31, %v1833_v16  ;;  %v1838_v12 = vmul.f32 %v5484_v13, %v1833_v16 }
 0x168   :  { %v1839_v50 = vmul.f32 %v5489_v45, %v1833_v16  ;;  %v1840_v59 = vmul.f32 %v5494_v41, %v1833_v16  ;;  %v1841_v55 = vmul.f32 %v5499_v11, %v1833_v16  ;;  %v5591_v53 = vadd.f32 %v1834_v1, %v1771_v46  ;;  %v5602_v16 = vld [vmem:[%s7134_s0 + $0x438] sm:$0x1] }
 0x169   :  { %v5593_v7 = vadd.f32 %v1835_v4, %v1772_v19  ;;  %v5595_v52 = vadd.f32 %v1836_v6, %v1773_v17  ;;  %v5597_v23 = vadd.f32 %v1837_v35, %v1774_v43  ;;  %v5609_v54 = vadd.f32 %v1838_v12, %v1775_v26  ;;  %v5620_v43 = vld [vmem:[%s7134_s0 + $0x458] sm:$0x1] }
 0x16a   :  { %7243 = vst [vmem:[#allocation13_spill] sm:$0xff] %v5591_v53  ;;  %v5611_v46 = vadd.f32 %v1839_v50, %v1776_v37  ;;  %v5613_v19 = vadd.f32 %v1840_v59, %v1777_v34  ;;  %v5615_v17 = vadd.f32 %v1841_v55, %v1778_v58  ;;  %v1852_v26 = vmul.f32 %v5464_v39, %v5505_v9 }
 0x16b   :  { %7244 = vst [vmem:[#allocation14_spill] sm:$0xff] %v5593_v7  ;;  %7245 = vst [vmem:[#allocation16_spill] sm:$0xff] %v5595_v52  ;;  %v1853_v37 = vmul.f32 %v5570_v60, %v5505_v9  ;;  %v1854_v34 = vmul.f32 %v5469_v22, %v5505_v9  ;;  %v1855_v58 = vmul.f32 %v5575_v47, %v5505_v9 }
 0x16c   :  { %7246 = vst [vmem:[#allocation15_spill] sm:$0xff] %v5597_v23  ;;  %7247 = vst [vmem:[#allocation17_spill] sm:$0xff] %v5609_v54  ;;  %v1856_v63 = vmul.f32 %v5474_v15, %v5505_v9  ;;  %v1857_v57 = vmul.f32 %v5584_v20, %v5505_v9  ;;  %v1858_v33 = vmul.f32 %v5479_v31, %v5505_v9  ;;  %v1884_v4 = vrot.slane %v1852_v26, 1 }
 0x16d   :  { %7248 = vst [vmem:[#allocation18_spill] sm:$0xff] %v5611_v46  ;;  %7249 = vst [vmem:[#allocation8_spill] sm:$0xff] %v5613_v19  ;;  %v1859_v8 = vmul.f32 %v5589_v2, %v5505_v9  ;;  %v1860_v61 = vmul.f32 %v5484_v13, %v5505_v9  ;;  %v1861_v32 = vmul.f32 %v5602_v16, %v5505_v9  ;;  %v1885_v6 = vrot.slane %v1853_v37, 1 }
 0x16e   :  { %7250 = vst [vmem:[#allocation9_spill] sm:$0xff] %v5615_v17  ;;  %v1862_v29 = vmul.f32 %v5489_v45, %v5505_v9  ;;  %v1863_v62 = vmul.f32 %v5607_v3, %v5505_v9  ;;  %v1864_v49 = vmul.f32 %v5494_v41, %v5505_v9  ;;  %v1865_v44 = vmul.f32 %v5620_v43, %v5505_v9 }
 0x16f   :  { %v1866_v25 = vmul.f32 %v5499_v11, %v5505_v9  ;;  %v1867_v1 = vmul.f32 %v5625_v0, %v5505_v9  ;;  %v1887_v35 = vrot.slane %v1854_v34, 1  ;;  %v1888_v12 = vrot.slane %v1855_v58, 1 }
 0x170   :  { %v1890_v50 = vrot.slane %v1856_v63, 1  ;;  %v1891_v59 = vrot.slane %v1857_v57, 1  ;;  %v1893_v55 = vrot.slane %v1858_v33, 1  ;;  %v1894_v17 = vrot.slane %v1859_v8, 1 }
 0x171   :  { %v1886_v19 = vsel %vm151_vm0, %v1884_v4, %v1885_v6  ;;  %v1889_v46 = vsel %vm151_vm0, %v1887_v35, %v1888_v12  ;;  %v1896_v54 = vrot.slane %v1860_v61, 1  ;;  %v1897_v23 = vrot.slane %v1861_v32, 1 }
 0x172   :  { %v1892_v52 = vsel %vm151_vm0, %v1890_v50, %v1891_v59  ;;  %v1895_v9 = vsel %vm151_vm0, %v1893_v55, %v1894_v17  ;;  %v1899_v7 = vrot.slane %v1862_v29, 1  ;;  %v1900_v53 = vrot.slane %v1863_v62, 1 }
 0x173   :  { %v1898_v26 = vsel %vm151_vm0, %v1896_v54, %v1897_v23  ;;  %v1902_v37 = vrot.slane %v1864_v49, 1  ;;  %v1903_v34 = vrot.slane %v1865_v44, 1  ;;  %v1905_v58 = vrot.slane %v1866_v25, 1 }
 0x174   :  { %v1901_v63 = vsel %vm151_vm0, %v1899_v7, %v1900_v53  ;;  %v1906_v57 = vrot.slane %v1867_v1, 1  ;;  %v5668_v33 = vadd.f32 %v1886_v19, %v5516_v56  ;;  %v5671_v8 = vadd.f32 %v1889_v46, %v5519_v5 }
 0x175   :  { %v1904_v61 = vsel %vm151_vm0, %v1902_v37, %v1903_v34  ;;  %v5675_v17 = vadd.f32 %v1892_v52, %v5522_v30  ;;  %v5678_v32 = vadd.f32 %v1895_v9, %v5525_v10  ;;  %v5681_v23 = vadd.f32 %v1898_v26, %v5528_v14 }
 0x176   :  { %v1907_v53 = vsel %vm151_vm0, %v1905_v58, %v1906_v57  ;;  %v5685_v7 = vadd.f32 %v1901_v63, %v5531_v36  ;;  %v5688_v56 = vadd.f32 %v1904_v61, %v5534_v40  ;;  %v1925_v5 = vstv %s5659_s28 }
 0x177   :  { %v5692_v54 = vadd.f32 %v1907_v53, %v5537_v27  ;;  %v1926_v30 = vmul.f32 %v5464_v39, %v1925_v5  ;;  %v1927_v10 = vmul.f32 %v5570_v60, %v1925_v5  ;;  %v1928_v52 = vmul.f32 %v5469_v22, %v1925_v5 }
 0x178   :  { %v1929_v14 = vmul.f32 %v5575_v47, %v1925_v5  ;;  %v1930_v46 = vmul.f32 %v5474_v15, %v1925_v5  ;;  %v1931_v36 = vmul.f32 %v5584_v20, %v1925_v5  ;;  %v1932_v19 = vmul.f32 %v5479_v31, %v1925_v5 }
 0x179   :  { %v1933_v40 = vmul.f32 %v5589_v2, %v1925_v5  ;;  %v1934_v29 = vmul.f32 %v5484_v13, %v1925_v5  ;;  %v1935_v27 = vmul.f32 %v5602_v16, %v1925_v5  ;;  %v1936_v62 = vmul.f32 %v5489_v45, %v1925_v5 }
 0x17a   :  { %v1937_v49 = vmul.f32 %v5607_v3, %v1925_v5  ;;  %v1938_v44 = vmul.f32 %v5494_v41, %v1925_v5  ;;  %v1939_v25 = vmul.f32 %v5620_v43, %v1925_v5  ;;  %v1940_v1 = vmul.f32 %v5499_v11, %v1925_v5 }
 0x17b   :  { %v1941_v4 = vmul.f32 %v5625_v0, %v1925_v5  ;;  %v1958_v6 = vrot.slane %v1926_v30, 1  ;;  %v1959_v35 = vrot.slane %v1927_v10, 1  ;;  %v1961_v12 = vrot.slane %v1928_v52, 1 }
 0x17c   :  { %v1962_v50 = vrot.slane %v1929_v14, 1  ;;  %v1964_v59 = vrot.slane %v1930_v46, 1  ;;  %v1965_v55 = vrot.slane %v1931_v36, 1  ;;  %v1967_v9 = vrot.slane %v1932_v19, 1 }
 0x17d   :  { %v1960_v26 = vsel %vm151_vm0, %v1958_v6, %v1959_v35  ;;  %v1968_v37 = vrot.slane %v1933_v40, 1  ;;  %v1970_v34 = vrot.slane %v1934_v29, 1  ;;  %v1971_v58 = vrot.slane %v1935_v27, 1 }
 0x17e   :  { %v1963_v63 = vsel %vm151_vm0, %v1961_v12, %v1962_v50  ;;  %v1966_v57 = vsel %vm151_vm0, %v1964_v59, %v1965_v55  ;;  %v1973_v61 = vrot.slane %v1936_v62, 1  ;;  %v1974_v53 = vrot.slane %v1937_v49, 1 }
 0x17f   :  { %v1969_v5 = vsel %vm151_vm0, %v1967_v9, %v1968_v37  ;;  %v1972_v30 = vsel %vm151_vm0, %v1970_v34, %v1971_v58  ;;  %v1976_v10 = vrot.slane %v1938_v44, 1  ;;  %v1977_v52 = vrot.slane %v1939_v25, 1 }
 0x180   :  { %v1975_v14 = vsel %vm151_vm0, %v1973_v61, %v1974_v53  ;;  %v1979_v46 = vrot.slane %v1940_v1, 1  ;;  %v1980_v36 = vrot.slane %v1941_v4, 1  ;;  %v5723_v19 = vadd.f32 %v1960_v26, %v5547_v24 }
 0x181   :  { %v1978_v40 = vsel %vm151_vm0, %v1976_v10, %v1977_v52  ;;  %v5727_v29 = vadd.f32 %v1963_v63, %v5549_v21  ;;  %v5730_v27 = vadd.f32 %v1966_v57, %v5551_v28  ;;  %v5733_v62 = vadd.f32 %v1969_v5, %v5553_v51  ;;  %v3341_v5 = vld [vmem:[%s7134_s0 + $0x5a0] sm:$0xff] }
 0x182   :  { %v1981_v49 = vsel %vm151_vm0, %v1979_v46, %v1980_v36  ;;  %v5737_v44 = vadd.f32 %v1972_v30, %v5555_v38  ;;  %v5740_v25 = vadd.f32 %v1975_v14, %v5557_v18  ;;  %v5743_v24 = vadd.f32 %v1978_v40, %v5559_v42  ;;  %v3342_v30 = vld [vmem:[%s7134_s0 + $0x5b0] sm:$0xff]  ;;  %v7251_v14 = vld [vmem:[#allocation13_spill] sm:$0xff] }
 0x183   :  { %v5746_v21 = vadd.f32 %v1981_v49, %v5561_v48  ;;  %v1999_v1 = vstv %s5709_s29  ;;  %v5750_v28 = vstv %s5711_s30  ;;  %v5753_v4 = vstv %s5714_s4  ;;  %v7252_v36 = vld [vmem:[#allocation14_spill] sm:$0xff]  ;;  %v3343_v49 = vld [vmem:[%s7134_s0 + $0x5c0] sm:$0xff]  ;;  %s6226_s30 = sld [smem:[#allocation2 + $0x33]]  ;;  %s6230_s4 = sld [smem:[#allocation2 + $0x4e]] }
 0x184   :  { %v2000_v51 = vmul.f32 %v5464_v39, %v1999_v1  ;;  %v2001_v6 = vmul.f32 %v5570_v60, %v1999_v1  ;;  %v2002_v38 = vmul.f32 %v5469_v22, %v1999_v1  ;;  %v2003_v18 = vmul.f32 %v5575_v47, %v1999_v1  ;;  %s6571_s29 = sld [smem:[#allocation2 + $0x19]] }
 0x185   :  { %v2004_v35 = vmul.f32 %v5474_v15, %v1999_v1  ;;  %v2005_v42 = vmul.f32 %v5584_v20, %v1999_v1  ;;  %v2006_v48 = vmul.f32 %v5479_v31, %v1999_v1  ;;  %v2007_v12 = vmul.f32 %v5589_v2, %v1999_v1 }
 0x186   :  { %v2008_v50 = vmul.f32 %v5484_v13, %v1999_v1  ;;  %v2009_v59 = vmul.f32 %v5602_v16, %v1999_v1  ;;  %v2010_v39 = vmul.f32 %v5489_v45, %v1999_v1  ;;  %v2011_v60 = vmul.f32 %v5607_v3, %v1999_v1 }
 0x187   :  { %v2012_v22 = vmul.f32 %v5494_v41, %v1999_v1  ;;  %v2013_v47 = vmul.f32 %v5620_v43, %v1999_v1  ;;  %v2014_v15 = vmul.f32 %v5499_v11, %v1999_v1  ;;  %v2015_v20 = vmul.f32 %v5625_v0, %v1999_v1  ;;  %v3344_v1 = vld [vmem:[%s7134_s0 + $0x5d0] sm:$0xff] }
 0x188   :  { %v2032_v55 = vrot.slane %v2000_v51, 1  ;;  %v2033_v31 = vrot.slane %v2001_v6, 1  ;;  %v2035_v9 = vrot.slane %v2002_v38, 1  ;;  %v2036_v2 = vrot.slane %v2003_v18, 1  ;;  %v3345_v51 = vld [vmem:[%s7134_s0 + $0x5e0] sm:$0xff] }
 0x189   :  { %v2038_v26 = vrot.slane %v2004_v35, 1  ;;  %v2039_v13 = vrot.slane %v2005_v42, 1  ;;  %v2041_v37 = vrot.slane %v2006_v48, 1  ;;  %v2042_v16 = vrot.slane %v2007_v12, 1  ;;  %v7253_v38 = vld [vmem:[#allocation16_spill] sm:$0xff]  ;;  %v7254_v35 = vld [vmem:[#allocation15_spill] sm:$0xff] }
 0x18a   :  { %v2034_v45 = vsel %vm151_vm0, %v2032_v55, %v2033_v31  ;;  %v2037_v3 = vsel %vm151_vm0, %v2035_v9, %v2036_v2  ;;  %v2044_v34 = vrot.slane %v2008_v50, 1  ;;  %v2045_v41 = vrot.slane %v2009_v59, 1  ;;  %v7255_v48 = vld [vmem:[#allocation17_spill] sm:$0xff]  ;;  %v3346_v50 = vld [vmem:[%s7134_s0 + $0x5f0] sm:$0xff]  ;;  %v3347_v59 = vld [vmem:[%s7134_s0 + $0x600] sm:$0xff] }
 0x18b   :  { %v2040_v43 = vsel %vm151_vm0, %v2038_v26, %v2039_v13  ;;  %v2043_v11 = vsel %vm151_vm0, %v2041_v37, %v2042_v16  ;;  %v2047_v58 = vrot.slane %v2010_v39, 1  ;;  %v2048_v0 = vrot.slane %v2011_v60, 1  ;;  %v3348_v39 = vld [vmem:[%s7134_s0 + $0x610] sm:$0xff]  ;;  %v7258_v31 = vld [vmem:[#allocation9_spill] sm:$0xff] }
 0x18c   :  { %v2046_v63 = vsel %vm151_vm0, %v2044_v34, %v2045_v41  ;;  %v2050_v57 = vrot.slane %v2012_v22, 1  ;;  %v2051_v61 = vrot.slane %v2013_v47, 1  ;;  %v2053_v53 = vrot.slane %v2014_v15, 1  ;;  %v7256_v22 = vld [vmem:[#allocation18_spill] sm:$0xff]  ;;  %v7257_v15 = vld [vmem:[#allocation8_spill] sm:$0xff] }
 0x18d   :  { %v2049_v10 = vsel %vm151_vm0, %v2047_v58, %v2048_v0  ;;  %v2054_v52 = vrot.slane %v2015_v20, 1  ;;  %v5784_v46 = vadd.f32 %v2034_v45, %v7251_v14  ;;  %v5787_v40 = vadd.f32 %v2037_v3, %v7252_v36 }
 0x18e   :  { %v2052_v6 = vsel %vm151_vm0, %v2050_v57, %v2051_v61  ;;  %v5800_v18 = vadd.f32 %v2040_v43, %v7253_v38  ;;  %v5803_v42 = vadd.f32 %v2043_v11, %v7254_v35  ;;  %v5806_v12 = vadd.f32 %v2046_v63, %v7255_v48 }
 0x18f   :  { %v2055_v60 = vsel %vm151_vm0, %v2053_v53, %v2054_v52  ;;  %v5819_v47 = vadd.f32 %v2049_v10, %v7256_v22  ;;  %v5822_v20 = vadd.f32 %v2052_v6, %v7257_v15  ;;  %v2083_v55 = vmul.f32 %v3341_v5, %v5750_v28  ;;  %v5924_v15 = vld [vmem:[%s7134_s0 + $0x180] sm:$0xff] }
 0x190   :  { %v2071_v9 = vadd.f32 %v2055_v60, %v7258_v31  ;;  %v2084_v2 = vmul.f32 %v3342_v30, %v5750_v28  ;;  %v2085_v26 = vmul.f32 %v3343_v49, %v5750_v28  ;;  %v2086_v13 = vmul.f32 %v3344_v1, %v5750_v28 }
 0x191   :  { %v2087_v37 = vmul.f32 %v3345_v51, %v5750_v28  ;;  %v2088_v16 = vmul.f32 %v3346_v50, %v5750_v28  ;;  %v2089_v45 = vmul.f32 %v3347_v59, %v5750_v28  ;;  %v2090_v3 = vmul.f32 %v3348_v39, %v5750_v28 }
 0x192   :  { %v2091_v34 = vadd.f32 %v2083_v55, %v5668_v33  ;;  %v2092_v41 = vadd.f32 %v2084_v2, %v5671_v8  ;;  %v2093_v43 = vadd.f32 %v2085_v26, %v5675_v17  ;;  %v2094_v11 = vadd.f32 %v2086_v13, %v5678_v32 }
 0x193   :  { %v2095_v58 = vadd.f32 %v2087_v37, %v5681_v23  ;;  %v2096_v0 = vadd.f32 %v2088_v16, %v5685_v7  ;;  %v2097_v63 = vadd.f32 %v2089_v45, %v5688_v56  ;;  %v2098_v57 = vadd.f32 %v2090_v3, %v5692_v54 }
 0x194   :  { %v2101_v61 = vmul.f32 %v3341_v5, %v5753_v4  ;;  %v2102_v28 = vmul.f32 %v3342_v30, %v5753_v4  ;;  %v2103_v33 = vmul.f32 %v3343_v49, %v5753_v4  ;;  %v2104_v8 = vmul.f32 %v3344_v1, %v5753_v4 }
 0x195   :  { %v2105_v17 = vmul.f32 %v3345_v51, %v5753_v4  ;;  %v2106_v32 = vmul.f32 %v3346_v50, %v5753_v4  ;;  %v2107_v23 = vmul.f32 %v3347_v59, %v5753_v4  ;;  %v2108_v7 = vmul.f32 %v3348_v39, %v5753_v4 }
 0x196   :  { %v5858_v56 = vadd.f32 %v2101_v61, %v5723_v19  ;;  %v5861_v54 = vadd.f32 %v2102_v28, %v5727_v29  ;;  %v5864_v53 = vadd.f32 %v2103_v33, %v5730_v27  ;;  %v5867_v10 = vadd.f32 %v2104_v8, %v5733_v62 }
 0x197   :  { %v5870_v52 = vadd.f32 %v2105_v17, %v5737_v44  ;;  %v5873_v14 = vadd.f32 %v2106_v32, %v5740_v25  ;;  %v5876_v4 = vadd.f32 %v2107_v23, %v5743_v24  ;;  %v5879_v19 = vadd.f32 %v2108_v7, %v5746_v21  ;;  %v5890_v44 = vld [vmem:[%s7134_s0 + $0x120] sm:$0xff]  ;;  %v5895_v25 = vld [vmem:[%s7134_s0 + $0x130] sm:$0xff] }
 0x198   :  { %v2118_v29 = vstv %s5825_s1  ;;  %v2155_v36 = vstv %s5827_s2  ;;  %v2173_v6 = vstv %s5833_s21  ;;  %v5885_v27 = vstv %s5835_s22 }
 0x199   :  { %v2119_v38 = vmul.f32 %v3341_v5, %v2118_v29  ;;  %v2120_v62 = vmul.f32 %v3342_v30, %v2118_v29  ;;  %v2121_v35 = vmul.f32 %v3343_v49, %v2118_v29  ;;  %v2122_v48 = vmul.f32 %v3344_v1, %v2118_v29  ;;  %v5900_v5 = vld [vmem:[%s7134_s0 + $0x140] sm:$0xff]  ;;  %v5905_v30 = vld [vmem:[%s7134_s0 + $0x150] sm:$0xff] }
 0x19a   :  { %v2123_v24 = vmul.f32 %v3345_v51, %v2118_v29  ;;  %v2124_v21 = vmul.f32 %v3346_v50, %v2118_v29  ;;  %v2125_v60 = vmul.f32 %v3347_v59, %v2118_v29  ;;  %v2126_v22 = vmul.f32 %v3348_v39, %v2118_v29  ;;  %v5910_v49 = vld [vmem:[%s7134_s0 + $0x160] sm:$0xff]  ;;  %v5919_v39 = vld [vmem:[%s7134_s0 + $0x170] sm:$0xff] }
 0x19b   :  { %v2127_v1 = vadd.f32 %v2119_v38, %v5784_v46  ;;  %v2128_v51 = vadd.f32 %v2120_v62, %v5787_v40  ;;  %v2129_v50 = vadd.f32 %v2121_v35, %v5800_v18  ;;  %v2130_v59 = vadd.f32 %v2122_v48, %v5803_v42  ;;  %v5929_v46 = vld [vmem:[%s7134_s0 + $0x190] sm:$0xff]  ;;  %v6017_v62 = vld [vmem:[%s7134_s0 + $0x128] sm:$0x1]  ;;  %v6022_v35 = vld [vmem:[%s7134_s0 + $0x138] sm:$0x1] }
 0x19c   :  { %v2131_v40 = vadd.f32 %v2123_v24, %v5806_v12  ;;  %v2132_v18 = vadd.f32 %v2124_v21, %v5819_v47  ;;  %v2133_v42 = vadd.f32 %v2125_v60, %v5822_v20  ;;  %v2134_v55 = vadd.f32 %v2126_v22, %v2071_v9  ;;  %v6027_v48 = vld [vmem:[%s7134_s0 + $0x148] sm:$0x1]  ;;  %v6040_v22 = vld [vmem:[%s7134_s0 + $0x158] sm:$0x1] }
 0x19d   :  { %v2156_v31 = vmul.f32 %v5890_v44, %v2155_v36  ;;  %v2157_v2 = vmul.f32 %v5895_v25, %v2155_v36  ;;  %v2158_v26 = vmul.f32 %v5900_v5, %v2155_v36  ;;  %v2159_v13 = vmul.f32 %v5905_v30, %v2155_v36 }
 0x19e   :  { %v2160_v37 = vmul.f32 %v5910_v49, %v2155_v36  ;;  %v2161_v16 = vmul.f32 %v5919_v39, %v2155_v36  ;;  %v2162_v45 = vmul.f32 %v5924_v15, %v2155_v36  ;;  %v2163_v12 = vmul.f32 %v5929_v46, %v2155_v36 }
 0x19f   :  { %v5942_v47 = vadd.f32 %v2156_v31, %v2091_v34  ;;  %v5944_v20 = vadd.f32 %v2157_v2, %v2092_v41  ;;  %v5946_v9 = vadd.f32 %v2158_v26, %v2093_v43  ;;  %v5948_v3 = vadd.f32 %v2159_v13, %v2094_v11  ;;  %v6045_v31 = vld [vmem:[%s7134_s0 + $0x168] sm:$0x1] }
 0x1a0   :  { %v5950_v61 = vadd.f32 %v2160_v37, %v2095_v58  ;;  %v5952_v28 = vadd.f32 %v2161_v16, %v2096_v0  ;;  %v5954_v33 = vadd.f32 %v2162_v45, %v2097_v63  ;;  %v5956_v8 = vadd.f32 %v2163_v12, %v2098_v57  ;;  %v6073_v45 = vld [vmem:[%s7134_s0 + $0x188] sm:$0x1] }
 0x1a1   :  { %v2174_v34 = vmul.f32 %v5890_v44, %v2173_v6  ;;  %v2175_v41 = vmul.f32 %v5895_v25, %v2173_v6  ;;  %v2176_v43 = vmul.f32 %v5900_v5, %v2173_v6  ;;  %v2177_v11 = vmul.f32 %v5905_v30, %v2173_v6 }
 0x1a2   :  { %v2178_v58 = vmul.f32 %v5910_v49, %v2173_v6  ;;  %v2179_v0 = vmul.f32 %v5919_v39, %v2173_v6  ;;  %v2180_v63 = vmul.f32 %v5924_v15, %v2173_v6  ;;  %v2181_v57 = vmul.f32 %v5929_v46, %v2173_v6 }
 0x1a3   :  { %v5975_v17 = vadd.f32 %v2174_v34, %v5858_v56  ;;  %v5978_v32 = vadd.f32 %v2175_v41, %v5861_v54  ;;  %v5981_v23 = vadd.f32 %v2176_v43, %v5864_v53  ;;  %v5984_v7 = vadd.f32 %v2177_v11, %v5867_v10 }
 0x1a4   :  { %v5987_v29 = vadd.f32 %v2178_v58, %v5870_v52  ;;  %v5990_v36 = vadd.f32 %v2179_v0, %v5873_v14  ;;  %v5993_v6 = vadd.f32 %v2180_v63, %v5876_v4  ;;  %v5996_v56 = vadd.f32 %v2181_v57, %v5879_v19 }
 0x1a5   :  { %v2192_v54 = vmul.f32 %v5890_v44, %v5885_v27  ;;  %v2193_v53 = vmul.f32 %v5895_v25, %v5885_v27  ;;  %v2194_v10 = vmul.f32 %v5900_v5, %v5885_v27  ;;  %v2195_v52 = vmul.f32 %v5905_v30, %v5885_v27 }
 0x1a6   :  { %7259 = vst [vmem:[#allocation10_spill] sm:$0xff] %v5996_v56  ;;  %v2196_v14 = vmul.f32 %v5910_v49, %v5885_v27  ;;  %v2197_v4 = vmul.f32 %v5919_v39, %v5885_v27  ;;  %v2198_v19 = vmul.f32 %v5924_v15, %v5885_v27  ;;  %v2199_v38 = vmul.f32 %v5929_v46, %v5885_v27 }
 0x1a7   :  { %v6029_v24 = vadd.f32 %v2192_v54, %v2127_v1  ;;  %v6031_v27 = vadd.f32 %v2193_v53, %v2128_v51  ;;  %v6033_v21 = vadd.f32 %v2194_v10, %v2129_v50  ;;  %v6035_v60 = vadd.f32 %v2195_v52, %v2130_v59  ;;  %v6050_v1 = vld [vmem:[%s7134_s0 + $0x178] sm:$0x1] }
 0x1a8   :  { %v6052_v51 = vadd.f32 %v2196_v14, %v2131_v40  ;;  %v6054_v50 = vadd.f32 %v2197_v4, %v2132_v18  ;;  %v6056_v59 = vadd.f32 %v2198_v19, %v2133_v42  ;;  %v6058_v2 = vadd.f32 %v2199_v38, %v2134_v55  ;;  %v6078_v40 = vld [vmem:[%s7134_s0 + $0x198] sm:$0x1] }
 0x1a9   :  { %7260 = vst [vmem:[#allocation11_spill] sm:$0xff] %v6029_v24  ;;  %7261 = vst [vmem:[#allocation12_spill] sm:$0xff] %v6031_v27  ;;  %v2209_v26 = vstv %s5958_s12  ;;  %v6062_v13 = vstv %s5960_s13  ;;  %v6065_v37 = vstv %s5966_s14  ;;  %v6068_v16 = vstv %s5968_s15  ;;  %s6490_s12 = sld [smem:[#allocation2 + $0x13]]  ;;  %s6492_s13 = sld [smem:[#allocation2 + $0x2e]] }
 0x1aa   :  { %7262 = vst [vmem:[#allocation13_spill] sm:$0xff] %v6033_v21  ;;  %7263 = vst [vmem:[#allocation14_spill] sm:$0xff] %v6035_v60  ;;  %v2210_v18 = vmul.f32 %v5890_v44, %v2209_v26  ;;  %v2211_v42 = vmul.f32 %v6017_v62, %v2209_v26  ;;  %v2212_v55 = vmul.f32 %v5895_v25, %v2209_v26  ;;  %s6495_s14 = sld [smem:[#allocation2 + $0x49]]  ;;  %s6669_s15 = sld [smem:[#allocation2 + $0x32]] }
 0x1ab   :  { %7264 = vst [vmem:[#allocation16_spill] sm:$0xff] %v6052_v51  ;;  %7265 = vst [vmem:[#allocation15_spill] sm:$0xff] %v6054_v50  ;;  %v2213_v12 = vmul.f32 %v6022_v35, %v2209_v26  ;;  %v2214_v34 = vmul.f32 %v5900_v5, %v2209_v26  ;;  %v2215_v41 = vmul.f32 %v6027_v48, %v2209_v26 }
 0x1ac   :  { %7266 = vst [vmem:[#allocation17_spill] sm:$0xff] %v6056_v59  ;;  %7267 = vst [vmem:[#allocation18_spill] sm:$0xff] %v6058_v2  ;;  %v2216_v43 = vmul.f32 %v5905_v30, %v2209_v26  ;;  %v2217_v11 = vmul.f32 %v6040_v22, %v2209_v26  ;;  %v2218_v58 = vmul.f32 %v5910_v49, %v2209_v26  ;;  %v2242_v14 = vrot.slane %v2210_v18, 1 }
 0x1ad   :  { %7268 = vst [vmem:[#allocation8_spill] sm:$0xff] %v6065_v37  ;;  %7269 = vst [vmem:[#allocation9_spill] sm:$0xff] %v6068_v16  ;;  %v2219_v0 = vmul.f32 %v6045_v31, %v2209_v26  ;;  %v2220_v63 = vmul.f32 %v5919_v39, %v2209_v26  ;;  %v2221_v57 = vmul.f32 %v6050_v1, %v2209_v26  ;;  %v2243_v4 = vrot.slane %v2211_v42, 1 }
 0x1ae   :  { %v2222_v54 = vmul.f32 %v5924_v15, %v2209_v26  ;;  %v2223_v53 = vmul.f32 %v6073_v45, %v2209_v26  ;;  %v2224_v10 = vmul.f32 %v5929_v46, %v2209_v26  ;;  %v2225_v52 = vmul.f32 %v6078_v40, %v2209_v26 }
 0x1af   :  { %v2245_v19 = vrot.slane %v2212_v55, 1  ;;  %v2246_v38 = vrot.slane %v2213_v12, 1  ;;  %v2248_v2 = vrot.slane %v2214_v34, 1  ;;  %v2249_v16 = vrot.slane %v2215_v41, 1 }
 0x1b0   :  { %v2251_v59 = vrot.slane %v2216_v43, 1  ;;  %v2252_v50 = vrot.slane %v2217_v11, 1  ;;  %v2244_v51 = vsel %vm151_vm0, %v2242_v14, %v2243_v4  ;;  %v2254_v21 = vrot.slane %v2218_v58, 1 }
 0x1b1   :  { %v2247_v60 = vsel %vm151_vm0, %v2245_v19, %v2246_v38  ;;  %v2255_v27 = vrot.slane %v2219_v0, 1  ;;  %v2250_v24 = vsel %vm151_vm0, %v2248_v2, %v2249_v16  ;;  %v2257_v37 = vrot.slane %v2220_v63, 1 }
 0x1b2   :  { %v2253_v56 = vsel %vm151_vm0, %v2251_v59, %v2252_v50  ;;  %v2258_v26 = vrot.slane %v2221_v57, 1  ;;  %v2260_v42 = vrot.slane %v2222_v54, 1  ;;  %v2261_v55 = vrot.slane %v2223_v53, 1 }
 0x1b3   :  { %v2256_v18 = vsel %vm151_vm0, %v2254_v21, %v2255_v27  ;;  %v2263_v12 = vrot.slane %v2224_v10, 1  ;;  %v2264_v41 = vrot.slane %v2225_v52, 1  ;;  %v6103_v43 = vadd.f32 %v2244_v51, %v5942_v47 }
 0x1b4   :  { %v2259_v34 = vsel %vm151_vm0, %v2257_v37, %v2258_v26  ;;  %v6106_v11 = vadd.f32 %v2247_v60, %v5944_v20  ;;  %v2262_v2 = vsel %vm151_vm0, %v2260_v42, %v2261_v55  ;;  %v6110_v50 = vadd.f32 %v2250_v24, %v5946_v9 }
 0x1b5   :  { %v6113_v59 = vadd.f32 %v2253_v56, %v5948_v3  ;;  %v6116_v27 = vadd.f32 %v2256_v18, %v5950_v61  ;;  %v2265_v21 = vsel %vm151_vm0, %v2263_v12, %v2264_v41  ;;  %v6120_v37 = vadd.f32 %v2259_v34, %v5952_v28 }
 0x1b6   :  { %v6123_v47 = vadd.f32 %v2262_v2, %v5954_v33  ;;  %v2284_v20 = vmul.f32 %v5890_v44, %v6062_v13  ;;  %v6128_v9 = vadd.f32 %v2265_v21, %v5956_v8  ;;  %v2285_v3 = vmul.f32 %v6017_v62, %v6062_v13 }
 0x1b7   :  { %v2286_v61 = vmul.f32 %v5895_v25, %v6062_v13  ;;  %v2287_v56 = vmul.f32 %v6022_v35, %v6062_v13  ;;  %v2288_v28 = vmul.f32 %v5900_v5, %v6062_v13  ;;  %v2289_v33 = vmul.f32 %v6027_v48, %v6062_v13 }
 0x1b8   :  { %v2290_v24 = vmul.f32 %v5905_v30, %v6062_v13  ;;  %v2291_v8 = vmul.f32 %v6040_v22, %v6062_v13  ;;  %v2292_v60 = vmul.f32 %v5910_v49, %v6062_v13  ;;  %v2293_v51 = vmul.f32 %v6045_v31, %v6062_v13 }
 0x1b9   :  { %v2294_v16 = vmul.f32 %v5919_v39, %v6062_v13  ;;  %v2295_v58 = vmul.f32 %v6050_v1, %v6062_v13  ;;  %v2296_v0 = vmul.f32 %v5924_v15, %v6062_v13  ;;  %v2297_v63 = vmul.f32 %v6073_v45, %v6062_v13 }
 0x1ba   :  { %v2298_v57 = vmul.f32 %v5929_v46, %v6062_v13  ;;  %v2299_v54 = vmul.f32 %v6078_v40, %v6062_v13  ;;  %v2316_v53 = vrot.slane %v2284_v20, 1  ;;  %v2317_v10 = vrot.slane %v2285_v3, 1 }
 0x1bb   :  { %v2319_v52 = vrot.slane %v2286_v61, 1  ;;  %v2320_v14 = vrot.slane %v2287_v56, 1  ;;  %v2322_v4 = vrot.slane %v2288_v28, 1  ;;  %v2323_v19 = vrot.slane %v2289_v33, 1 }
 0x1bc   :  { %v2325_v38 = vrot.slane %v2290_v24, 1  ;;  %v2326_v26 = vrot.slane %v2291_v8, 1  ;;  %v2318_v18 = vsel %vm151_vm0, %v2316_v53, %v2317_v10  ;;  %v2328_v55 = vrot.slane %v2292_v60, 1 }
 0x1bd   :  { %v2321_v42 = vsel %vm151_vm0, %v2319_v52, %v2320_v14  ;;  %v2329_v12 = vrot.slane %v2293_v51, 1  ;;  %v2324_v34 = vsel %vm151_vm0, %v2322_v4, %v2323_v19  ;;  %v2331_v2 = vrot.slane %v2294_v16, 1 }
 0x1be   :  { %v2327_v41 = vsel %vm151_vm0, %v2325_v38, %v2326_v26  ;;  %v2332_v13 = vrot.slane %v2295_v58, 1  ;;  %v2334_v20 = vrot.slane %v2296_v0, 1  ;;  %v2335_v3 = vrot.slane %v2297_v63, 1 }
 0x1bf   :  { %v2330_v21 = vsel %vm151_vm0, %v2328_v55, %v2329_v12  ;;  %v2337_v61 = vrot.slane %v2298_v57, 1  ;;  %v2338_v28 = vrot.slane %v2299_v54, 1  ;;  %v6167_v33 = vadd.f32 %v2318_v18, %v5975_v17  ;;  %v7271_v57 = vld [vmem:[#allocation10_spill] sm:$0xff] }
 0x1c0   :  { %v2333_v56 = vsel %vm151_vm0, %v2331_v2, %v2332_v13  ;;  %v6170_v24 = vadd.f32 %v2321_v42, %v5978_v32  ;;  %v2336_v8 = vsel %vm151_vm0, %v2334_v20, %v2335_v3  ;;  %v6174_v60 = vadd.f32 %v2324_v34, %v5981_v23  ;;  %v7270_v32 = vld [vmem:[#allocation8_spill] sm:$0xff] }
 0x1c1   :  { %v6177_v51 = vadd.f32 %v2327_v41, %v5984_v7  ;;  %v6180_v16 = vadd.f32 %v2330_v21, %v5987_v29  ;;  %v2339_v58 = vsel %vm151_vm0, %v2337_v61, %v2338_v28  ;;  %v6184_v0 = vadd.f32 %v2333_v56, %v5990_v36 }
 0x1c2   :  { %v6187_v17 = vadd.f32 %v2336_v8, %v5993_v6  ;;  %v2358_v63 = vmul.f32 %v5890_v44, %v7270_v32  ;;  %v6192_v23 = vadd.f32 %v2339_v58, %v7271_v57  ;;  %v2359_v7 = vmul.f32 %v6017_v62, %v7270_v32 }
 0x1c3   :  { %v2360_v29 = vmul.f32 %v5895_v25, %v7270_v32  ;;  %v2361_v54 = vmul.f32 %v6022_v35, %v7270_v32  ;;  %v2362_v36 = vmul.f32 %v5900_v5, %v7270_v32  ;;  %v2363_v6 = vmul.f32 %v6027_v48, %v7270_v32 }
 0x1c4   :  { %v2364_v44 = vmul.f32 %v5905_v30, %v7270_v32  ;;  %v2365_v53 = vmul.f32 %v6040_v22, %v7270_v32  ;;  %v2366_v62 = vmul.f32 %v5910_v49, %v7270_v32  ;;  %v2367_v10 = vmul.f32 %v6045_v31, %v7270_v32 }
 0x1c5   :  { %v2368_v52 = vmul.f32 %v5919_v39, %v7270_v32  ;;  %v2369_v14 = vmul.f32 %v6050_v1, %v7270_v32  ;;  %v2370_v4 = vmul.f32 %v5924_v15, %v7270_v32  ;;  %v2371_v19 = vmul.f32 %v6073_v45, %v7270_v32 }
 0x1c6   :  { %v2372_v38 = vmul.f32 %v5929_v46, %v7270_v32  ;;  %v2373_v26 = vmul.f32 %v6078_v40, %v7270_v32  ;;  %v2390_v18 = vrot.slane %v2358_v63, 1  ;;  %v2391_v42 = vrot.slane %v2359_v7, 1 }
 0x1c7   :  { %v2393_v55 = vrot.slane %v2360_v29, 1  ;;  %v2394_v12 = vrot.slane %v2361_v54, 1  ;;  %v2396_v34 = vrot.slane %v2362_v36, 1  ;;  %v2397_v41 = vrot.slane %v2363_v6, 1  ;;  %v7272_v36 = vld [vmem:[#allocation11_spill] sm:$0xff] }
 0x1c8   :  { %v2399_v2 = vrot.slane %v2364_v44, 1  ;;  %v2400_v13 = vrot.slane %v2365_v53, 1  ;;  %v2392_v21 = vsel %vm151_vm0, %v2390_v18, %v2391_v42  ;;  %v2402_v3 = vrot.slane %v2366_v62, 1  ;;  %v7273_v44 = vld [vmem:[#allocation12_spill] sm:$0xff] }
 0x1c9   :  { %v2395_v20 = vsel %vm151_vm0, %v2393_v55, %v2394_v12  ;;  %v2403_v61 = vrot.slane %v2367_v10, 1  ;;  %v2398_v56 = vsel %vm151_vm0, %v2396_v34, %v2397_v41  ;;  %v2405_v8 = vrot.slane %v2368_v52, 1  ;;  %v6243_v62 = vld [vmem:[%s7134_s0 + $0x1a0] sm:$0xff]  ;;  %v7274_v52 = vld [vmem:[#allocation13_spill] sm:$0xff] }
 0x1ca   :  { %v2401_v28 = vsel %vm151_vm0, %v2399_v2, %v2400_v13  ;;  %v2406_v58 = vrot.slane %v2369_v14, 1  ;;  %v2408_v63 = vrot.slane %v2370_v4, 1  ;;  %v2409_v57 = vrot.slane %v2371_v19, 1  ;;  %v7275_v4 = vld [vmem:[#allocation14_spill] sm:$0xff]  ;;  %v7278_v12 = vld [vmem:[#allocation17_spill] sm:$0xff] }
 0x1cb   :  { %v2404_v32 = vsel %vm151_vm0, %v2402_v3, %v2403_v61  ;;  %v2411_v7 = vrot.slane %v2372_v38, 1  ;;  %v2412_v54 = vrot.slane %v2373_v26, 1  ;;  %v2422_v6 = vadd.f32 %v2392_v21, %v7272_v36  ;;  %v7276_v38 = vld [vmem:[#allocation16_spill] sm:$0xff]  ;;  %v7277_v26 = vld [vmem:[#allocation15_spill] sm:$0xff]  ;;  %v7279_v41 = vld [vmem:[#allocation9_spill] sm:$0xff] }
 0x1cc   :  { %v2407_v29 = vsel %vm151_vm0, %v2405_v8, %v2406_v58  ;;  %v2423_v53 = vadd.f32 %v2395_v20, %v7273_v44  ;;  %v2410_v10 = vsel %vm151_vm0, %v2408_v63, %v2409_v57  ;;  %v2424_v14 = vadd.f32 %v2398_v56, %v7274_v52  ;;  %v7280_v13 = vld [vmem:[#allocation18_spill] sm:$0xff] }
 0x1cd   :  { %v2425_v19 = vadd.f32 %v2401_v28, %v7275_v4  ;;  %v2426_v18 = vadd.f32 %v2404_v32, %v7276_v38  ;;  %v2413_v42 = vsel %vm151_vm0, %v2411_v7, %v2412_v54  ;;  %v2427_v55 = vadd.f32 %v2407_v29, %v7277_v26 }
 0x1ce   :  { %v2428_v34 = vadd.f32 %v2410_v10, %v7278_v12  ;;  %v2432_v2 = vmul.f32 %v5895_v25, %v7279_v41  ;;  %v2429_v21 = vadd.f32 %v2413_v42, %v7280_v13  ;;  %v2433_v20 = vmul.f32 %v5900_v5, %v7279_v41 }
 0x1cf   :  { %v2434_v3 = vmul.f32 %v5905_v30, %v7279_v41  ;;  %v2435_v61 = vmul.f32 %v5910_v49, %v7279_v41  ;;  %v2436_v56 = vmul.f32 %v5919_v39, %v7279_v41  ;;  %v2437_v28 = vmul.f32 %v5924_v15, %v7279_v41 }
 0x1d0   :  { %v2438_v8 = vmul.f32 %v5929_v46, %v7279_v41  ;;  %v2439_v58 = vmul.f32 %v6243_v62, %v7279_v41  ;;  %v6270_v32 = vadd.f32 %v2432_v2, %v6103_v43  ;;  %v6273_v63 = vadd.f32 %v2433_v20, %v6106_v11 }
 0x1d1   :  { %v6276_v57 = vadd.f32 %v2434_v3, %v6110_v50  ;;  %v6279_v7 = vadd.f32 %v2435_v61, %v6113_v59  ;;  %v6282_v29 = vadd.f32 %v2436_v56, %v6116_v27  ;;  %v6285_v54 = vadd.f32 %v2437_v28, %v6120_v37 }
 0x1d2   :  { %v6288_v36 = vadd.f32 %v2438_v8, %v6123_v47  ;;  %v6291_v43 = vadd.f32 %v2439_v58, %v6128_v9  ;;  %v2449_v11 = vstv %s6226_s30  ;;  %v2467_v44 = vstv %s6230_s4  ;;  %s6573_s30 = sld [smem:[#allocation2 + $0x34]]  ;;  %s6578_s4 = sld [smem:[#allocation2 + $0x4f]] }
 0x1d3   :  { %v2485_v10 = vstv %s6232_s5  ;;  %v6297_v50 = vstv %s6235_s6  ;;  %v2450_v59 = vmul.f32 %v5895_v25, %v2449_v11  ;;  %v2451_v52 = vmul.f32 %v5900_v5, %v2449_v11  ;;  %s6580_s5 = sld [smem:[#allocation2 + $0x15]] }
 0x1d4   :  { %v2452_v27 = vmul.f32 %v5905_v30, %v2449_v11  ;;  %v2453_v37 = vmul.f32 %v5910_v49, %v2449_v11  ;;  %v2454_v4 = vmul.f32 %v5919_v39, %v2449_v11  ;;  %v2455_v47 = vmul.f32 %v5924_v15, %v2449_v11 }
 0x1d5   :  { %v2456_v9 = vmul.f32 %v5929_v46, %v2449_v11  ;;  %v2457_v38 = vmul.f32 %v6243_v62, %v2449_v11  ;;  %v6308_v42 = vadd.f32 %v2450_v59, %v6167_v33  ;;  %v6311_v26 = vadd.f32 %v2451_v52, %v6170_v24 }
 0x1d6   :  { %v6314_v12 = vadd.f32 %v2452_v27, %v6174_v60  ;;  %v6317_v41 = vadd.f32 %v2453_v37, %v6177_v51  ;;  %v6320_v2 = vadd.f32 %v2454_v4, %v6180_v16  ;;  %v6323_v13 = vadd.f32 %v2455_v47, %v6184_v0 }
 0x1d7   :  { %v6326_v20 = vadd.f32 %v2456_v9, %v6187_v17  ;;  %v6329_v33 = vadd.f32 %v2457_v38, %v6192_v23  ;;  %v2468_v24 = vmul.f32 %v5895_v25, %v2467_v44  ;;  %v2469_v60 = vmul.f32 %v5900_v5, %v2467_v44 }
 0x1d8   :  { %v2470_v3 = vmul.f32 %v5905_v30, %v2467_v44  ;;  %v2471_v51 = vmul.f32 %v5910_v49, %v2467_v44  ;;  %v2472_v16 = vmul.f32 %v5919_v39, %v2467_v44  ;;  %v2473_v61 = vmul.f32 %v5924_v15, %v2467_v44 }
 0x1d9   :  { %7281 = vst [vmem:[#allocation8_spill] sm:$0xff] %v6329_v33  ;;  %v2474_v0 = vmul.f32 %v5929_v46, %v2467_v44  ;;  %v2475_v17 = vmul.f32 %v6243_v62, %v2467_v44  ;;  %v6339_v56 = vadd.f32 %v2468_v24, %v2422_v6  ;;  %v6341_v23 = vadd.f32 %v2469_v60, %v2423_v53  ;;  %v6358_v44 = vld [vmem:[%s7134_s0 + $0x1a8] sm:$0x1] }
 0x1da   :  { %v6343_v28 = vadd.f32 %v2470_v3, %v2424_v14  ;;  %v6345_v8 = vadd.f32 %v2471_v51, %v2425_v19  ;;  %v6347_v58 = vadd.f32 %v2472_v16, %v2426_v18  ;;  %v6349_v11 = vadd.f32 %v2473_v61, %v2427_v55 }
 0x1db   :  { %7282 = vst [vmem:[#allocation10_spill] sm:$0xff] %v6339_v56  ;;  %7283 = vst [vmem:[#allocation11_spill] sm:$0xff] %v6341_v23  ;;  %v6351_v59 = vadd.f32 %v2474_v0, %v2428_v34  ;;  %v6353_v52 = vadd.f32 %v2475_v17, %v2429_v21  ;;  %v2486_v6 = vmul.f32 %v5895_v25, %v2485_v10 }
 0x1dc   :  { %7284 = vst [vmem:[#allocation12_spill] sm:$0xff] %v6343_v28  ;;  %7285 = vst [vmem:[#allocation13_spill] sm:$0xff] %v6345_v8  ;;  %v2487_v53 = vmul.f32 %v6022_v35, %v2485_v10  ;;  %v2488_v14 = vmul.f32 %v5900_v5, %v2485_v10  ;;  %v2489_v19 = vmul.f32 %v6027_v48, %v2485_v10 }
 0x1dd   :  { %7286 = vst [vmem:[#allocation14_spill] sm:$0xff] %v6347_v58  ;;  %7287 = vst [vmem:[#allocation16_spill] sm:$0xff] %v6349_v11  ;;  %v2490_v18 = vmul.f32 %v5905_v30, %v2485_v10  ;;  %v2491_v55 = vmul.f32 %v6040_v22, %v2485_v10  ;;  %v2492_v34 = vmul.f32 %v5910_v49, %v2485_v10  ;;  %v2518_v3 = vrot.slane %v2486_v6, 1 }
 0x1de   :  { %7288 = vst [vmem:[#allocation15_spill] sm:$0xff] %v6351_v59  ;;  %7289 = vst [vmem:[#allocation17_spill] sm:$0xff] %v6353_v52  ;;  %v2493_v21 = vmul.f32 %v6045_v31, %v2485_v10  ;;  %v2494_v27 = vmul.f32 %v5919_v39, %v2485_v10  ;;  %v2495_v37 = vmul.f32 %v6050_v1, %v2485_v10  ;;  %v2519_v51 = vrot.slane %v2487_v53, 1 }
 0x1df   :  { %v2496_v4 = vmul.f32 %v5924_v15, %v2485_v10  ;;  %v2497_v47 = vmul.f32 %v6073_v45, %v2485_v10  ;;  %v2498_v9 = vmul.f32 %v5929_v46, %v2485_v10  ;;  %v2499_v38 = vmul.f32 %v6078_v40, %v2485_v10 }
 0x1e0   :  { %v2500_v24 = vmul.f32 %v6243_v62, %v2485_v10  ;;  %v2501_v60 = vmul.f32 %v6358_v44, %v2485_v10  ;;  %v2521_v16 = vrot.slane %v2488_v14, 1  ;;  %v2522_v61 = vrot.slane %v2489_v19, 1 }
 0x1e1   :  { %v2524_v0 = vrot.slane %v2490_v18, 1  ;;  %v2525_v17 = vrot.slane %v2491_v55, 1  ;;  %v2527_v52 = vrot.slane %v2492_v34, 1  ;;  %v2528_v59 = vrot.slane %v2493_v21, 1 }
 0x1e2   :  { %v2520_v11 = vsel %vm151_vm0, %v2518_v3, %v2519_v51  ;;  %v2523_v58 = vsel %vm151_vm0, %v2521_v16, %v2522_v61  ;;  %v2530_v8 = vrot.slane %v2494_v27, 1  ;;  %v2531_v28 = vrot.slane %v2495_v37, 1 }
 0x1e3   :  { %v2526_v23 = vsel %vm151_vm0, %v2524_v0, %v2525_v17  ;;  %v2529_v56 = vsel %vm151_vm0, %v2527_v52, %v2528_v59  ;;  %v2533_v33 = vrot.slane %v2496_v4, 1  ;;  %v2534_v10 = vrot.slane %v2497_v47, 1 }
 0x1e4   :  { %v2532_v6 = vsel %vm151_vm0, %v2530_v8, %v2531_v28  ;;  %v2536_v53 = vrot.slane %v2498_v9, 1  ;;  %v2537_v14 = vrot.slane %v2499_v38, 1  ;;  %v2539_v19 = vrot.slane %v2500_v24, 1 }
 0x1e5   :  { %v2535_v18 = vsel %vm151_vm0, %v2533_v33, %v2534_v10  ;;  %v2540_v55 = vrot.slane %v2501_v60, 1  ;;  %v6383_v34 = vadd.f32 %v2520_v11, %v6270_v32  ;;  %v6386_v21 = vadd.f32 %v2523_v58, %v6273_v63 }
 0x1e6   :  { %v2538_v27 = vsel %vm151_vm0, %v2536_v53, %v2537_v14  ;;  %v6390_v59 = vadd.f32 %v2526_v23, %v6276_v57  ;;  %v6393_v52 = vadd.f32 %v2529_v56, %v6279_v7  ;;  %v6396_v28 = vadd.f32 %v2532_v6, %v6282_v29 }
 0x1e7   :  { %v2541_v33 = vsel %vm151_vm0, %v2539_v19, %v2540_v55  ;;  %v6400_v8 = vadd.f32 %v2535_v18, %v6285_v54  ;;  %v6403_v32 = vadd.f32 %v2538_v27, %v6288_v36  ;;  %v2560_v63 = vmul.f32 %v5895_v25, %v6297_v50 }
 0x1e8   :  { %v6408_v57 = vadd.f32 %v2541_v33, %v6291_v43  ;;  %v2561_v7 = vmul.f32 %v6022_v35, %v6297_v50  ;;  %v2562_v29 = vmul.f32 %v5900_v5, %v6297_v50  ;;  %v2563_v56 = vmul.f32 %v6027_v48, %v6297_v50 }
 0x1e9   :  { %v2564_v54 = vmul.f32 %v5905_v30, %v6297_v50  ;;  %v2565_v36 = vmul.f32 %v6040_v22, %v6297_v50  ;;  %v2566_v23 = vmul.f32 %v5910_v49, %v6297_v50  ;;  %v2567_v43 = vmul.f32 %v6045_v31, %v6297_v50 }
 0x1ea   :  { %v2568_v58 = vmul.f32 %v5919_v39, %v6297_v50  ;;  %v2569_v11 = vmul.f32 %v6050_v1, %v6297_v50  ;;  %v2570_v37 = vmul.f32 %v5924_v15, %v6297_v50  ;;  %v2571_v4 = vmul.f32 %v6073_v45, %v6297_v50 }
 0x1eb   :  { %v2572_v47 = vmul.f32 %v5929_v46, %v6297_v50  ;;  %v2573_v9 = vmul.f32 %v6078_v40, %v6297_v50  ;;  %v2574_v38 = vmul.f32 %v6243_v62, %v6297_v50  ;;  %v2575_v24 = vmul.f32 %v6358_v44, %v6297_v50 }
 0x1ec   :  { %v2592_v60 = vrot.slane %v2560_v63, 1  ;;  %v2593_v3 = vrot.slane %v2561_v7, 1  ;;  %v2595_v51 = vrot.slane %v2562_v29, 1  ;;  %v2596_v16 = vrot.slane %v2563_v56, 1 }
 0x1ed   :  { %v2598_v61 = vrot.slane %v2564_v54, 1  ;;  %v2599_v0 = vrot.slane %v2565_v36, 1  ;;  %v2601_v17 = vrot.slane %v2566_v23, 1  ;;  %v2602_v10 = vrot.slane %v2567_v43, 1 }
 0x1ee   :  { %v2594_v6 = vsel %vm151_vm0, %v2592_v60, %v2593_v3  ;;  %v2597_v53 = vsel %vm151_vm0, %v2595_v51, %v2596_v16  ;;  %v2604_v14 = vrot.slane %v2568_v58, 1  ;;  %v2605_v19 = vrot.slane %v2569_v11, 1 }
 0x1ef   :  { %v2600_v18 = vsel %vm151_vm0, %v2598_v61, %v2599_v0  ;;  %v2603_v50 = vsel %vm151_vm0, %v2601_v17, %v2602_v10  ;;  %v2607_v55 = vrot.slane %v2570_v37, 1  ;;  %v2608_v27 = vrot.slane %v2571_v4, 1 }
 0x1f0   :  { %v2606_v33 = vsel %vm151_vm0, %v2604_v14, %v2605_v19  ;;  %v2610_v63 = vrot.slane %v2572_v47, 1  ;;  %v2611_v7 = vrot.slane %v2573_v9, 1  ;;  %v2613_v29 = vrot.slane %v2574_v38, 1  ;;  %v7290_v9 = vld [vmem:[#allocation8_spill] sm:$0xff] }
 0x1f1   :  { %v2609_v56 = vsel %vm151_vm0, %v2607_v55, %v2608_v27  ;;  %v2614_v54 = vrot.slane %v2575_v24, 1  ;;  %v6449_v36 = vadd.f32 %v2594_v6, %v6308_v42  ;;  %v6452_v23 = vadd.f32 %v2597_v53, %v6311_v26 }
 0x1f2   :  { %v2612_v43 = vsel %vm151_vm0, %v2610_v63, %v2611_v7  ;;  %v6456_v58 = vadd.f32 %v2600_v18, %v6314_v12  ;;  %v6459_v11 = vadd.f32 %v2603_v50, %v6317_v41  ;;  %v6462_v37 = vadd.f32 %v2606_v33, %v6320_v2  ;;  %v7291_v33 = vld [vmem:[#allocation10_spill] sm:$0xff] }
 0x1f3   :  { %v2615_v4 = vsel %vm151_vm0, %v2613_v29, %v2614_v54  ;;  %v6466_v47 = vadd.f32 %v2609_v56, %v6323_v13  ;;  %v6469_v42 = vadd.f32 %v2612_v43, %v6326_v20  ;;  %v2633_v26 = vstv %s6440_s11  ;;  %v3382_v7 = vld [vmem:[%s7134_s0 + $0x2d0] sm:$0xff]  ;;  %v6512_v29 = vld [vmem:[%s7134_s0 + $0x2e0] sm:$0xff]  ;;  %v7292_v54 = vld [vmem:[#allocation11_spill] sm:$0xff] }
 0x1f4   :  { %v6473_v38 = vadd.f32 %v2615_v4, %v7290_v9  ;;  %v2634_v12 = vmul.f32 %v5895_v25, %v2633_v26  ;;  %v2635_v41 = vmul.f32 %v6022_v35, %v2633_v26  ;;  %v2636_v24 = vmul.f32 %v5900_v5, %v2633_v26  ;;  %v7293_v4 = vld [vmem:[#allocation12_spill] sm:$0xff]  ;;  %v7294_v9 = vld [vmem:[#allocation13_spill] sm:$0xff] }
 0x1f5   :  { %v2637_v2 = vmul.f32 %v6027_v48, %v2633_v26  ;;  %v2638_v60 = vmul.f32 %v5905_v30, %v2633_v26  ;;  %v2639_v13 = vmul.f32 %v6040_v22, %v2633_v26  ;;  %v2640_v3 = vmul.f32 %v5910_v49, %v2633_v26 }
 0x1f6   :  { %v2641_v20 = vmul.f32 %v6045_v31, %v2633_v26  ;;  %v2642_v51 = vmul.f32 %v5919_v39, %v2633_v26  ;;  %v2643_v16 = vmul.f32 %v6050_v1, %v2633_v26  ;;  %v2644_v25 = vmul.f32 %v5924_v15, %v2633_v26 }
 0x1f7   :  { %v2645_v35 = vmul.f32 %v6073_v45, %v2633_v26  ;;  %v2646_v5 = vmul.f32 %v5929_v46, %v2633_v26  ;;  %v2647_v48 = vmul.f32 %v6078_v40, %v2633_v26  ;;  %v2648_v30 = vmul.f32 %v6243_v62, %v2633_v26 }
 0x1f8   :  { %v2649_v49 = vmul.f32 %v6358_v44, %v2633_v26  ;;  %v2666_v22 = vrot.slane %v2634_v12, 1  ;;  %v2667_v39 = vrot.slane %v2635_v41, 1  ;;  %v2669_v31 = vrot.slane %v2636_v24, 1  ;;  %v6521_v41 = vld [vmem:[%s7134_s0 + $0x2f0] sm:$0xff]  ;;  %v6526_v24 = vld [vmem:[%s7134_s0 + $0x300] sm:$0xff] }
 0x1f9   :  { %v2670_v15 = vrot.slane %v2637_v2, 1  ;;  %v2672_v1 = vrot.slane %v2638_v60, 1  ;;  %v2673_v45 = vrot.slane %v2639_v13, 1  ;;  %v2675_v61 = vrot.slane %v2640_v3, 1  ;;  %v6531_v2 = vld [vmem:[%s7134_s0 + $0x310] sm:$0xff] }
 0x1fa   :  { %v2668_v46 = vsel %vm151_vm0, %v2666_v22, %v2667_v39  ;;  %v2676_v40 = vrot.slane %v2641_v20, 1  ;;  %v2678_v0 = vrot.slane %v2642_v51, 1  ;;  %v2679_v62 = vrot.slane %v2643_v16, 1  ;;  %v7295_v13 = vld [vmem:[#allocation14_spill] sm:$0xff]  ;;  %v7296_v20 = vld [vmem:[#allocation16_spill] sm:$0xff]  ;;  %v7297_v16 = vld [vmem:[#allocation15_spill] sm:$0xff] }
 0x1fb   :  { %v2671_v17 = vsel %vm151_vm0, %v2669_v31, %v2670_v15  ;;  %v2674_v10 = vsel %vm151_vm0, %v2672_v1, %v2673_v45  ;;  %v2681_v6 = vrot.slane %v2644_v25, 1  ;;  %v2682_v44 = vrot.slane %v2645_v35, 1  ;;  %v6540_v35 = vld [vmem:[%s7134_s0 + $0x320] sm:$0xff] }
 0x1fc   :  { %v2677_v53 = vsel %vm151_vm0, %v2675_v61, %v2676_v40  ;;  %v2680_v14 = vsel %vm151_vm0, %v2678_v0, %v2679_v62  ;;  %v2684_v19 = vrot.slane %v2646_v5, 1  ;;  %v2685_v18 = vrot.slane %v2647_v48, 1  ;;  %v6545_v5 = vld [vmem:[%s7134_s0 + $0x330] sm:$0xff]  ;;  %v6550_v48 = vld [vmem:[%s7134_s0 + $0x340] sm:$0xff] }
 0x1fd   :  { %v2683_v50 = vsel %vm151_vm0, %v2681_v6, %v2682_v44  ;;  %v2687_v55 = vrot.slane %v2648_v30, 1  ;;  %v2688_v27 = vrot.slane %v2649_v49, 1  ;;  %v6504_v63 = vadd.f32 %v2668_v46, %v7291_v33  ;;  %v7298_v30 = vld [vmem:[#allocation17_spill] sm:$0xff] }
 0x1fe   :  { %v2686_v56 = vsel %vm151_vm0, %v2684_v19, %v2685_v18  ;;  %v2699_v43 = vadd.f32 %v2671_v17, %v7292_v54  ;;  %v2700_v26 = vadd.f32 %v2674_v10, %v7293_v4  ;;  %v2701_v12 = vadd.f32 %v2677_v53, %v7294_v9 }
 0x1ff   :  { %v2689_v60 = vsel %vm151_vm0, %v2687_v55, %v2688_v27  ;;  %v2702_v3 = vadd.f32 %v2680_v14, %v7295_v13  ;;  %v2703_v51 = vadd.f32 %v2683_v50, %v7296_v20  ;;  %v2704_v25 = vadd.f32 %v2686_v56, %v7297_v16  ;;  %v3390_v16 = vld [vmem:[%s7134_s0 + $0x350] sm:$0xff] }
 0x200   :  { %v2705_v49 = vadd.f32 %v2689_v60, %v7298_v30  ;;  %v2717_v22 = vstv %s6490_s12  ;;  %v2735_v39 = vstv %s6492_s13  ;;  %v2753_v31 = vstv %s6495_s14  ;;  %s6667_s14 = sld [smem:[#allocation2 + $0x17]] }
 0x201   :  { %v2718_v15 = vmul.f32 %v3382_v7, %v2717_v22  ;;  %v2719_v1 = vmul.f32 %v6512_v29, %v2717_v22  ;;  %v2720_v45 = vmul.f32 %v6521_v41, %v2717_v22  ;;  %v2721_v61 = vmul.f32 %v6526_v24, %v2717_v22 }
 0x202   :  { %v2722_v46 = vmul.f32 %v6531_v2, %v2717_v22  ;;  %v2723_v40 = vmul.f32 %v6540_v35, %v2717_v22  ;;  %v2724_v0 = vmul.f32 %v6545_v5, %v2717_v22  ;;  %v2725_v62 = vmul.f32 %v6550_v48, %v2717_v22 }
 0x203   :  { %v2726_v17 = vadd.f32 %v2718_v15, %v6383_v34  ;;  %v2727_v10 = vadd.f32 %v2719_v1, %v6386_v21  ;;  %v2728_v6 = vadd.f32 %v2720_v45, %v6390_v59  ;;  %v2729_v44 = vadd.f32 %v2721_v61, %v6393_v52 }
 0x204   :  { %v2730_v53 = vadd.f32 %v2722_v46, %v6396_v28  ;;  %v2731_v14 = vadd.f32 %v2723_v40, %v6400_v8  ;;  %v2732_v19 = vadd.f32 %v2724_v0, %v6403_v32  ;;  %v2733_v18 = vadd.f32 %v2725_v62, %v6408_v57 }
 0x205   :  { %v2736_v50 = vmul.f32 %v3382_v7, %v2735_v39  ;;  %v2737_v34 = vmul.f32 %v6512_v29, %v2735_v39  ;;  %v2738_v21 = vmul.f32 %v6521_v41, %v2735_v39  ;;  %v2739_v59 = vmul.f32 %v6526_v24, %v2735_v39 }
 0x206   :  { %v2740_v52 = vmul.f32 %v6531_v2, %v2735_v39  ;;  %v2741_v28 = vmul.f32 %v6540_v35, %v2735_v39  ;;  %v2742_v8 = vmul.f32 %v6545_v5, %v2735_v39  ;;  %v2743_v32 = vmul.f32 %v6550_v48, %v2735_v39 }
 0x207   :  { %v2744_v57 = vadd.f32 %v2736_v50, %v6449_v36  ;;  %v2745_v55 = vadd.f32 %v2737_v34, %v6452_v23  ;;  %v2746_v27 = vadd.f32 %v2738_v21, %v6456_v58  ;;  %v2747_v33 = vadd.f32 %v2739_v59, %v6459_v11 }
 0x208   :  { %v2748_v56 = vadd.f32 %v2740_v52, %v6462_v37  ;;  %v2749_v54 = vadd.f32 %v2741_v28, %v6466_v47  ;;  %v2750_v4 = vadd.f32 %v2742_v8, %v6469_v42  ;;  %v2751_v9 = vadd.f32 %v2743_v32, %v6473_v38 }
 0x209   :  { %v2754_v60 = vmul.f32 %v3382_v7, %v2753_v31  ;;  %v2755_v13 = vmul.f32 %v6512_v29, %v2753_v31  ;;  %v2756_v36 = vmul.f32 %v6521_v41, %v2753_v31  ;;  %v2757_v23 = vmul.f32 %v6526_v24, %v2753_v31 }
 0x20a   :  { %v2758_v58 = vmul.f32 %v6531_v2, %v2753_v31  ;;  %v2759_v11 = vmul.f32 %v6540_v35, %v2753_v31  ;;  %v2760_v37 = vmul.f32 %v6545_v5, %v2753_v31  ;;  %v2761_v47 = vmul.f32 %v6550_v48, %v2753_v31 }
 0x20b   :  { %v2762_v42 = vadd.f32 %v2754_v60, %v6504_v63  ;;  %v2763_v38 = vadd.f32 %v2755_v13, %v2699_v43  ;;  %v2764_v7 = vadd.f32 %v2756_v36, %v2700_v26  ;;  %v2765_v20 = vadd.f32 %v2757_v23, %v2701_v12 }
 0x20c   :  { %v6605_v30 = vadd.f32 %v2758_v58, %v2702_v3  ;;  %v6607_v22 = vadd.f32 %v2759_v11, %v2703_v51  ;;  %v6609_v39 = vadd.f32 %v2760_v37, %v2704_v25  ;;  %v6611_v15 = vadd.f32 %v2761_v47, %v2705_v49  ;;  %v6687_v58 = vld [vmem:[%s7134_s0 + $0x4c0] sm:$0xff]  ;;  %v6692_v37 = vld [vmem:[%s7134_s0 + $0x4d0] sm:$0xff] }
 0x20d   :  { %v2771_v1 = vstv %s6571_s29  ;;  %v2789_v45 = vstv %s6573_s30  ;;  %v2807_v31 = vstv %s6578_s4  ;;  %v6617_v61 = vstv %s6580_s5 }
 0x20e   :  { %v2772_v63 = vmul.f32 %v6512_v29, %v2771_v1  ;;  %v2773_v43 = vmul.f32 %v6521_v41, %v2771_v1  ;;  %v2774_v26 = vmul.f32 %v6526_v24, %v2771_v1  ;;  %v2775_v12 = vmul.f32 %v6531_v2, %v2771_v1  ;;  %v6697_v47 = vld [vmem:[%s7134_s0 + $0x4e0] sm:$0xff] }
 0x20f   :  { %v2776_v3 = vmul.f32 %v6540_v35, %v2771_v1  ;;  %v2777_v51 = vmul.f32 %v6545_v5, %v2771_v1  ;;  %v2778_v25 = vmul.f32 %v6550_v48, %v2771_v1  ;;  %v2779_v49 = vmul.f32 %v3390_v16, %v2771_v1 }
 0x210   :  { %v2780_v46 = vadd.f32 %v2772_v63, %v2726_v17  ;;  %v2781_v40 = vadd.f32 %v2773_v43, %v2727_v10  ;;  %v2782_v0 = vadd.f32 %v2774_v26, %v2728_v6  ;;  %v2783_v62 = vadd.f32 %v2775_v12, %v2729_v44 }
 0x211   :  { %v2784_v50 = vadd.f32 %v2776_v3, %v2730_v53  ;;  %v2785_v34 = vadd.f32 %v2777_v51, %v2731_v14  ;;  %v2786_v21 = vadd.f32 %v2778_v25, %v2732_v19  ;;  %v2787_v59 = vadd.f32 %v2779_v49, %v2733_v18 }
 0x212   :  { %v2790_v52 = vmul.f32 %v6512_v29, %v2789_v45  ;;  %v2791_v28 = vmul.f32 %v6521_v41, %v2789_v45  ;;  %v2792_v8 = vmul.f32 %v6526_v24, %v2789_v45  ;;  %v2793_v32 = vmul.f32 %v6531_v2, %v2789_v45 }
 0x213   :  { %v2794_v60 = vmul.f32 %v6540_v35, %v2789_v45  ;;  %v2795_v13 = vmul.f32 %v6545_v5, %v2789_v45  ;;  %v2796_v17 = vmul.f32 %v6550_v48, %v2789_v45  ;;  %v2797_v10 = vmul.f32 %v3390_v16, %v2789_v45 }
 0x214   :  { %v6633_v6 = vadd.f32 %v2790_v52, %v2744_v57  ;;  %v6635_v44 = vadd.f32 %v2791_v28, %v2745_v55  ;;  %v6637_v53 = vadd.f32 %v2792_v8, %v2746_v27  ;;  %v6639_v14 = vadd.f32 %v2793_v32, %v2747_v33 }
 0x215   :  { %v6641_v19 = vadd.f32 %v2794_v60, %v2748_v56  ;;  %v6643_v18 = vadd.f32 %v2795_v13, %v2749_v54  ;;  %v6645_v36 = vadd.f32 %v2796_v17, %v2750_v4  ;;  %v6647_v23 = vadd.f32 %v2797_v10, %v2751_v9  ;;  %v6660_v56 = vld [vmem:[%s7134_s0 + $0x480] sm:$0xff]  ;;  %v6665_v54 = vld [vmem:[%s7134_s0 + $0x490] sm:$0xff] }
 0x216   :  { %v2808_v57 = vmul.f32 %v6512_v29, %v2807_v31  ;;  %v2809_v55 = vmul.f32 %v6521_v41, %v2807_v31  ;;  %v2810_v27 = vmul.f32 %v6526_v24, %v2807_v31  ;;  %v2811_v33 = vmul.f32 %v6531_v2, %v2807_v31  ;;  %v6677_v4 = vld [vmem:[%s7134_s0 + $0x4a0] sm:$0xff]  ;;  %v6682_v9 = vld [vmem:[%s7134_s0 + $0x4b0] sm:$0xff] }
 0x217   :  { %v2812_v29 = vmul.f32 %v6540_v35, %v2807_v31  ;;  %v2813_v41 = vmul.f32 %v6545_v5, %v2807_v31  ;;  %v2814_v24 = vmul.f32 %v6550_v48, %v2807_v31  ;;  %v2815_v2 = vmul.f32 %v3390_v16, %v2807_v31  ;;  %v6702_v16 = vld [vmem:[%s7134_s0 + $0x4f0] sm:$0xff] }
 0x218   :  { %v2816_v35 = vadd.f32 %v2808_v57, %v2762_v42  ;;  %v2817_v5 = vadd.f32 %v2809_v55, %v2763_v38  ;;  %v2818_v11 = vadd.f32 %v2810_v27, %v2764_v7  ;;  %v2819_v48 = vadd.f32 %v2811_v33, %v2765_v20 }
 0x219   :  { %v2820_v42 = vadd.f32 %v2812_v29, %v6605_v30  ;;  %v2821_v38 = vadd.f32 %v2813_v41, %v6607_v22  ;;  %v2822_v7 = vadd.f32 %v2814_v24, %v6609_v39  ;;  %v2823_v20 = vadd.f32 %v2815_v2, %v6611_v15  ;;  %v6799_v24 = vld [vmem:[%s7134_s0 + $0x4a8] sm:$0x1]  ;;  %v6804_v2 = vld [vmem:[%s7134_s0 + $0x4b8] sm:$0x1] }
 0x21a   :  { %v2843_v1 = vmul.f32 %v6660_v56, %v6617_v61  ;;  %v2844_v45 = vmul.f32 %v6665_v54, %v6617_v61  ;;  %v2845_v31 = vmul.f32 %v6677_v4, %v6617_v61  ;;  %v2846_v30 = vmul.f32 %v6682_v9, %v6617_v61 }
 0x21b   :  { %v2847_v22 = vmul.f32 %v6687_v58, %v6617_v61  ;;  %v2848_v39 = vmul.f32 %v6692_v37, %v6617_v61  ;;  %v2849_v15 = vmul.f32 %v6697_v47, %v6617_v61  ;;  %v2850_v63 = vmul.f32 %v6702_v16, %v6617_v61 }
 0x21c   :  { %v6724_v43 = vadd.f32 %v2843_v1, %v2780_v46  ;;  %v6726_v26 = vadd.f32 %v2844_v45, %v2781_v40  ;;  %v6728_v12 = vadd.f32 %v2845_v31, %v2782_v0  ;;  %v6730_v3 = vadd.f32 %v2846_v30, %v2783_v62 }
 0x21d   :  { %v6732_v51 = vadd.f32 %v2847_v22, %v2784_v50  ;;  %v6734_v25 = vadd.f32 %v2848_v39, %v2785_v34  ;;  %v6736_v49 = vadd.f32 %v2849_v15, %v2786_v21  ;;  %v6738_v52 = vadd.f32 %v2850_v63, %v2787_v59  ;;  %v6817_v22 = vld [vmem:[%s7134_s0 + $0x4c8] sm:$0x1]  ;;  %v6822_v39 = vld [vmem:[%s7134_s0 + $0x4d8] sm:$0x1] }
 0x21e   :  { %v2860_v28 = vstv %s6649_s8  ;;  %v2878_v8 = vstv %s6651_s9  ;;  %v2896_v32 = vstv %s6667_s14  ;;  %v6744_v61 = vstv %s6669_s15  ;;  %s6922_s15 = sld [smem:[#allocation2 + $0x4d]] }
 0x21f   :  { %v2861_v46 = vmul.f32 %v6660_v56, %v2860_v28  ;;  %v2862_v40 = vmul.f32 %v6665_v54, %v2860_v28  ;;  %v2863_v0 = vmul.f32 %v6677_v4, %v2860_v28  ;;  %v2864_v62 = vmul.f32 %v6682_v9, %v2860_v28  ;;  %v6840_v63 = vld [vmem:[%s7134_s0 + $0x4f8] sm:$0x1] }
 0x220   :  { %v2865_v50 = vmul.f32 %v6687_v58, %v2860_v28  ;;  %v2866_v34 = vmul.f32 %v6692_v37, %v2860_v28  ;;  %v2867_v21 = vmul.f32 %v6697_v47, %v2860_v28  ;;  %v2868_v59 = vmul.f32 %v6702_v16, %v2860_v28 }
 0x221   :  { %v6755_v60 = vadd.f32 %v2861_v46, %v6633_v6  ;;  %v6758_v13 = vadd.f32 %v2862_v40, %v6635_v44  ;;  %v6761_v17 = vadd.f32 %v2863_v0, %v6637_v53  ;;  %v6764_v10 = vadd.f32 %v2864_v62, %v6639_v14 }
 0x222   :  { %v6767_v57 = vadd.f32 %v2865_v50, %v6641_v19  ;;  %v6770_v55 = vadd.f32 %v2866_v34, %v6643_v18  ;;  %v6773_v27 = vadd.f32 %v2867_v21, %v6645_v36  ;;  %v6776_v6 = vadd.f32 %v2868_v59, %v6647_v23  ;;  %v6785_v19 = vld [vmem:[%s7134_s0 + $0x488] sm:$0x1]  ;;  %v6790_v18 = vld [vmem:[%s7134_s0 + $0x498] sm:$0x1] }
 0x223   :  { %v2879_v44 = vmul.f32 %v6660_v56, %v2878_v8  ;;  %v2880_v53 = vmul.f32 %v6665_v54, %v2878_v8  ;;  %v2881_v33 = vmul.f32 %v6677_v4, %v2878_v8  ;;  %v2882_v14 = vmul.f32 %v6682_v9, %v2878_v8 }
 0x224   :  { %7299 = vst [vmem:[#allocation9_spill] sm:$0xff] %v6776_v6  ;;  %v2883_v36 = vmul.f32 %v6687_v58, %v2878_v8  ;;  %v2884_v23 = vmul.f32 %v6692_v37, %v2878_v8  ;;  %v2885_v29 = vmul.f32 %v6697_v47, %v2878_v8  ;;  %v2886_v41 = vmul.f32 %v6702_v16, %v2878_v8 }
 0x225   :  { %v6806_v1 = vadd.f32 %v2879_v44, %v2816_v35  ;;  %v6808_v45 = vadd.f32 %v2880_v53, %v2817_v5  ;;  %v6810_v31 = vadd.f32 %v2881_v33, %v2818_v11  ;;  %v6812_v30 = vadd.f32 %v2882_v14, %v2819_v48  ;;  %v6835_v48 = vld [vmem:[%s7134_s0 + $0x4e8] sm:$0x1] }
 0x226   :  { %v6824_v15 = vadd.f32 %v2883_v36, %v2820_v42  ;;  %v6826_v35 = vadd.f32 %v2884_v23, %v2821_v38  ;;  %v6828_v5 = vadd.f32 %v2885_v29, %v2822_v7  ;;  %v6830_v11 = vadd.f32 %v2886_v41, %v2823_v20 }
 0x227   :  { %7300 = vst [vmem:[#allocation18_spill] sm:$0xff] %v6806_v1  ;;  %7301 = vst [vmem:[#allocation8_spill] sm:$0xff] %v6808_v45  ;;  %v2897_v28 = vmul.f32 %v6660_v56, %v2896_v32  ;;  %v2898_v42 = vmul.f32 %v6785_v19, %v2896_v32  ;;  %v2899_v38 = vmul.f32 %v6665_v54, %v2896_v32 }
 0x228   :  { %7302 = vst [vmem:[#allocation10_spill] sm:$0xff] %v6810_v31  ;;  %7303 = vst [vmem:[#allocation11_spill] sm:$0xff] %v6812_v30  ;;  %v2900_v7 = vmul.f32 %v6790_v18, %v2896_v32  ;;  %v2901_v20 = vmul.f32 %v6677_v4, %v2896_v32  ;;  %v2902_v8 = vmul.f32 %v6799_v24, %v2896_v32 }
 0x229   :  { %7304 = vst [vmem:[#allocation12_spill] sm:$0xff] %v6824_v15  ;;  %7305 = vst [vmem:[#allocation13_spill] sm:$0xff] %v6826_v35  ;;  %v2903_v46 = vmul.f32 %v6682_v9, %v2896_v32  ;;  %v2904_v40 = vmul.f32 %v6804_v2, %v2896_v32  ;;  %v2905_v0 = vmul.f32 %v6687_v58, %v2896_v32  ;;  %v2929_v33 = vrot.slane %v2897_v28, 1 }
 0x22a   :  { %7306 = vst [vmem:[#allocation14_spill] sm:$0xff] %v6828_v5  ;;  %7307 = vst [vmem:[#allocation16_spill] sm:$0xff] %v6830_v11  ;;  %v2906_v62 = vmul.f32 %v6817_v22, %v2896_v32  ;;  %v2907_v50 = vmul.f32 %v6692_v37, %v2896_v32  ;;  %v2908_v34 = vmul.f32 %v6822_v39, %v2896_v32  ;;  %v2930_v14 = vrot.slane %v2898_v42, 1 }
 0x22b   :  { %v2909_v21 = vmul.f32 %v6697_v47, %v2896_v32  ;;  %v2910_v59 = vmul.f32 %v6835_v48, %v2896_v32  ;;  %v2911_v44 = vmul.f32 %v6702_v16, %v2896_v32  ;;  %v2912_v53 = vmul.f32 %v6840_v63, %v2896_v32 }
 0x22c   :  { %v2932_v36 = vrot.slane %v2899_v38, 1  ;;  %v2933_v23 = vrot.slane %v2900_v7, 1  ;;  %v2935_v29 = vrot.slane %v2901_v20, 1  ;;  %v2936_v41 = vrot.slane %v2902_v8, 1 }
 0x22d   :  { %v2938_v11 = vrot.slane %v2903_v46, 1  ;;  %v2939_v5 = vrot.slane %v2904_v40, 1  ;;  %v2931_v35 = vsel %vm151_vm0, %v2929_v33, %v2930_v14  ;;  %v2941_v30 = vrot.slane %v2905_v0, 1 }
 0x22e   :  { %v2934_v15 = vsel %vm151_vm0, %v2932_v36, %v2933_v23  ;;  %v2942_v31 = vrot.slane %v2906_v62, 1  ;;  %v2937_v45 = vsel %vm151_vm0, %v2935_v29, %v2936_v41  ;;  %v2944_v6 = vrot.slane %v2907_v50, 1 }
 0x22f   :  { %v2940_v1 = vsel %vm151_vm0, %v2938_v11, %v2939_v5  ;;  %v2945_v32 = vrot.slane %v2908_v34, 1  ;;  %v2947_v42 = vrot.slane %v2909_v21, 1  ;;  %v2948_v38 = vrot.slane %v2910_v59, 1 }
 0x230   :  { %v2943_v28 = vsel %vm151_vm0, %v2941_v30, %v2942_v31  ;;  %v2950_v7 = vrot.slane %v2911_v44, 1  ;;  %v2951_v8 = vrot.slane %v2912_v53, 1  ;;  %v6865_v46 = vadd.f32 %v2931_v35, %v6724_v43 }
 0x231   :  { %v2946_v20 = vsel %vm151_vm0, %v2944_v6, %v2945_v32  ;;  %v6868_v40 = vadd.f32 %v2934_v15, %v6726_v26  ;;  %v2949_v0 = vsel %vm151_vm0, %v2947_v42, %v2948_v38  ;;  %v6872_v5 = vadd.f32 %v2937_v45, %v6728_v12 }
 0x232   :  { %v6875_v11 = vadd.f32 %v2940_v1, %v6730_v3  ;;  %v6878_v31 = vadd.f32 %v2943_v28, %v6732_v51  ;;  %v2952_v6 = vsel %vm151_vm0, %v2950_v7, %v2951_v8  ;;  %v6882_v30 = vadd.f32 %v2946_v20, %v6734_v25 }
 0x233   :  { %v6885_v43 = vadd.f32 %v2949_v0, %v6736_v49  ;;  %v2971_v26 = vmul.f32 %v6660_v56, %v6744_v61  ;;  %v6890_v12 = vadd.f32 %v2952_v6, %v6738_v52  ;;  %v2972_v3 = vmul.f32 %v6785_v19, %v6744_v61 }
 0x234   :  { %v2973_v51 = vmul.f32 %v6665_v54, %v6744_v61  ;;  %v2974_v1 = vmul.f32 %v6790_v18, %v6744_v61  ;;  %v2975_v25 = vmul.f32 %v6677_v4, %v6744_v61  ;;  %v2976_v49 = vmul.f32 %v6799_v24, %v6744_v61 }
 0x235   :  { %v2977_v45 = vmul.f32 %v6682_v9, %v6744_v61  ;;  %v2978_v52 = vmul.f32 %v6804_v2, %v6744_v61  ;;  %v2979_v15 = vmul.f32 %v6687_v58, %v6744_v61  ;;  %v2980_v35 = vmul.f32 %v6817_v22, %v6744_v61 }
 0x236   :  { %v2981_v62 = vmul.f32 %v6692_v37, %v6744_v61  ;;  %v2982_v50 = vmul.f32 %v6822_v39, %v6744_v61  ;;  %v2983_v34 = vmul.f32 %v6697_v47, %v6744_v61  ;;  %v2984_v21 = vmul.f32 %v6835_v48, %v6744_v61 }
 0x237   :  { %v2985_v59 = vmul.f32 %v6702_v16, %v6744_v61  ;;  %v2986_v44 = vmul.f32 %v6840_v63, %v6744_v61  ;;  %v3003_v53 = vrot.slane %v2971_v26, 1  ;;  %v3004_v33 = vrot.slane %v2972_v3, 1 }
 0x238   :  { %v3006_v14 = vrot.slane %v2973_v51, 1  ;;  %v3007_v36 = vrot.slane %v2974_v1, 1  ;;  %v3009_v23 = vrot.slane %v2975_v25, 1  ;;  %v3010_v29 = vrot.slane %v2976_v49, 1 }
 0x239   :  { %v3012_v41 = vrot.slane %v2977_v45, 1  ;;  %v3013_v32 = vrot.slane %v2978_v52, 1  ;;  %v3005_v28 = vsel %vm151_vm0, %v3003_v53, %v3004_v33  ;;  %v3015_v38 = vrot.slane %v2979_v15, 1 }
 0x23a   :  { %v3008_v42 = vsel %vm151_vm0, %v3006_v14, %v3007_v36  ;;  %v3016_v7 = vrot.slane %v2980_v35, 1  ;;  %v3011_v20 = vsel %vm151_vm0, %v3009_v23, %v3010_v29  ;;  %v3018_v8 = vrot.slane %v2981_v62, 1 }
 0x23b   :  { %v3014_v61 = vsel %vm151_vm0, %v3012_v41, %v3013_v32  ;;  %v3019_v0 = vrot.slane %v2982_v50, 1  ;;  %v3021_v26 = vrot.slane %v2983_v34, 1  ;;  %v3022_v3 = vrot.slane %v2984_v21, 1  ;;  %v7308_v21 = vld [vmem:[#allocation9_spill] sm:$0xff] }
 0x23c   :  { %v3017_v6 = vsel %vm151_vm0, %v3015_v38, %v3016_v7  ;;  %v3024_v51 = vrot.slane %v2985_v59, 1  ;;  %v3025_v25 = vrot.slane %v2986_v44, 1  ;;  %v6931_v49 = vadd.f32 %v3005_v28, %v6755_v60 }
 0x23d   :  { %v3020_v1 = vsel %vm151_vm0, %v3018_v8, %v3019_v0  ;;  %v6934_v45 = vadd.f32 %v3008_v42, %v6758_v13  ;;  %v3023_v52 = vsel %vm151_vm0, %v3021_v26, %v3022_v3  ;;  %v6938_v15 = vadd.f32 %v3011_v20, %v6761_v17  ;;  %v3419_v3 = vld [vmem:[%s7134_s0 + $0x630] sm:$0xff] }
 0x23e   :  { %v6941_v35 = vadd.f32 %v3014_v61, %v6764_v10  ;;  %v6944_v62 = vadd.f32 %v3017_v6, %v6767_v57  ;;  %v3026_v50 = vsel %vm151_vm0, %v3024_v51, %v3025_v25  ;;  %v6948_v34 = vadd.f32 %v3020_v1, %v6770_v55  ;;  %v7309_v6 = vld [vmem:[#allocation18_spill] sm:$0xff]  ;;  %v3420_v51 = vld [vmem:[%s7134_s0 + $0x640] sm:$0xff] }
 0x23f   :  { %v6951_v60 = vadd.f32 %v3023_v52, %v6773_v27  ;;  %v3044_v13 = vstv %s6922_s15  ;;  %v6955_v59 = vadd.f32 %v3026_v50, %v7308_v21  ;;  %v7310_v25 = vld [vmem:[#allocation8_spill] sm:$0xff]  ;;  %v7311_v50 = vld [vmem:[#allocation10_spill] sm:$0xff]  ;;  %v7312_v21 = vld [vmem:[#allocation11_spill] sm:$0xff] }
 0x240   :  { %v3045_v17 = vmul.f32 %v6660_v56, %v3044_v13  ;;  %v3046_v10 = vmul.f32 %v6785_v19, %v3044_v13  ;;  %v3047_v44 = vmul.f32 %v6665_v54, %v3044_v13  ;;  %v3048_v57 = vmul.f32 %v6790_v18, %v3044_v13 }
 0x241   :  { %v3049_v53 = vmul.f32 %v6677_v4, %v3044_v13  ;;  %v3050_v55 = vmul.f32 %v6799_v24, %v3044_v13  ;;  %v3051_v33 = vmul.f32 %v6682_v9, %v3044_v13  ;;  %v3052_v27 = vmul.f32 %v6804_v2, %v3044_v13 }
 0x242   :  { %v3053_v14 = vmul.f32 %v6687_v58, %v3044_v13  ;;  %v3054_v36 = vmul.f32 %v6817_v22, %v3044_v13  ;;  %v3055_v56 = vmul.f32 %v6692_v37, %v3044_v13  ;;  %v3056_v19 = vmul.f32 %v6822_v39, %v3044_v13 }
 0x243   :  { %v3057_v54 = vmul.f32 %v6697_v47, %v3044_v13  ;;  %v3058_v18 = vmul.f32 %v6835_v48, %v3044_v13  ;;  %v3059_v4 = vmul.f32 %v6702_v16, %v3044_v13  ;;  %v3060_v9 = vmul.f32 %v6840_v63, %v3044_v13 }
 0x244   :  { %v3077_v24 = vrot.slane %v3045_v17, 1  ;;  %v3078_v58 = vrot.slane %v3046_v10, 1  ;;  %v3080_v2 = vrot.slane %v3047_v44, 1  ;;  %v3081_v37 = vrot.slane %v3048_v57, 1  ;;  %v3421_v10 = vld [vmem:[%s7134_s0 + $0x650] sm:$0xff]  ;;  %v3422_v44 = vld [vmem:[%s7134_s0 + $0x660] sm:$0xff] }
 0x245   :  { %v3083_v22 = vrot.slane %v3049_v53, 1  ;;  %v3084_v39 = vrot.slane %v3050_v55, 1  ;;  %v3086_v23 = vrot.slane %v3051_v33, 1  ;;  %v3087_v48 = vrot.slane %v3052_v27, 1  ;;  %v3423_v57 = vld [vmem:[%s7134_s0 + $0x670] sm:$0xff]  ;;  %v7313_v55 = vld [vmem:[#allocation12_spill] sm:$0xff] }
 0x246   :  { %v3079_v47 = vsel %vm151_vm0, %v3077_v24, %v3078_v58  ;;  %v3089_v29 = vrot.slane %v3053_v14, 1  ;;  %v3090_v16 = vrot.slane %v3054_v36, 1  ;;  %v3082_v41 = vsel %vm151_vm0, %v3080_v2, %v3081_v37  ;;  %v7314_v27 = vld [vmem:[#allocation13_spill] sm:$0xff]  ;;  %v7315_v36 = vld [vmem:[#allocation14_spill] sm:$0xff] }
 0x247   :  { %v3085_v32 = vsel %vm151_vm0, %v3083_v22, %v3084_v39  ;;  %v3092_v28 = vrot.slane %v3055_v56, 1  ;;  %v3093_v63 = vrot.slane %v3056_v19, 1  ;;  %v3088_v42 = vsel %vm151_vm0, %v3086_v23, %v3087_v48  ;;  %v3424_v19 = vld [vmem:[%s7134_s0 + $0x680] sm:$0xff] }
 0x248   :  { %v3091_v38 = vsel %vm151_vm0, %v3089_v29, %v3090_v16  ;;  %v3095_v7 = vrot.slane %v3057_v54, 1  ;;  %v3096_v20 = vrot.slane %v3058_v18, 1  ;;  %v3098_v8 = vrot.slane %v3059_v4, 1  ;;  %v3425_v54 = vld [vmem:[%s7134_s0 + $0x690] sm:$0xff]  ;;  %v3426_v18 = vld [vmem:[%s7134_s0 + $0x6a0] sm:$0xff] }
 0x249   :  { %v3094_v61 = vsel %vm151_vm0, %v3092_v28, %v3093_v63  ;;  %v3099_v0 = vrot.slane %v3060_v9, 1  ;;  %v3109_v26 = vadd.f32 %v3079_v47, %v7309_v6  ;;  %v3110_v52 = vadd.f32 %v3082_v41, %v7310_v25  ;;  %v7316_v4 = vld [vmem:[#allocation16_spill] sm:$0xff] }
 0x24a   :  { %v3097_v1 = vsel %vm151_vm0, %v3095_v7, %v3096_v20  ;;  %v3111_v13 = vadd.f32 %v3085_v32, %v7311_v50  ;;  %v3112_v17 = vadd.f32 %v3088_v42, %v7312_v21  ;;  %v3113_v33 = vadd.f32 %v3091_v38, %v7313_v55 }
 0x24b   :  { %v3100_v53 = vsel %vm151_vm0, %v3098_v8, %v3099_v0  ;;  %v3114_v14 = vadd.f32 %v3094_v61, %v7314_v27  ;;  %v3115_v56 = vadd.f32 %v3097_v1, %v7315_v36  ;;  %v3127_v24 = vstv %s6972_s16 }
 0x24c   :  { %v3116_v9 = vadd.f32 %v3100_v53, %v7316_v4  ;;  %v3145_v58 = vstv %s6974_s17  ;;  %v3163_v2 = vstv %s6977_s18  ;;  %v3128_v37 = vmul.f32 %v3419_v3, %v3127_v24 }
 0x24d   :  { %v3129_v22 = vmul.f32 %v3420_v51, %v3127_v24  ;;  %v3130_v39 = vmul.f32 %v3421_v10, %v3127_v24  ;;  %v3131_v23 = vmul.f32 %v3422_v44, %v3127_v24  ;;  %v3132_v47 = vmul.f32 %v3423_v57, %v3127_v24 }
 0x24e   :  { %v3133_v48 = vmul.f32 %v3424_v19, %v3127_v24  ;;  %v3134_v29 = vmul.f32 %v3425_v54, %v3127_v24  ;;  %v3135_v16 = vmul.f32 %v3426_v18, %v3127_v24  ;;  %v3136_v41 = vadd.f32 %v3128_v37, %v6865_v46 }
 0x24f   :  { %v3137_v32 = vadd.f32 %v3129_v22, %v6868_v40  ;;  %v3138_v28 = vadd.f32 %v3130_v39, %v6872_v5  ;;  %v3139_v63 = vadd.f32 %v3131_v23, %v6875_v11  ;;  %v3140_v42 = vadd.f32 %v3132_v47, %v6878_v31 }
 0x250   :  { %v3141_v38 = vadd.f32 %v3133_v48, %v6882_v30  ;;  %v3142_v7 = vadd.f32 %v3134_v29, %v6885_v43  ;;  %v3143_v20 = vadd.f32 %v3135_v16, %v6890_v12  ;;  %v3146_v61 = vmul.f32 %v3419_v3, %v3145_v58  ;;  %3181 = vst.msk [vmem:[%s7137_s3] sm:$0xff] %vm3180_vm1, %v3136_v41 }
 0x251   :  { %v3147_v8 = vmul.f32 %v3420_v51, %v3145_v58  ;;  %v3148_v0 = vmul.f32 %v3421_v10, %v3145_v58  ;;  %v3149_v6 = vmul.f32 %v3422_v44, %v3145_v58  ;;  %v3150_v1 = vmul.f32 %v3423_v57, %v3145_v58  ;;  %3182 = vst.msk [vmem:[%s7137_s3 + $0x8] sm:$0xff] %vm3180_vm1, %v3137_v32 }
 0x252   :  { %v3151_v46 = vmul.f32 %v3424_v19, %v3145_v58  ;;  %v3152_v25 = vmul.f32 %v3425_v54, %v3145_v58  ;;  %v3153_v40 = vmul.f32 %v3426_v18, %v3145_v58  ;;  %v3154_v5 = vadd.f32 %v3146_v61, %v6931_v49  ;;  %3183 = vst.msk [vmem:[%s7137_s3 + $0x10] sm:$0xff] %vm3180_vm1, %v3138_v28 }
 0x253   :  { %v3155_v11 = vadd.f32 %v3147_v8, %v6934_v45  ;;  %v3156_v31 = vadd.f32 %v3148_v0, %v6938_v15  ;;  %v3157_v30 = vadd.f32 %v3149_v6, %v6941_v35  ;;  %v3158_v43 = vadd.f32 %v3150_v1, %v6944_v62  ;;  %3184 = vst.msk [vmem:[%s7137_s3 + $0x18] sm:$0xff] %vm3180_vm1, %v3139_v63 }
 0x254   :  { %v3159_v12 = vadd.f32 %v3151_v46, %v6948_v34  ;;  %v3160_v50 = vadd.f32 %v3152_v25, %v6951_v60  ;;  %v3161_v21 = vadd.f32 %v3153_v40, %v6955_v59  ;;  %v3164_v53 = vmul.f32 %v3419_v3, %v3163_v2  ;;  %3185 = vst.msk [vmem:[%s7137_s3 + $0x20] sm:$0xff] %vm3180_vm1, %v3140_v42 }
 0x255   :  { %v3165_v55 = vmul.f32 %v3420_v51, %v3163_v2  ;;  %v3166_v27 = vmul.f32 %v3421_v10, %v3163_v2  ;;  %v3167_v36 = vmul.f32 %v3422_v44, %v3163_v2  ;;  %v3168_v4 = vmul.f32 %v3423_v57, %v3163_v2  ;;  %3186 = vst.msk [vmem:[%s7137_s3 + $0x28] sm:$0xff] %vm3180_vm1, %v3141_v38 }
 0x256   :  { %v3169_v49 = vmul.f32 %v3424_v19, %v3163_v2  ;;  %v3170_v24 = vmul.f32 %v3425_v54, %v3163_v2  ;;  %v3171_v45 = vmul.f32 %v3426_v18, %v3163_v2  ;;  %v3172_v58 = vadd.f32 %v3164_v53, %v3109_v26  ;;  %3187 = vst.msk [vmem:[%s7137_s3 + $0x30] sm:$0xff] %vm3180_vm1, %v3142_v7 }
 0x257   :  { %v3173_v15 = vadd.f32 %v3165_v55, %v3110_v52  ;;  %v3174_v37 = vadd.f32 %v3166_v27, %v3111_v13  ;;  %v3175_v35 = vadd.f32 %v3167_v36, %v3112_v17  ;;  %v3176_v22 = vadd.f32 %v3168_v4, %v3113_v33  ;;  %3188 = vst.msk [vmem:[%s7137_s3 + $0x38] sm:$0xff] %vm3180_vm1, %v3143_v20 }
 0x258   :  { %v3177_v62 = vadd.f32 %v3169_v49, %v3114_v14  ;;  %v3178_v39 = vadd.f32 %v3170_v24, %v3115_v56  ;;  %v3179_v34 = vadd.f32 %v3171_v45, %v3116_v9  ;;  %3430 = vst.msk [vmem:[%s7137_s3 + $0x40] sm:$0xff] %vm3180_vm1, %v3154_v5  ;;  %3431 = vst.msk [vmem:[%s7137_s3 + $0x48] sm:$0xff] %vm3180_vm1, %v3155_v11 }
 0x259   :  { %3432 = vst.msk [vmem:[%s7137_s3 + $0x50] sm:$0xff] %vm3180_vm1, %v3156_v31  ;;  %3433 = vst.msk [vmem:[%s7137_s3 + $0x58] sm:$0xff] %vm3180_vm1, %v3157_v30 }
 0x25a   :  { %3434 = vst.msk [vmem:[%s7137_s3 + $0x60] sm:$0xff] %vm3180_vm1, %v3158_v43  ;;  %3435 = vst.msk [vmem:[%s7137_s3 + $0x68] sm:$0xff] %vm3180_vm1, %v3159_v12 }
 0x25b   :  { %3436 = vst.msk [vmem:[%s7137_s3 + $0x70] sm:$0xff] %vm3180_vm1, %v3160_v50  ;;  %3437 = vst.msk [vmem:[%s7137_s3 + $0x78] sm:$0xff] %vm3180_vm1, %v3161_v21 }
 0x25c   :  { %3438 = vst.msk [vmem:[%s7137_s3 + $0x80] sm:$0xff] %vm3180_vm1, %v3172_v58  ;;  %3439 = vst.msk [vmem:[%s7137_s3 + $0x88] sm:$0xff] %vm3180_vm1, %v3173_v15 }
 0x25d   :  { %3440 = vst.msk [vmem:[%s7137_s3 + $0x90] sm:$0xff] %vm3180_vm1, %v3174_v37  ;;  %3441 = vst.msk [vmem:[%s7137_s3 + $0x98] sm:$0xff] %vm3180_vm1, %v3175_v35 }
 0x25e   :  { %3442 = vst.msk [vmem:[%s7137_s3 + $0xa0] sm:$0xff] %vm3180_vm1, %v3176_v22  ;;  %3443 = vst.msk [vmem:[%s7137_s3 + $0xa8] sm:$0xff] %vm3180_vm1, %v3177_v62 }
 0x25f   :  { %3444 = vst.msk [vmem:[%s7137_s3 + $0xb0] sm:$0xff] %vm3180_vm1, %v3178_v39  ;;  %3445 = vst.msk [vmem:[%s7137_s3 + $0xb8] sm:$0xff] %vm3180_vm1, %v3179_v34 }
 0x260   :  { %3211 = vsyncpa [#allocation3], 1 }
 0x261   :  { %3212 = vsyncpa [#allocation5], 1 }

</bundles_post_ra>
